<compile_context>
chip_gen: v5e
topology: v5e:2x2
jax: 0.10.0
libtpu: 0.0.40
codegen_flags: <defaults>
</compile_context>

<pallas_src>
import jax
import jax.numpy as jnp
from jax.experimental import pallas as pl
from jax.experimental.pallas import tpu as pltpu

NUM_LAYERS = 3


def _gru3_kernel(x_ref,
                 wih0_ref, whh0_ref, bi0_ref, bhn0_ref,
                 wih1_ref, whh1_ref, bi1_ref, bhn1_ref,
                 wih2_ref, whh2_ref, bi2_ref, bhn2_ref,
                 y_ref, hn_ref,
                 gi_scr, a1_scr, a2_scr, y_scr):
    """Fused 3-layer GRU forward. Single invocation; everything resident in VMEM."""
    Bp, T, Dp = x_ref.shape        # padded batch (>=8), timesteps, padded in_dim
    Hp = whh0_ref.shape[0]         # padded hidden (multiple of 128)
    B, _, H = y_ref.shape          # true (unpadded) output dims

    def run_layer(x2d, wih_ref, whh_ref, bi_ref, bhn_ref, out_ref):
        # x2d: (T*Bp, Din) bf16 time-major rows.  out_ref: (T, Bp, Hp) VMEM ref.
        # Hoisted, gate-fused input projection for ALL timesteps: one
        # (T*Bp, Din) @ (Din, 3Hp) MXU matmul off the serial path; bias
        # (b_ih + b_hh for r/z, b_ih for n) pre-folded.
        gi = jnp.dot(x2d, wih_ref[...],
                     preferred_element_type=jnp.float32) + bi_ref[...]
        gi_scr[...] = gi.reshape(T, Bp, 3 * Hp)

        whh = whh_ref[...]                                  # (Hp, 3Hp) bf16, resident
        bhn = jnp.broadcast_to(bhn_ref[...], (Bp, Hp))      # hoisted out of the loop

        def step(t, h):
            # Only the h-dependent (Bp,Hp) @ (Hp,3Hp) matmul is on the serial
            # chain; gate slices are 128-lane aligned since Hp % 128 == 0.
            gh = jnp.dot(h.astype(jnp.bfloat16), whh,
                         preferred_element_type=jnp.float32)          # (Bp, 3Hp)
            g = gi_scr[t]                                              # (Bp, 3Hp)
            r = jax.nn.sigmoid(g[:, :Hp] + gh[:, :Hp])
            z = jax.nn.sigmoid(g[:, Hp:2 * Hp] + gh[:, Hp:2 * Hp])
            n = jnp.tanh(g[:, 2 * Hp:] + r * (gh[:, 2 * Hp:] + bhn))
            h_new = n + z * (h - n)                # == (1-z)*n + z*h, f32 gate math
            out_ref[t] = h_new.astype(out_ref.dtype)
            return h_new

        h0 = jnp.zeros((Bp, Hp), jnp.float32)
        # Partial unroll gives the scheduler several steps of EUP/VPU/load/store
        # work to overlap; full unroll for short sequences.
        return jax.lax.fori_loop(0, T, step, h0, unroll=min(T, 8))

    # Single in-VMEM relayout of the batch-first input to time-major rows
    # (avoids an HBM transpose pass in the wrapper).
    x_tb = jnp.transpose(x_ref[...], (1, 0, 2)).reshape(T * Bp, Dp)

    h_last0 = run_layer(x_tb, wih0_ref, whh0_ref, bi0_ref, bhn0_ref, a1_scr)
    h_last1 = run_layer(a1_scr[...].reshape(T * Bp, Hp),
                        wih1_ref, whh1_ref, bi1_ref, bhn1_ref, a2_scr)
    h_last2 = run_layer(a2_scr[...].reshape(T * Bp, Hp),
                        wih2_ref, whh2_ref, bi2_ref, bhn2_ref, y_scr)

    # Final outputs written exactly once, unpadded; y in batch-first layout.
    y_ref[...] = jnp.transpose(y_scr[...], (1, 0, 2))[:B, :, :H].astype(y_ref.dtype)
    hn_ref[0] = h_last0[:B, :H].astype(hn_ref.dtype)
    hn_ref[1] = h_last1[:B, :H].astype(hn_ref.dtype)
    hn_ref[2] = h_last2[:B, :H].astype(hn_ref.dtype)


def _round_up(n, m):
    return (n + m - 1) // m * m


def _pad2(a, rows, cols):
    return jnp.pad(a, ((0, rows - a.shape[0]), (0, cols - a.shape[1])))


def _prep_layer(wih, whh, bih, bhh, din_pad, hp):
    """PyTorch layout (3,H,Din)/(3,H,H)/(3,1,H)/(3,1,H) -> fused, lane-aligned
    kernel layout.  x @ wih_f = [gi_r | gi_z | gi_n], each gate block hp lanes."""
    wih_f = jnp.concatenate([_pad2(wih[k].T, din_pad, hp) for k in range(3)],
                            axis=1).astype(jnp.bfloat16)              # (din_pad, 3hp)
    whh_f = jnp.concatenate([_pad2(whh[k].T, hp, hp) for k in range(3)],
                            axis=1).astype(jnp.bfloat16)              # (hp, 3hp)
    # r/z gates take b_ih + b_hh folded into the hoisted projection; the n
    # gate's b_hn must stay inside r * (.) so it is kept separate.
    bi = jnp.concatenate([_pad2(bih[0] + bhh[0], 1, hp),
                          _pad2(bih[1] + bhh[1], 1, hp),
                          _pad2(bih[2], 1, hp)], axis=1).astype(jnp.float32)  # (1, 3hp)
    bhn = _pad2(bhh[2], 1, hp).astype(jnp.float32)                    # (1, hp)
    return wih_f, whh_f, bi, bhn


@jax.jit
def gru_forward(x_btl, params):
    """x_btl: (B, T, L) batch_first; params: tuple of (wih, whh, bih, bhh) per layer.

    Returns (output (B, T, H), h_n (NUM_LAYERS, B, H)) -- same as nn.GRU (eval)."""
    B, T, L = x_btl.shape
    H = params[0][1].shape[-1]
    out_dtype = x_btl.dtype

    Bp = _round_up(max(B, 8), 8)      # >= 8 sublanes
    Hp = _round_up(H, 128)            # lane-aligned per-gate blocks
    Dp = _round_up(L, 128)

    flat = []
    for li, (wih, whh, bih, bhh) in enumerate(params):
        din_pad = Dp if li == 0 else Hp
        flat.extend(_prep_layer(wih, whh, bih, bhh, din_pad, Hp))

    # Pad (batch -> 8 sublanes, features -> 128 lanes) and cast to bf16 once;
    # x stays batch-first (no HBM transpose pass).
    x_p = jnp.pad(x_btl, ((0, Bp - B), (0, 0), (0, Dp - L))).astype(jnp.bfloat16)

    # Scratch: hoisted input-gate activations (f32), two bf16 inter-layer
    # activation buffers, and the time-major f32 buffer for the final layer.
    scratch = [
        pltpu.VMEM((T, Bp, 3 * Hp), jnp.float32),
        pltpu.VMEM((T, Bp, Hp), jnp.bfloat16),
        pltpu.VMEM((T, Bp, Hp), jnp.bfloat16),
        pltpu.VMEM((T, Bp, Hp), jnp.float32),
    ]

    itemsize = jnp.dtype(out_dtype).itemsize
    scratch_bytes = (T * Bp * 3 * Hp * 4) + 2 * (T * Bp * Hp * 2) + (T * Bp * Hp * 4)
    operand_bytes = x_p.size * 2 + sum(int(a.size) * a.dtype.itemsize for a in flat)
    out_bytes = (B * T * H + NUM_LAYERS * B * H) * itemsize
    vmem_limit = int(min(max(3 * (scratch_bytes + operand_bytes + out_bytes)
                             + (4 << 20), 16 << 20), 64 << 20))

    flops = 0
    for li in range(NUM_LAYERS):
        din = L if li == 0 else H
        flops += 2 * T * B * (din + H) * 3 * H
    cost = pl.CostEstimate(flops=flops,
                           transcendentals=NUM_LAYERS * 3 * T * B * H,
                           bytes_accessed=operand_bytes + out_bytes)

    y, h_n = pl.pallas_call(
        _gru3_kernel,
        out_shape=(
            jax.ShapeDtypeStruct((B, T, H), out_dtype),
            jax.ShapeDtypeStruct((NUM_LAYERS, B, H), out_dtype),
        ),
        in_specs=[pl.BlockSpec(memory_space=pltpu.MemorySpace.VMEM)]
                 * (1 + 4 * NUM_LAYERS),
        out_specs=(
            pl.BlockSpec(memory_space=pltpu.MemorySpace.VMEM),
            pl.BlockSpec(memory_space=pltpu.MemorySpace.VMEM),
        ),
        scratch_shapes=scratch,
        compiler_params=pltpu.CompilerParams(vmem_limit_bytes=vmem_limit),
        cost_estimate=cost,
    )(x_p, *flat)

    return y, h_n


def init_gru_params(key, in_dim, hidden_dim, num_layers=NUM_LAYERS, dtype=jnp.float32):
    """PyTorch-style init U(-1/sqrt(H), 1/sqrt(H)) in PyTorch parameter layout."""
    k = 1.0 / float(hidden_dim) ** 0.5
    params = []
    for layer in range(num_layers):
        lin = in_dim if layer == 0 else hidden_dim
        key, k1, k2, k3, k4 = jax.random.split(key, 5)
        wih = jax.random.uniform(k1, (3, hidden_dim, lin), dtype, -k, k)
        whh = jax.random.uniform(k2, (3, hidden_dim, hidden_dim), dtype, -k, k)
        bih = jax.random.uniform(k3, (3, 1, hidden_dim), dtype, -k, k)
        bhh = jax.random.uniform(k4, (3, 1, hidden_dim), dtype, -k, k)
        params.append((wih, whh, bih, bhh))
    return tuple(params)


def _reference_gru(x_btl, params):
    """Pure-JAX reference (lax.scan) with PyTorch GRU semantics, mirroring the
    kernel's mixed precision (bf16 matmul inputs, f32 accumulation + gate math,
    bf16 inter-layer activations)."""
    x_tbl = jnp.transpose(x_btl, (1, 0, 2)).astype(jnp.bfloat16)
    hs = []
    y = None
    for li, (wih, whh, bih, bhh) in enumerate(params):
        wih_b = wih.astype(jnp.bfloat16)
        whh_b = whh.astype(jnp.bfloat16)
        bih_f = bih.astype(jnp.float32)
        bhh_f = bhh.astype(jnp.float32)
        B = x_tbl.shape[1]
        H = whh.shape[-1]

        def step(h, x_t, wih_b=wih_b, whh_b=whh_b, bih_f=bih_f, bhh_f=bhh_f):
            gi = jnp.einsum('bd,ghd->gbh', x_t, wih_b,
                            preferred_element_type=jnp.float32) + bih_f
            gh = jnp.einsum('bi,ghi->gbh', h.astype(jnp.bfloat16), whh_b,
                            preferred_element_type=jnp.float32)
            r = jax.nn.sigmoid(gi[0] + gh[0] + bhh_f[0])
            z = jax.nn.sigmoid(gi[1] + gh[1] + bhh_f[1])
            n = jnp.tanh(gi[2] + r * (gh[2] + bhh_f[2]))
            h_new = n + z * (h - n)
            return h_new, h_new

        h0 = jnp.zeros((B, H), jnp.float32)
        h_last, ys = jax.lax.scan(step, h0, x_tbl)
        hs.append(h_last)
        if li < len(params) - 1:
            x_tbl = ys.astype(jnp.bfloat16)   # next layer's input via bf16 scratch
        else:
            y = ys
    return jnp.transpose(y, (1, 0, 2)), jnp.stack(hs, axis=0)


if __name__ == "__main__":
    B, T, L, H = 2, 8, 32, 32   # batch, timesteps, in_dim, hidden_dim

    key = jax.random.PRNGKey(0)
    key, xk = jax.random.split(key)
    x = jax.random.normal(xk, (B, T, L), jnp.float32)

    params = init_gru_params(key, in_dim=L, hidden_dim=H, num_layers=NUM_LAYERS)

    out, h_n = gru_forward(x, params)
    out = jax.block_until_ready(out)
    h_n = jax.block_until_ready(h_n)

    assert out.shape == (B, T, H) and h_n.shape == (NUM_LAYERS, B, H)

    # Sanity check against the pure-JAX (matching mixed-precision) reference.
    ref_out, ref_hn = _reference_gru(x, params)
    err_out = float(jnp.max(jnp.abs(out - ref_out)))
    err_hn = float(jnp.max(jnp.abs(h_n - ref_hn)))
    assert err_out < 2e-3 and err_hn < 2e-3, (err_out, err_hn)

    print("KERNEL_OK")
</pallas_src>

<mosaic_0001>
module attributes {stable_mosaic.version = 11 : i64} {
  func.func @_gru3_kernel(%arg0: memref<8x8x128xbf16, #tpu.memory_space<vmem>>, %arg1: memref<128x384xbf16, #tpu.memory_space<vmem>>, %arg2: memref<128x384xbf16, #tpu.memory_space<vmem>>, %arg3: memref<1x384xf32, #tpu.memory_space<vmem>>, %arg4: memref<1x128xf32, #tpu.memory_space<vmem>>, %arg5: memref<128x384xbf16, #tpu.memory_space<vmem>>, %arg6: memref<128x384xbf16, #tpu.memory_space<vmem>>, %arg7: memref<1x384xf32, #tpu.memory_space<vmem>>, %arg8: memref<1x128xf32, #tpu.memory_space<vmem>>, %arg9: memref<128x384xbf16, #tpu.memory_space<vmem>>, %arg10: memref<128x384xbf16, #tpu.memory_space<vmem>>, %arg11: memref<1x384xf32, #tpu.memory_space<vmem>>, %arg12: memref<1x128xf32, #tpu.memory_space<vmem>>, %arg13: memref<2x8x32xf32, #tpu.memory_space<vmem>>, %arg14: memref<3x2x32xf32, #tpu.memory_space<vmem>>, %arg15: memref<8x8x384xf32, #tpu.memory_space<vmem>>, %arg16: memref<8x8x128xbf16, #tpu.memory_space<vmem>>, %arg17: memref<8x8x128xbf16, #tpu.memory_space<vmem>>, %arg18: memref<8x8x128xf32, #tpu.memory_space<vmem>>) attributes {dimension_semantics = [], scalar_prefetch = 0 : i64, scratch_operands = 4 : i64, tpu.core_type = #tpu.core_type<tc>} {
    %c0 = arith.constant 0 : index
    %c0_0 = arith.constant 0 : index
    %c0_1 = arith.constant 0 : index
    %0 = vector.load %arg0[%c0, %c0_0, %c0_1] : memref<8x8x128xbf16, #tpu.memory_space<vmem>>, vector<8x8x128xbf16>
    %1 = tpu.transpose %0, [1, 0, 2] : vector<8x8x128xbf16> -> vector<8x8x128xbf16>
    %2 = vector.shape_cast %1 : vector<8x8x128xbf16> to vector<64x128xbf16>
    %c0_2 = arith.constant 0 : index
    %c0_3 = arith.constant 0 : index
    %3 = vector.load %arg1[%c0_2, %c0_3] : memref<128x384xbf16, #tpu.memory_space<vmem>>, vector<128x384xbf16>
    %cst = arith.constant dense<0.000000e+00> : vector<64x384xf32>
    %4 = tpu.matmul %2, %3, %cst {dimension_numbers = #tpu.dot_dimension_numbers<[1], [0], [0], [1], [0, 0, 1, 1], [], []>} : vector<64x128xbf16>, vector<128x384xbf16>, vector<64x384xf32> -> vector<64x384xf32>
    %c0_4 = arith.constant 0 : index
    %c0_5 = arith.constant 0 : index
    %5 = vector.load %arg3[%c0_4, %c0_5] : memref<1x384xf32, #tpu.memory_space<vmem>>, vector<1x384xf32>
    %6 = vector.broadcast %5 : vector<1x384xf32> to vector<64x384xf32>
    %7 = arith.addf %4, %6 : vector<64x384xf32>
    %8 = vector.shape_cast %7 : vector<64x384xf32> to vector<8x8x384xf32>
    %c0_6 = arith.constant 0 : index
    %c0_7 = arith.constant 0 : index
    %c0_8 = arith.constant 0 : index
    %9 = vector.load %arg15[%c0_6, %c0_7, %c0_8] : memref<8x8x384xf32, #tpu.memory_space<vmem>>, vector<8x8x384xf32>
    tpu.vector_store %arg15[%c0_6, %c0_7, %c0_8], %8 {strides = array<i32>} : memref<8x8x384xf32, #tpu.memory_space<vmem>>, vector<8x8x384xf32>,
    %c0_9 = arith.constant 0 : index
    %c0_10 = arith.constant 0 : index
    %10 = vector.load %arg2[%c0_9, %c0_10] : memref<128x384xbf16, #tpu.memory_space<vmem>>, vector<128x384xbf16>
    %c0_11 = arith.constant 0 : index
    %c0_12 = arith.constant 0 : index
    %11 = vector.load %arg4[%c0_11, %c0_12] : memref<1x128xf32, #tpu.memory_space<vmem>>, vector<1x128xf32>
    %12 = vector.shape_cast %11 : vector<1x128xf32> to vector<1x128xf32>
    %13 = vector.broadcast %12 : vector<1x128xf32> to vector<8x128xf32>
    %cst_13 = arith.constant 0.000000e+00 : f32
    %14 = vector.broadcast %cst_13 : f32 to vector<8x128xf32>
    %c0_i32 = arith.constant 0 : i32
    %15 = arith.truncf %14 : vector<8x128xf32> to vector<8x128xbf16>
    %cst_14 = arith.constant dense<0.000000e+00> : vector<8x384xf32>
    %16 = tpu.matmul %15, %10, %cst_14 {dimension_numbers = #tpu.dot_dimension_numbers<[1], [0], [0], [1], [0, 0, 1, 1], [], []>} : vector<8x128xbf16>, vector<128x384xbf16>, vector<8x384xf32> -> vector<8x384xf32>
    %17 = arith.index_cast %c0_i32 : i32 to index
    %c0_15 = arith.constant 0 : index
    %c0_16 = arith.constant 0 : index
    %18 = vector.load %arg15[%17, %c0_15, %c0_16] : memref<8x8x384xf32, #tpu.memory_space<vmem>>, vector<1x8x384xf32>
    %19 = vector.shape_cast %18 : vector<1x8x384xf32> to vector<8x384xf32>
    %20 = vector.extract_strided_slice %19 {offsets = [0, 0], sizes = [8, 128], strides = [1, 1]} : vector<8x384xf32> to vector<8x128xf32>
    %21 = vector.extract_strided_slice %16 {offsets = [0, 0], sizes = [8, 128], strides = [1, 1]} : vector<8x384xf32> to vector<8x128xf32>
    %22 = arith.addf %20, %21 : vector<8x128xf32>
    %23 = arith.negf %22 : vector<8x128xf32>
    %24 = math.exp %23 : vector<8x128xf32>
    %cst_17 = arith.constant 1.000000e+00 : f32
    %25 = vector.broadcast %cst_17 : f32 to vector<8x128xf32>
    %26 = arith.addf %25, %24 : vector<8x128xf32>
    %27 = arith.divf %25, %26 : vector<8x128xf32>
    %28 = vector.extract_strided_slice %19 {offsets = [0, 128], sizes = [8, 128], strides = [1, 1]} : vector<8x384xf32> to vector<8x128xf32>
    %29 = vector.extract_strided_slice %16 {offsets = [0, 128], sizes = [8, 128], strides = [1, 1]} : vector<8x384xf32> to vector<8x128xf32>
    %30 = arith.addf %28, %29 : vector<8x128xf32>
    %31 = arith.negf %30 : vector<8x128xf32>
    %32 = math.exp %31 : vector<8x128xf32>
    %cst_18 = arith.constant 1.000000e+00 : f32
    %33 = vector.broadcast %cst_18 : f32 to vector<8x128xf32>
    %34 = arith.addf %33, %32 : vector<8x128xf32>
    %35 = arith.divf %33, %34 : vector<8x128xf32>
    %36 = vector.extract_strided_slice %19 {offsets = [0, 256], sizes = [8, 128], strides = [1, 1]} : vector<8x384xf32> to vector<8x128xf32>
    %37 = vector.extract_strided_slice %16 {offsets = [0, 256], sizes = [8, 128], strides = [1, 1]} : vector<8x384xf32> to vector<8x128xf32>
    %38 = arith.addf %37, %13 : vector<8x128xf32>
    %39 = arith.mulf %27, %38 : vector<8x128xf32>
    %40 = arith.addf %36, %39 : vector<8x128xf32>
    %41 = math.tanh %40 : vector<8x128xf32>
    %42 = arith.subf %14, %41 : vector<8x128xf32>
    %43 = arith.mulf %35, %42 : vector<8x128xf32>
    %44 = arith.addf %41, %43 : vector<8x128xf32>
    %45 = arith.truncf %44 : vector<8x128xf32> to vector<8x128xbf16>
    %46 = arith.index_cast %c0_i32 : i32 to index
    %c0_19 = arith.constant 0 : index
    %c0_20 = arith.constant 0 : index
    %47 = vector.load %arg16[%46, %c0_19, %c0_20] : memref<8x8x128xbf16, #tpu.memory_space<vmem>>, vector<1x8x128xbf16>
    %48 = vector.shape_cast %47 : vector<1x8x128xbf16> to vector<8x128xbf16>
    %49 = vector.shape_cast %45 : vector<8x128xbf16> to vector<1x8x128xbf16>
    tpu.vector_store %arg16[%46, %c0_19, %c0_20], %49 {strides = array<i32>} : memref<8x8x128xbf16, #tpu.memory_space<vmem>>, vector<1x8x128xbf16>,
    %c1_i32 = arith.constant 1 : i32
    %50 = arith.truncf %44 : vector<8x128xf32> to vector<8x128xbf16>
    %cst_21 = arith.constant dense<0.000000e+00> : vector<8x384xf32>
    %51 = tpu.matmul %50, %10, %cst_21 {dimension_numbers = #tpu.dot_dimension_numbers<[1], [0], [0], [1], [0, 0, 1, 1], [], []>} : vector<8x128xbf16>, vector<128x384xbf16>, vector<8x384xf32> -> vector<8x384xf32>
    %52 = arith.index_cast %c1_i32 : i32 to index
    %c0_22 = arith.constant 0 : index
    %c0_23 = arith.constant 0 : index
    %53 = vector.load %arg15[%52, %c0_22, %c0_23] : memref<8x8x384xf32, #tpu.memory_space<vmem>>, vector<1x8x384xf32>
    %54 = vector.shape_cast %53 : vector<1x8x384xf32> to vector<8x384xf32>
    %55 = vector.extract_strided_slice %54 {offsets = [0, 0], sizes = [8, 128], strides = [1, 1]} : vector<8x384xf32> to vector<8x128xf32>
    %56 = vector.extract_strided_slice %51 {offsets = [0, 0], sizes = [8, 128], strides = [1, 1]} : vector<8x384xf32> to vector<8x128xf32>
    %57 = arith.addf %55, %56 : vector<8x128xf32>
    %58 = arith.negf %57 : vector<8x128xf32>
    %59 = math.exp %58 : vector<8x128xf32>
    %cst_24 = arith.constant 1.000000e+00 : f32
    %60 = vector.broadcast %cst_24 : f32 to vector<8x128xf32>
    %61 = arith.addf %60, %59 : vector<8x128xf32>
    %62 = arith.divf %60, %61 : vector<8x128xf32>
    %63 = vector.extract_strided_slice %54 {offsets = [0, 128], sizes = [8, 128], strides = [1, 1]} : vector<8x384xf32> to vector<8x128xf32>
    %64 = vector.extract_strided_slice %51 {offsets = [0, 128], sizes = [8, 128], strides = [1, 1]} : vector<8x384xf32> to vector<8x128xf32>
    %65 = arith.addf %63, %64 : vector<8x128xf32>
    %66 = arith.negf %65 : vector<8x128xf32>
    %67 = math.exp %66 : vector<8x128xf32>
    %cst_25 = arith.constant 1.000000e+00 : f32
    %68 = vector.broadcast %cst_25 : f32 to vector<8x128xf32>
    %69 = arith.addf %68, %67 : vector<8x128xf32>
    %70 = arith.divf %68, %69 : vector<8x128xf32>
    %71 = vector.extract_strided_slice %54 {offsets = [0, 256], sizes = [8, 128], strides = [1, 1]} : vector<8x384xf32> to vector<8x128xf32>
    %72 = vector.extract_strided_slice %51 {offsets = [0, 256], sizes = [8, 128], strides = [1, 1]} : vector<8x384xf32> to vector<8x128xf32>
    %73 = arith.addf %72, %13 : vector<8x128xf32>
    %74 = arith.mulf %62, %73 : vector<8x128xf32>
    %75 = arith.addf %71, %74 : vector<8x128xf32>
    %76 = math.tanh %75 : vector<8x128xf32>
    %77 = arith.subf %44, %76 : vector<8x128xf32>
    %78 = arith.mulf %70, %77 : vector<8x128xf32>
    %79 = arith.addf %76, %78 : vector<8x128xf32>
    %80 = arith.truncf %79 : vector<8x128xf32> to vector<8x128xbf16>
    %81 = arith.index_cast %c1_i32 : i32 to index
    %c0_26 = arith.constant 0 : index
    %c0_27 = arith.constant 0 : index
    %82 = vector.load %arg16[%81, %c0_26, %c0_27] : memref<8x8x128xbf16, #tpu.memory_space<vmem>>, vector<1x8x128xbf16>
    %83 = vector.shape_cast %82 : vector<1x8x128xbf16> to vector<8x128xbf16>
    %84 = vector.shape_cast %80 : vector<8x128xbf16> to vector<1x8x128xbf16>
    tpu.vector_store %arg16[%81, %c0_26, %c0_27], %84 {strides = array<i32>} : memref<8x8x128xbf16, #tpu.memory_space<vmem>>, vector<1x8x128xbf16>,
    %c2_i32 = arith.constant 2 : i32
    %85 = arith.truncf %79 : vector<8x128xf32> to vector<8x128xbf16>
    %cst_28 = arith.constant dense<0.000000e+00> : vector<8x384xf32>
    %86 = tpu.matmul %85, %10, %cst_28 {dimension_numbers = #tpu.dot_dimension_numbers<[1], [0], [0], [1], [0, 0, 1, 1], [], []>} : vector<8x128xbf16>, vector<128x384xbf16>, vector<8x384xf32> -> vector<8x384xf32>
    %87 = arith.index_cast %c2_i32 : i32 to index
    %c0_29 = arith.constant 0 : index
    %c0_30 = arith.constant 0 : index
    %88 = vector.load %arg15[%87, %c0_29, %c0_30] : memref<8x8x384xf32, #tpu.memory_space<vmem>>, vector<1x8x384xf32>
    %89 = vector.shape_cast %88 : vector<1x8x384xf32> to vector<8x384xf32>
    %90 = vector.extract_strided_slice %89 {offsets = [0, 0], sizes = [8, 128], strides = [1, 1]} : vector<8x384xf32> to vector<8x128xf32>
    %91 = vector.extract_strided_slice %86 {offsets = [0, 0], sizes = [8, 128], strides = [1, 1]} : vector<8x384xf32> to vector<8x128xf32>
    %92 = arith.addf %90, %91 : vector<8x128xf32>
    %93 = arith.negf %92 : vector<8x128xf32>
    %94 = math.exp %93 : vector<8x128xf32>
    %cst_31 = arith.constant 1.000000e+00 : f32
    %95 = vector.broadcast %cst_31 : f32 to vector<8x128xf32>
    %96 = arith.addf %95, %94 : vector<8x128xf32>
    %97 = arith.divf %95, %96 : vector<8x128xf32>
    %98 = vector.extract_strided_slice %89 {offsets = [0, 128], sizes = [8, 128], strides = [1, 1]} : vector<8x384xf32> to vector<8x128xf32>
    %99 = vector.extract_strided_slice %86 {offsets = [0, 128], sizes = [8, 128], strides = [1, 1]} : vector<8x384xf32> to vector<8x128xf32>
    %100 = arith.addf %98, %99 : vector<8x128xf32>
    %101 = arith.negf %100 : vector<8x128xf32>
    %102 = math.exp %101 : vector<8x128xf32>
    %cst_32 = arith.constant 1.000000e+00 : f32
    %103 = vector.broadcast %cst_32 : f32 to vector<8x128xf32>
    %104 = arith.addf %103, %102 : vector<8x128xf32>
    %105 = arith.divf %103, %104 : vector<8x128xf32>
    %106 = vector.extract_strided_slice %89 {offsets = [0, 256], sizes = [8, 128], strides = [1, 1]} : vector<8x384xf32> to vector<8x128xf32>
    %107 = vector.extract_strided_slice %86 {offsets = [0, 256], sizes = [8, 128], strides = [1, 1]} : vector<8x384xf32> to vector<8x128xf32>
    %108 = arith.addf %107, %13 : vector<8x128xf32>
    %109 = arith.mulf %97, %108 : vector<8x128xf32>
    %110 = arith.addf %106, %109 : vector<8x128xf32>
    %111 = math.tanh %110 : vector<8x128xf32>
    %112 = arith.subf %79, %111 : vector<8x128xf32>
    %113 = arith.mulf %105, %112 : vector<8x128xf32>
    %114 = arith.addf %111, %113 : vector<8x128xf32>
    %115 = arith.truncf %114 : vector<8x128xf32> to vector<8x128xbf16>
    %116 = arith.index_cast %c2_i32 : i32 to index
    %c0_33 = arith.constant 0 : index
    %c0_34 = arith.constant 0 : index
    %117 = vector.load %arg16[%116, %c0_33, %c0_34] : memref<8x8x128xbf16, #tpu.memory_space<vmem>>, vector<1x8x128xbf16>
    %118 = vector.shape_cast %117 : vector<1x8x128xbf16> to vector<8x128xbf16>
    %119 = vector.shape_cast %115 : vector<8x128xbf16> to vector<1x8x128xbf16>
    tpu.vector_store %arg16[%116, %c0_33, %c0_34], %119 {strides = array<i32>} : memref<8x8x128xbf16, #tpu.memory_space<vmem>>, vector<1x8x128xbf16>,
    %c3_i32 = arith.constant 3 : i32
    %120 = arith.truncf %114 : vector<8x128xf32> to vector<8x128xbf16>
    %cst_35 = arith.constant dense<0.000000e+00> : vector<8x384xf32>
    %121 = tpu.matmul %120, %10, %cst_35 {dimension_numbers = #tpu.dot_dimension_numbers<[1], [0], [0], [1], [0, 0, 1, 1], [], []>} : vector<8x128xbf16>, vector<128x384xbf16>, vector<8x384xf32> -> vector<8x384xf32>
    %122 = arith.index_cast %c3_i32 : i32 to index
    %c0_36 = arith.constant 0 : index
    %c0_37 = arith.constant 0 : index
    %123 = vector.load %arg15[%122, %c0_36, %c0_37] : memref<8x8x384xf32, #tpu.memory_space<vmem>>, vector<1x8x384xf32>
    %124 = vector.shape_cast %123 : vector<1x8x384xf32> to vector<8x384xf32>
    %125 = vector.extract_strided_slice %124 {offsets = [0, 0], sizes = [8, 128], strides = [1, 1]} : vector<8x384xf32> to vector<8x128xf32>
    %126 = vector.extract_strided_slice %121 {offsets = [0, 0], sizes = [8, 128], strides = [1, 1]} : vector<8x384xf32> to vector<8x128xf32>
    %127 = arith.addf %125, %126 : vector<8x128xf32>
    %128 = arith.negf %127 : vector<8x128xf32>
    %129 = math.exp %128 : vector<8x128xf32>
    %cst_38 = arith.constant 1.000000e+00 : f32
    %130 = vector.broadcast %cst_38 : f32 to vector<8x128xf32>
    %131 = arith.addf %130, %129 : vector<8x128xf32>
    %132 = arith.divf %130, %131 : vector<8x128xf32>
    %133 = vector.extract_strided_slice %124 {offsets = [0, 128], sizes = [8, 128], strides = [1, 1]} : vector<8x384xf32> to vector<8x128xf32>
    %134 = vector.extract_strided_slice %121 {offsets = [0, 128], sizes = [8, 128], strides = [1, 1]} : vector<8x384xf32> to vector<8x128xf32>
    %135 = arith.addf %133, %134 : vector<8x128xf32>
    %136 = arith.negf %135 : vector<8x128xf32>
    %137 = math.exp %136 : vector<8x128xf32>
    %cst_39 = arith.constant 1.000000e+00 : f32
    %138 = vector.broadcast %cst_39 : f32 to vector<8x128xf32>
    %139 = arith.addf %138, %137 : vector<8x128xf32>
    %140 = arith.divf %138, %139 : vector<8x128xf32>
    %141 = vector.extract_strided_slice %124 {offsets = [0, 256], sizes = [8, 128], strides = [1, 1]} : vector<8x384xf32> to vector<8x128xf32>
    %142 = vector.extract_strided_slice %121 {offsets = [0, 256], sizes = [8, 128], strides = [1, 1]} : vector<8x384xf32> to vector<8x128xf32>
    %143 = arith.addf %142, %13 : vector<8x128xf32>
    %144 = arith.mulf %132, %143 : vector<8x128xf32>
    %145 = arith.addf %141, %144 : vector<8x128xf32>
    %146 = math.tanh %145 : vector<8x128xf32>
    %147 = arith.subf %114, %146 : vector<8x128xf32>
    %148 = arith.mulf %140, %147 : vector<8x128xf32>
    %149 = arith.addf %146, %148 : vector<8x128xf32>
    %150 = arith.truncf %149 : vector<8x128xf32> to vector<8x128xbf16>
    %151 = arith.index_cast %c3_i32 : i32 to index
    %c0_40 = arith.constant 0 : index
    %c0_41 = arith.constant 0 : index
    %152 = vector.load %arg16[%151, %c0_40, %c0_41] : memref<8x8x128xbf16, #tpu.memory_space<vmem>>, vector<1x8x128xbf16>
    %153 = vector.shape_cast %152 : vector<1x8x128xbf16> to vector<8x128xbf16>
    %154 = vector.shape_cast %150 : vector<8x128xbf16> to vector<1x8x128xbf16>
    tpu.vector_store %arg16[%151, %c0_40, %c0_41], %154 {strides = array<i32>} : memref<8x8x128xbf16, #tpu.memory_space<vmem>>, vector<1x8x128xbf16>,
    %c4_i32 = arith.constant 4 : i32
    %155 = arith.truncf %149 : vector<8x128xf32> to vector<8x128xbf16>
    %cst_42 = arith.constant dense<0.000000e+00> : vector<8x384xf32>
    %156 = tpu.matmul %155, %10, %cst_42 {dimension_numbers = #tpu.dot_dimension_numbers<[1], [0], [0], [1], [0, 0, 1, 1], [], []>} : vector<8x128xbf16>, vector<128x384xbf16>, vector<8x384xf32> -> vector<8x384xf32>
    %157 = arith.index_cast %c4_i32 : i32 to index
    %c0_43 = arith.constant 0 : index
    %c0_44 = arith.constant 0 : index
    %158 = vector.load %arg15[%157, %c0_43, %c0_44] : memref<8x8x384xf32, #tpu.memory_space<vmem>>, vector<1x8x384xf32>
    %159 = vector.shape_cast %158 : vector<1x8x384xf32> to vector<8x384xf32>
    %160 = vector.extract_strided_slice %159 {offsets = [0, 0], sizes = [8, 128], strides = [1, 1]} : vector<8x384xf32> to vector<8x128xf32>
    %161 = vector.extract_strided_slice %156 {offsets = [0, 0], sizes = [8, 128], strides = [1, 1]} : vector<8x384xf32> to vector<8x128xf32>
    %162 = arith.addf %160, %161 : vector<8x128xf32>
    %163 = arith.negf %162 : vector<8x128xf32>
    %164 = math.exp %163 : vector<8x128xf32>
    %cst_45 = arith.constant 1.000000e+00 : f32
    %165 = vector.broadcast %cst_45 : f32 to vector<8x128xf32>
    %166 = arith.addf %165, %164 : vector<8x128xf32>
    %167 = arith.divf %165, %166 : vector<8x128xf32>
    %168 = vector.extract_strided_slice %159 {offsets = [0, 128], sizes = [8, 128], strides = [1, 1]} : vector<8x384xf32> to vector<8x128xf32>
    %169 = vector.extract_strided_slice %156 {offsets = [0, 128], sizes = [8, 128], strides = [1, 1]} : vector<8x384xf32> to vector<8x128xf32>
    %170 = arith.addf %168, %169 : vector<8x128xf32>
    %171 = arith.negf %170 : vector<8x128xf32>
    %172 = math.exp %171 : vector<8x128xf32>
    %cst_46 = arith.constant 1.000000e+00 : f32
    %173 = vector.broadcast %cst_46 : f32 to vector<8x128xf32>
    %174 = arith.addf %173, %172 : vector<8x128xf32>
    %175 = arith.divf %173, %174 : vector<8x128xf32>
    %176 = vector.extract_strided_slice %159 {offsets = [0, 256], sizes = [8, 128], strides = [1, 1]} : vector<8x384xf32> to vector<8x128xf32>
    %177 = vector.extract_strided_slice %156 {offsets = [0, 256], sizes = [8, 128], strides = [1, 1]} : vector<8x384xf32> to vector<8x128xf32>
    %178 = arith.addf %177, %13 : vector<8x128xf32>
    %179 = arith.mulf %167, %178 : vector<8x128xf32>
    %180 = arith.addf %176, %179 : vector<8x128xf32>
    %181 = math.tanh %180 : vector<8x128xf32>
    %182 = arith.subf %149, %181 : vector<8x128xf32>
    %183 = arith.mulf %175, %182 : vector<8x128xf32>
    %184 = arith.addf %181, %183 : vector<8x128xf32>
    %185 = arith.truncf %184 : vector<8x128xf32> to vector<8x128xbf16>
    %186 = arith.index_cast %c4_i32 : i32 to index
    %c0_47 = arith.constant 0 : index
    %c0_48 = arith.constant 0 : index
    %187 = vector.load %arg16[%186, %c0_47, %c0_48] : memref<8x8x128xbf16, #tpu.memory_space<vmem>>, vector<1x8x128xbf16>
    %188 = vector.shape_cast %187 : vector<1x8x128xbf16> to vector<8x128xbf16>
    %189 = vector.shape_cast %185 : vector<8x128xbf16> to vector<1x8x128xbf16>
    tpu.vector_store %arg16[%186, %c0_47, %c0_48], %189 {strides = array<i32>} : memref<8x8x128xbf16, #tpu.memory_space<vmem>>, vector<1x8x128xbf16>,
    %c5_i32 = arith.constant 5 : i32
    %190 = arith.truncf %184 : vector<8x128xf32> to vector<8x128xbf16>
    %cst_49 = arith.constant dense<0.000000e+00> : vector<8x384xf32>
    %191 = tpu.matmul %190, %10, %cst_49 {dimension_numbers = #tpu.dot_dimension_numbers<[1], [0], [0], [1], [0, 0, 1, 1], [], []>} : vector<8x128xbf16>, vector<128x384xbf16>, vector<8x384xf32> -> vector<8x384xf32>
    %192 = arith.index_cast %c5_i32 : i32 to index
    %c0_50 = arith.constant 0 : index
    %c0_51 = arith.constant 0 : index
    %193 = vector.load %arg15[%192, %c0_50, %c0_51] : memref<8x8x384xf32, #tpu.memory_space<vmem>>, vector<1x8x384xf32>
    %194 = vector.shape_cast %193 : vector<1x8x384xf32> to vector<8x384xf32>
    %195 = vector.extract_strided_slice %194 {offsets = [0, 0], sizes = [8, 128], strides = [1, 1]} : vector<8x384xf32> to vector<8x128xf32>
    %196 = vector.extract_strided_slice %191 {offsets = [0, 0], sizes = [8, 128], strides = [1, 1]} : vector<8x384xf32> to vector<8x128xf32>
    %197 = arith.addf %195, %196 : vector<8x128xf32>
    %198 = arith.negf %197 : vector<8x128xf32>
    %199 = math.exp %198 : vector<8x128xf32>
    %cst_52 = arith.constant 1.000000e+00 : f32
    %200 = vector.broadcast %cst_52 : f32 to vector<8x128xf32>
    %201 = arith.addf %200, %199 : vector<8x128xf32>
    %202 = arith.divf %200, %201 : vector<8x128xf32>
    %203 = vector.extract_strided_slice %194 {offsets = [0, 128], sizes = [8, 128], strides = [1, 1]} : vector<8x384xf32> to vector<8x128xf32>
    %204 = vector.extract_strided_slice %191 {offsets = [0, 128], sizes = [8, 128], strides = [1, 1]} : vector<8x384xf32> to vector<8x128xf32>
    %205 = arith.addf %203, %204 : vector<8x128xf32>
    %206 = arith.negf %205 : vector<8x128xf32>
    %207 = math.exp %206 : vector<8x128xf32>
    %cst_53 = arith.constant 1.000000e+00 : f32
    %208 = vector.broadcast %cst_53 : f32 to vector<8x128xf32>
    %209 = arith.addf %208, %207 : vector<8x128xf32>
    %210 = arith.divf %208, %209 : vector<8x128xf32>
    %211 = vector.extract_strided_slice %194 {offsets = [0, 256], sizes = [8, 128], strides = [1, 1]} : vector<8x384xf32> to vector<8x128xf32>
    %212 = vector.extract_strided_slice %191 {offsets = [0, 256], sizes = [8, 128], strides = [1, 1]} : vector<8x384xf32> to vector<8x128xf32>
    %213 = arith.addf %212, %13 : vector<8x128xf32>
    %214 = arith.mulf %202, %213 : vector<8x128xf32>
    %215 = arith.addf %211, %214 : vector<8x128xf32>
    %216 = math.tanh %215 : vector<8x128xf32>
    %217 = arith.subf %184, %216 : vector<8x128xf32>
    %218 = arith.mulf %210, %217 : vector<8x128xf32>
    %219 = arith.addf %216, %218 : vector<8x128xf32>
    %220 = arith.truncf %219 : vector<8x128xf32> to vector<8x128xbf16>
    %221 = arith.index_cast %c5_i32 : i32 to index
    %c0_54 = arith.constant 0 : index
    %c0_55 = arith.constant 0 : index
    %222 = vector.load %arg16[%221, %c0_54, %c0_55] : memref<8x8x128xbf16, #tpu.memory_space<vmem>>, vector<1x8x128xbf16>
    %223 = vector.shape_cast %222 : vector<1x8x128xbf16> to vector<8x128xbf16>
    %224 = vector.shape_cast %220 : vector<8x128xbf16> to vector<1x8x128xbf16>
    tpu.vector_store %arg16[%221, %c0_54, %c0_55], %224 {strides = array<i32>} : memref<8x8x128xbf16, #tpu.memory_space<vmem>>, vector<1x8x128xbf16>,
    %c6_i32 = arith.constant 6 : i32
    %225 = arith.truncf %219 : vector<8x128xf32> to vector<8x128xbf16>
    %cst_56 = arith.constant dense<0.000000e+00> : vector<8x384xf32>
    %226 = tpu.matmul %225, %10, %cst_56 {dimension_numbers = #tpu.dot_dimension_numbers<[1], [0], [0], [1], [0, 0, 1, 1], [], []>} : vector<8x128xbf16>, vector<128x384xbf16>, vector<8x384xf32> -> vector<8x384xf32>
    %227 = arith.index_cast %c6_i32 : i32 to index
    %c0_57 = arith.constant 0 : index
    %c0_58 = arith.constant 0 : index
    %228 = vector.load %arg15[%227, %c0_57, %c0_58] : memref<8x8x384xf32, #tpu.memory_space<vmem>>, vector<1x8x384xf32>
    %229 = vector.shape_cast %228 : vector<1x8x384xf32> to vector<8x384xf32>
    %230 = vector.extract_strided_slice %229 {offsets = [0, 0], sizes = [8, 128], strides = [1, 1]} : vector<8x384xf32> to vector<8x128xf32>
    %231 = vector.extract_strided_slice %226 {offsets = [0, 0], sizes = [8, 128], strides = [1, 1]} : vector<8x384xf32> to vector<8x128xf32>
    %232 = arith.addf %230, %231 : vector<8x128xf32>
    %233 = arith.negf %232 : vector<8x128xf32>
    %234 = math.exp %233 : vector<8x128xf32>
    %cst_59 = arith.constant 1.000000e+00 : f32
    %235 = vector.broadcast %cst_59 : f32 to vector<8x128xf32>
    %236 = arith.addf %235, %234 : vector<8x128xf32>
    %237 = arith.divf %235, %236 : vector<8x128xf32>
    %238 = vector.extract_strided_slice %229 {offsets = [0, 128], sizes = [8, 128], strides = [1, 1]} : vector<8x384xf32> to vector<8x128xf32>
    %239 = vector.extract_strided_slice %226 {offsets = [0, 128], sizes = [8, 128], strides = [1, 1]} : vector<8x384xf32> to vector<8x128xf32>
    %240 = arith.addf %238, %239 : vector<8x128xf32>
    %241 = arith.negf %240 : vector<8x128xf32>
    %242 = math.exp %241 : vector<8x128xf32>
    %cst_60 = arith.constant 1.000000e+00 : f32
    %243 = vector.broadcast %cst_60 : f32 to vector<8x128xf32>
    %244 = arith.addf %243, %242 : vector<8x128xf32>
    %245 = arith.divf %243, %244 : vector<8x128xf32>
    %246 = vector.extract_strided_slice %229 {offsets = [0, 256], sizes = [8, 128], strides = [1, 1]} : vector<8x384xf32> to vector<8x128xf32>
    %247 = vector.extract_strided_slice %226 {offsets = [0, 256], sizes = [8, 128], strides = [1, 1]} : vector<8x384xf32> to vector<8x128xf32>
    %248 = arith.addf %247, %13 : vector<8x128xf32>
    %249 = arith.mulf %237, %248 : vector<8x128xf32>
    %250 = arith.addf %246, %249 : vector<8x128xf32>
    %251 = math.tanh %250 : vector<8x128xf32>
    %252 = arith.subf %219, %251 : vector<8x128xf32>
    %253 = arith.mulf %245, %252 : vector<8x128xf32>
    %254 = arith.addf %251, %253 : vector<8x128xf32>
    %255 = arith.truncf %254 : vector<8x128xf32> to vector<8x128xbf16>
    %256 = arith.index_cast %c6_i32 : i32 to index
    %c0_61 = arith.constant 0 : index
    %c0_62 = arith.constant 0 : index
    %257 = vector.load %arg16[%256, %c0_61, %c0_62] : memref<8x8x128xbf16, #tpu.memory_space<vmem>>, vector<1x8x128xbf16>
    %258 = vector.shape_cast %257 : vector<1x8x128xbf16> to vector<8x128xbf16>
    %259 = vector.shape_cast %255 : vector<8x128xbf16> to vector<1x8x128xbf16>
    tpu.vector_store %arg16[%256, %c0_61, %c0_62], %259 {strides = array<i32>} : memref<8x8x128xbf16, #tpu.memory_space<vmem>>, vector<1x8x128xbf16>,
    %c7_i32 = arith.constant 7 : i32
    %260 = arith.truncf %254 : vector<8x128xf32> to vector<8x128xbf16>
    %cst_63 = arith.constant dense<0.000000e+00> : vector<8x384xf32>
    %261 = tpu.matmul %260, %10, %cst_63 {dimension_numbers = #tpu.dot_dimension_numbers<[1], [0], [0], [1], [0, 0, 1, 1], [], []>} : vector<8x128xbf16>, vector<128x384xbf16>, vector<8x384xf32> -> vector<8x384xf32>
    %262 = arith.index_cast %c7_i32 : i32 to index
    %c0_64 = arith.constant 0 : index
    %c0_65 = arith.constant 0 : index
    %263 = vector.load %arg15[%262, %c0_64, %c0_65] : memref<8x8x384xf32, #tpu.memory_space<vmem>>, vector<1x8x384xf32>
    %264 = vector.shape_cast %263 : vector<1x8x384xf32> to vector<8x384xf32>
    %265 = vector.extract_strided_slice %264 {offsets = [0, 0], sizes = [8, 128], strides = [1, 1]} : vector<8x384xf32> to vector<8x128xf32>
    %266 = vector.extract_strided_slice %261 {offsets = [0, 0], sizes = [8, 128], strides = [1, 1]} : vector<8x384xf32> to vector<8x128xf32>
    %267 = arith.addf %265, %266 : vector<8x128xf32>
    %268 = arith.negf %267 : vector<8x128xf32>
    %269 = math.exp %268 : vector<8x128xf32>
    %cst_66 = arith.constant 1.000000e+00 : f32
    %270 = vector.broadcast %cst_66 : f32 to vector<8x128xf32>
    %271 = arith.addf %270, %269 : vector<8x128xf32>
    %272 = arith.divf %270, %271 : vector<8x128xf32>
    %273 = vector.extract_strided_slice %264 {offsets = [0, 128], sizes = [8, 128], strides = [1, 1]} : vector<8x384xf32> to vector<8x128xf32>
    %274 = vector.extract_strided_slice %261 {offsets = [0, 128], sizes = [8, 128], strides = [1, 1]} : vector<8x384xf32> to vector<8x128xf32>
    %275 = arith.addf %273, %274 : vector<8x128xf32>
    %276 = arith.negf %275 : vector<8x128xf32>
    %277 = math.exp %276 : vector<8x128xf32>
    %cst_67 = arith.constant 1.000000e+00 : f32
    %278 = vector.broadcast %cst_67 : f32 to vector<8x128xf32>
    %279 = arith.addf %278, %277 : vector<8x128xf32>
    %280 = arith.divf %278, %279 : vector<8x128xf32>
    %281 = vector.extract_strided_slice %264 {offsets = [0, 256], sizes = [8, 128], strides = [1, 1]} : vector<8x384xf32> to vector<8x128xf32>
    %282 = vector.extract_strided_slice %261 {offsets = [0, 256], sizes = [8, 128], strides = [1, 1]} : vector<8x384xf32> to vector<8x128xf32>
    %283 = arith.addf %282, %13 : vector<8x128xf32>
    %284 = arith.mulf %272, %283 : vector<8x128xf32>
    %285 = arith.addf %281, %284 : vector<8x128xf32>
    %286 = math.tanh %285 : vector<8x128xf32>
    %287 = arith.subf %254, %286 : vector<8x128xf32>
    %288 = arith.mulf %280, %287 : vector<8x128xf32>
    %289 = arith.addf %286, %288 : vector<8x128xf32>
    %290 = arith.truncf %289 : vector<8x128xf32> to vector<8x128xbf16>
    %291 = arith.index_cast %c7_i32 : i32 to index
    %c0_68 = arith.constant 0 : index
    %c0_69 = arith.constant 0 : index
    %292 = vector.load %arg16[%291, %c0_68, %c0_69] : memref<8x8x128xbf16, #tpu.memory_space<vmem>>, vector<1x8x128xbf16>
    %293 = vector.shape_cast %292 : vector<1x8x128xbf16> to vector<8x128xbf16>
    %294 = vector.shape_cast %290 : vector<8x128xbf16> to vector<1x8x128xbf16>
    tpu.vector_store %arg16[%291, %c0_68, %c0_69], %294 {strides = array<i32>} : memref<8x8x128xbf16, #tpu.memory_space<vmem>>, vector<1x8x128xbf16>,
    %c8_i32 = arith.constant 8 : i32
    %c0_70 = arith.constant 0 : index
    %c0_71 = arith.constant 0 : index
    %c0_72 = arith.constant 0 : index
    %295 = vector.load %arg16[%c0_70, %c0_71, %c0_72] : memref<8x8x128xbf16, #tpu.memory_space<vmem>>, vector<8x8x128xbf16>
    %296 = vector.shape_cast %295 : vector<8x8x128xbf16> to vector<64x128xbf16>
    %c0_73 = arith.constant 0 : index
    %c0_74 = arith.constant 0 : index
    %297 = vector.load %arg5[%c0_73, %c0_74] : memref<128x384xbf16, #tpu.memory_space<vmem>>, vector<128x384xbf16>
    %cst_75 = arith.constant dense<0.000000e+00> : vector<64x384xf32>
    %298 = tpu.matmul %296, %297, %cst_75 {dimension_numbers = #tpu.dot_dimension_numbers<[1], [0], [0], [1], [0, 0, 1, 1], [], []>} : vector<64x128xbf16>, vector<128x384xbf16>, vector<64x384xf32> -> vector<64x384xf32>
    %c0_76 = arith.constant 0 : index
    %c0_77 = arith.constant 0 : index
    %299 = vector.load %arg7[%c0_76, %c0_77] : memref<1x384xf32, #tpu.memory_space<vmem>>, vector<1x384xf32>
    %300 = vector.broadcast %299 : vector<1x384xf32> to vector<64x384xf32>
    %301 = arith.addf %298, %300 : vector<64x384xf32>
    %302 = vector.shape_cast %301 : vector<64x384xf32> to vector<8x8x384xf32>
    %c0_78 = arith.constant 0 : index
    %c0_79 = arith.constant 0 : index
    %c0_80 = arith.constant 0 : index
    %303 = vector.load %arg15[%c0_78, %c0_79, %c0_80] : memref<8x8x384xf32, #tpu.memory_space<vmem>>, vector<8x8x384xf32>
    tpu.vector_store %arg15[%c0_78, %c0_79, %c0_80], %302 {strides = array<i32>} : memref<8x8x384xf32, #tpu.memory_space<vmem>>, vector<8x8x384xf32>,
    %c0_81 = arith.constant 0 : index
    %c0_82 = arith.constant 0 : index
    %304 = vector.load %arg6[%c0_81, %c0_82] : memref<128x384xbf16, #tpu.memory_space<vmem>>, vector<128x384xbf16>
    %c0_83 = arith.constant 0 : index
    %c0_84 = arith.constant 0 : index
    %305 = vector.load %arg8[%c0_83, %c0_84] : memref<1x128xf32, #tpu.memory_space<vmem>>, vector<1x128xf32>
    %306 = vector.shape_cast %305 : vector<1x128xf32> to vector<1x128xf32>
    %307 = vector.broadcast %306 : vector<1x128xf32> to vector<8x128xf32>
    %cst_85 = arith.constant 0.000000e+00 : f32
    %308 = vector.broadcast %cst_85 : f32 to vector<8x128xf32>
    %c0_i32_86 = arith.constant 0 : i32
    %309 = arith.truncf %308 : vector<8x128xf32> to vector<8x128xbf16>
    %cst_87 = arith.constant dense<0.000000e+00> : vector<8x384xf32>
    %310 = tpu.matmul %309, %304, %cst_87 {dimension_numbers = #tpu.dot_dimension_numbers<[1], [0], [0], [1], [0, 0, 1, 1], [], []>} : vector<8x128xbf16>, vector<128x384xbf16>, vector<8x384xf32> -> vector<8x384xf32>
    %311 = arith.index_cast %c0_i32_86 : i32 to index
    %c0_88 = arith.constant 0 : index
    %c0_89 = arith.constant 0 : index
    %312 = vector.load %arg15[%311, %c0_88, %c0_89] : memref<8x8x384xf32, #tpu.memory_space<vmem>>, vector<1x8x384xf32>
    %313 = vector.shape_cast %312 : vector<1x8x384xf32> to vector<8x384xf32>
    %314 = vector.extract_strided_slice %313 {offsets = [0, 0], sizes = [8, 128], strides = [1, 1]} : vector<8x384xf32> to vector<8x128xf32>
    %315 = vector.extract_strided_slice %310 {offsets = [0, 0], sizes = [8, 128], strides = [1, 1]} : vector<8x384xf32> to vector<8x128xf32>
    %316 = arith.addf %314, %315 : vector<8x128xf32>
    %317 = arith.negf %316 : vector<8x128xf32>
    %318 = math.exp %317 : vector<8x128xf32>
    %cst_90 = arith.constant 1.000000e+00 : f32
    %319 = vector.broadcast %cst_90 : f32 to vector<8x128xf32>
    %320 = arith.addf %319, %318 : vector<8x128xf32>
    %321 = arith.divf %319, %320 : vector<8x128xf32>
    %322 = vector.extract_strided_slice %313 {offsets = [0, 128], sizes = [8, 128], strides = [1, 1]} : vector<8x384xf32> to vector<8x128xf32>
    %323 = vector.extract_strided_slice %310 {offsets = [0, 128], sizes = [8, 128], strides = [1, 1]} : vector<8x384xf32> to vector<8x128xf32>
    %324 = arith.addf %322, %323 : vector<8x128xf32>
    %325 = arith.negf %324 : vector<8x128xf32>
    %326 = math.exp %325 : vector<8x128xf32>
    %cst_91 = arith.constant 1.000000e+00 : f32
    %327 = vector.broadcast %cst_91 : f32 to vector<8x128xf32>
    %328 = arith.addf %327, %326 : vector<8x128xf32>
    %329 = arith.divf %327, %328 : vector<8x128xf32>
    %330 = vector.extract_strided_slice %313 {offsets = [0, 256], sizes = [8, 128], strides = [1, 1]} : vector<8x384xf32> to vector<8x128xf32>
    %331 = vector.extract_strided_slice %310 {offsets = [0, 256], sizes = [8, 128], strides = [1, 1]} : vector<8x384xf32> to vector<8x128xf32>
    %332 = arith.addf %331, %307 : vector<8x128xf32>
    %333 = arith.mulf %321, %332 : vector<8x128xf32>
    %334 = arith.addf %330, %333 : vector<8x128xf32>
    %335 = math.tanh %334 : vector<8x128xf32>
    %336 = arith.subf %308, %335 : vector<8x128xf32>
    %337 = arith.mulf %329, %336 : vector<8x128xf32>
    %338 = arith.addf %335, %337 : vector<8x128xf32>
    %339 = arith.truncf %338 : vector<8x128xf32> to vector<8x128xbf16>
    %340 = arith.index_cast %c0_i32_86 : i32 to index
    %c0_92 = arith.constant 0 : index
    %c0_93 = arith.constant 0 : index
    %341 = vector.load %arg17[%340, %c0_92, %c0_93] : memref<8x8x128xbf16, #tpu.memory_space<vmem>>, vector<1x8x128xbf16>
    %342 = vector.shape_cast %341 : vector<1x8x128xbf16> to vector<8x128xbf16>
    %343 = vector.shape_cast %339 : vector<8x128xbf16> to vector<1x8x128xbf16>
    tpu.vector_store %arg17[%340, %c0_92, %c0_93], %343 {strides = array<i32>} : memref<8x8x128xbf16, #tpu.memory_space<vmem>>, vector<1x8x128xbf16>,
    %c1_i32_94 = arith.constant 1 : i32
    %344 = arith.truncf %338 : vector<8x128xf32> to vector<8x128xbf16>
    %cst_95 = arith.constant dense<0.000000e+00> : vector<8x384xf32>
    %345 = tpu.matmul %344, %304, %cst_95 {dimension_numbers = #tpu.dot_dimension_numbers<[1], [0], [0], [1], [0, 0, 1, 1], [], []>} : vector<8x128xbf16>, vector<128x384xbf16>, vector<8x384xf32> -> vector<8x384xf32>
    %346 = arith.index_cast %c1_i32_94 : i32 to index
    %c0_96 = arith.constant 0 : index
    %c0_97 = arith.constant 0 : index
    %347 = vector.load %arg15[%346, %c0_96, %c0_97] : memref<8x8x384xf32, #tpu.memory_space<vmem>>, vector<1x8x384xf32>
    %348 = vector.shape_cast %347 : vector<1x8x384xf32> to vector<8x384xf32>
    %349 = vector.extract_strided_slice %348 {offsets = [0, 0], sizes = [8, 128], strides = [1, 1]} : vector<8x384xf32> to vector<8x128xf32>
    %350 = vector.extract_strided_slice %345 {offsets = [0, 0], sizes = [8, 128], strides = [1, 1]} : vector<8x384xf32> to vector<8x128xf32>
    %351 = arith.addf %349, %350 : vector<8x128xf32>
    %352 = arith.negf %351 : vector<8x128xf32>
    %353 = math.exp %352 : vector<8x128xf32>
    %cst_98 = arith.constant 1.000000e+00 : f32
    %354 = vector.broadcast %cst_98 : f32 to vector<8x128xf32>
    %355 = arith.addf %354, %353 : vector<8x128xf32>
    %356 = arith.divf %354, %355 : vector<8x128xf32>
    %357 = vector.extract_strided_slice %348 {offsets = [0, 128], sizes = [8, 128], strides = [1, 1]} : vector<8x384xf32> to vector<8x128xf32>
    %358 = vector.extract_strided_slice %345 {offsets = [0, 128], sizes = [8, 128], strides = [1, 1]} : vector<8x384xf32> to vector<8x128xf32>
    %359 = arith.addf %357, %358 : vector<8x128xf32>
    %360 = arith.negf %359 : vector<8x128xf32>
    %361 = math.exp %360 : vector<8x128xf32>
    %cst_99 = arith.constant 1.000000e+00 : f32
    %362 = vector.broadcast %cst_99 : f32 to vector<8x128xf32>
    %363 = arith.addf %362, %361 : vector<8x128xf32>
    %364 = arith.divf %362, %363 : vector<8x128xf32>
    %365 = vector.extract_strided_slice %348 {offsets = [0, 256], sizes = [8, 128], strides = [1, 1]} : vector<8x384xf32> to vector<8x128xf32>
    %366 = vector.extract_strided_slice %345 {offsets = [0, 256], sizes = [8, 128], strides = [1, 1]} : vector<8x384xf32> to vector<8x128xf32>
    %367 = arith.addf %366, %307 : vector<8x128xf32>
    %368 = arith.mulf %356, %367 : vector<8x128xf32>
    %369 = arith.addf %365, %368 : vector<8x128xf32>
    %370 = math.tanh %369 : vector<8x128xf32>
    %371 = arith.subf %338, %370 : vector<8x128xf32>
    %372 = arith.mulf %364, %371 : vector<8x128xf32>
    %373 = arith.addf %370, %372 : vector<8x128xf32>
    %374 = arith.truncf %373 : vector<8x128xf32> to vector<8x128xbf16>
    %375 = arith.index_cast %c1_i32_94 : i32 to index
    %c0_100 = arith.constant 0 : index
    %c0_101 = arith.constant 0 : index
    %376 = vector.load %arg17[%375, %c0_100, %c0_101] : memref<8x8x128xbf16, #tpu.memory_space<vmem>>, vector<1x8x128xbf16>
    %377 = vector.shape_cast %376 : vector<1x8x128xbf16> to vector<8x128xbf16>
    %378 = vector.shape_cast %374 : vector<8x128xbf16> to vector<1x8x128xbf16>
    tpu.vector_store %arg17[%375, %c0_100, %c0_101], %378 {strides = array<i32>} : memref<8x8x128xbf16, #tpu.memory_space<vmem>>, vector<1x8x128xbf16>,
    %c2_i32_102 = arith.constant 2 : i32
    %379 = arith.truncf %373 : vector<8x128xf32> to vector<8x128xbf16>
    %cst_103 = arith.constant dense<0.000000e+00> : vector<8x384xf32>
    %380 = tpu.matmul %379, %304, %cst_103 {dimension_numbers = #tpu.dot_dimension_numbers<[1], [0], [0], [1], [0, 0, 1, 1], [], []>} : vector<8x128xbf16>, vector<128x384xbf16>, vector<8x384xf32> -> vector<8x384xf32>
    %381 = arith.index_cast %c2_i32_102 : i32 to index
    %c0_104 = arith.constant 0 : index
    %c0_105 = arith.constant 0 : index
    %382 = vector.load %arg15[%381, %c0_104, %c0_105] : memref<8x8x384xf32, #tpu.memory_space<vmem>>, vector<1x8x384xf32>
    %383 = vector.shape_cast %382 : vector<1x8x384xf32> to vector<8x384xf32>
    %384 = vector.extract_strided_slice %383 {offsets = [0, 0], sizes = [8, 128], strides = [1, 1]} : vector<8x384xf32> to vector<8x128xf32>
    %385 = vector.extract_strided_slice %380 {offsets = [0, 0], sizes = [8, 128], strides = [1, 1]} : vector<8x384xf32> to vector<8x128xf32>
    %386 = arith.addf %384, %385 : vector<8x128xf32>
    %387 = arith.negf %386 : vector<8x128xf32>
    %388 = math.exp %387 : vector<8x128xf32>
    %cst_106 = arith.constant 1.000000e+00 : f32
    %389 = vector.broadcast %cst_106 : f32 to vector<8x128xf32>
    %390 = arith.addf %389, %388 : vector<8x128xf32>
    %391 = arith.divf %389, %390 : vector<8x128xf32>
    %392 = vector.extract_strided_slice %383 {offsets = [0, 128], sizes = [8, 128], strides = [1, 1]} : vector<8x384xf32> to vector<8x128xf32>
    %393 = vector.extract_strided_slice %380 {offsets = [0, 128], sizes = [8, 128], strides = [1, 1]} : vector<8x384xf32> to vector<8x128xf32>
    %394 = arith.addf %392, %393 : vector<8x128xf32>
    %395 = arith.negf %394 : vector<8x128xf32>
    %396 = math.exp %395 : vector<8x128xf32>
    %cst_107 = arith.constant 1.000000e+00 : f32
    %397 = vector.broadcast %cst_107 : f32 to vector<8x128xf32>
    %398 = arith.addf %397, %396 : vector<8x128xf32>
    %399 = arith.divf %397, %398 : vector<8x128xf32>
    %400 = vector.extract_strided_slice %383 {offsets = [0, 256], sizes = [8, 128], strides = [1, 1]} : vector<8x384xf32> to vector<8x128xf32>
    %401 = vector.extract_strided_slice %380 {offsets = [0, 256], sizes = [8, 128], strides = [1, 1]} : vector<8x384xf32> to vector<8x128xf32>
    %402 = arith.addf %401, %307 : vector<8x128xf32>
    %403 = arith.mulf %391, %402 : vector<8x128xf32>
    %404 = arith.addf %400, %403 : vector<8x128xf32>
    %405 = math.tanh %404 : vector<8x128xf32>
    %406 = arith.subf %373, %405 : vector<8x128xf32>
    %407 = arith.mulf %399, %406 : vector<8x128xf32>
    %408 = arith.addf %405, %407 : vector<8x128xf32>
    %409 = arith.truncf %408 : vector<8x128xf32> to vector<8x128xbf16>
    %410 = arith.index_cast %c2_i32_102 : i32 to index
    %c0_108 = arith.constant 0 : index
    %c0_109 = arith.constant 0 : index
    %411 = vector.load %arg17[%410, %c0_108, %c0_109] : memref<8x8x128xbf16, #tpu.memory_space<vmem>>, vector<1x8x128xbf16>
    %412 = vector.shape_cast %411 : vector<1x8x128xbf16> to vector<8x128xbf16>
    %413 = vector.shape_cast %409 : vector<8x128xbf16> to vector<1x8x128xbf16>
    tpu.vector_store %arg17[%410, %c0_108, %c0_109], %413 {strides = array<i32>} : memref<8x8x128xbf16, #tpu.memory_space<vmem>>, vector<1x8x128xbf16>,
    %c3_i32_110 = arith.constant 3 : i32
    %414 = arith.truncf %408 : vector<8x128xf32> to vector<8x128xbf16>
    %cst_111 = arith.constant dense<0.000000e+00> : vector<8x384xf32>
    %415 = tpu.matmul %414, %304, %cst_111 {dimension_numbers = #tpu.dot_dimension_numbers<[1], [0], [0], [1], [0, 0, 1, 1], [], []>} : vector<8x128xbf16>, vector<128x384xbf16>, vector<8x384xf32> -> vector<8x384xf32>
    %416 = arith.index_cast %c3_i32_110 : i32 to index
    %c0_112 = arith.constant 0 : index
    %c0_113 = arith.constant 0 : index
    %417 = vector.load %arg15[%416, %c0_112, %c0_113] : memref<8x8x384xf32, #tpu.memory_space<vmem>>, vector<1x8x384xf32>
    %418 = vector.shape_cast %417 : vector<1x8x384xf32> to vector<8x384xf32>
    %419 = vector.extract_strided_slice %418 {offsets = [0, 0], sizes = [8, 128], strides = [1, 1]} : vector<8x384xf32> to vector<8x128xf32>
    %420 = vector.extract_strided_slice %415 {offsets = [0, 0], sizes = [8, 128], strides = [1, 1]} : vector<8x384xf32> to vector<8x128xf32>
    %421 = arith.addf %419, %420 : vector<8x128xf32>
    %422 = arith.negf %421 : vector<8x128xf32>
    %423 = math.exp %422 : vector<8x128xf32>
    %cst_114 = arith.constant 1.000000e+00 : f32
    %424 = vector.broadcast %cst_114 : f32 to vector<8x128xf32>
    %425 = arith.addf %424, %423 : vector<8x128xf32>
    %426 = arith.divf %424, %425 : vector<8x128xf32>
    %427 = vector.extract_strided_slice %418 {offsets = [0, 128], sizes = [8, 128], strides = [1, 1]} : vector<8x384xf32> to vector<8x128xf32>
    %428 = vector.extract_strided_slice %415 {offsets = [0, 128], sizes = [8, 128], strides = [1, 1]} : vector<8x384xf32> to vector<8x128xf32>
    %429 = arith.addf %427, %428 : vector<8x128xf32>
    %430 = arith.negf %429 : vector<8x128xf32>
    %431 = math.exp %430 : vector<8x128xf32>
    %cst_115 = arith.constant 1.000000e+00 : f32
    %432 = vector.broadcast %cst_115 : f32 to vector<8x128xf32>
    %433 = arith.addf %432, %431 : vector<8x128xf32>
    %434 = arith.divf %432, %433 : vector<8x128xf32>
    %435 = vector.extract_strided_slice %418 {offsets = [0, 256], sizes = [8, 128], strides = [1, 1]} : vector<8x384xf32> to vector<8x128xf32>
    %436 = vector.extract_strided_slice %415 {offsets = [0, 256], sizes = [8, 128], strides = [1, 1]} : vector<8x384xf32> to vector<8x128xf32>
    %437 = arith.addf %436, %307 : vector<8x128xf32>
    %438 = arith.mulf %426, %437 : vector<8x128xf32>
    %439 = arith.addf %435, %438 : vector<8x128xf32>
    %440 = math.tanh %439 : vector<8x128xf32>
    %441 = arith.subf %408, %440 : vector<8x128xf32>
    %442 = arith.mulf %434, %441 : vector<8x128xf32>
    %443 = arith.addf %440, %442 : vector<8x128xf32>
    %444 = arith.truncf %443 : vector<8x128xf32> to vector<8x128xbf16>
    %445 = arith.index_cast %c3_i32_110 : i32 to index
    %c0_116 = arith.constant 0 : index
    %c0_117 = arith.constant 0 : index
    %446 = vector.load %arg17[%445, %c0_116, %c0_117] : memref<8x8x128xbf16, #tpu.memory_space<vmem>>, vector<1x8x128xbf16>
    %447 = vector.shape_cast %446 : vector<1x8x128xbf16> to vector<8x128xbf16>
    %448 = vector.shape_cast %444 : vector<8x128xbf16> to vector<1x8x128xbf16>
    tpu.vector_store %arg17[%445, %c0_116, %c0_117], %448 {strides = array<i32>} : memref<8x8x128xbf16, #tpu.memory_space<vmem>>, vector<1x8x128xbf16>,
    %c4_i32_118 = arith.constant 4 : i32
    %449 = arith.truncf %443 : vector<8x128xf32> to vector<8x128xbf16>
    %cst_119 = arith.constant dense<0.000000e+00> : vector<8x384xf32>
    %450 = tpu.matmul %449, %304, %cst_119 {dimension_numbers = #tpu.dot_dimension_numbers<[1], [0], [0], [1], [0, 0, 1, 1], [], []>} : vector<8x128xbf16>, vector<128x384xbf16>, vector<8x384xf32> -> vector<8x384xf32>
    %451 = arith.index_cast %c4_i32_118 : i32 to index
    %c0_120 = arith.constant 0 : index
    %c0_121 = arith.constant 0 : index
    %452 = vector.load %arg15[%451, %c0_120, %c0_121] : memref<8x8x384xf32, #tpu.memory_space<vmem>>, vector<1x8x384xf32>
    %453 = vector.shape_cast %452 : vector<1x8x384xf32> to vector<8x384xf32>
    %454 = vector.extract_strided_slice %453 {offsets = [0, 0], sizes = [8, 128], strides = [1, 1]} : vector<8x384xf32> to vector<8x128xf32>
    %455 = vector.extract_strided_slice %450 {offsets = [0, 0], sizes = [8, 128], strides = [1, 1]} : vector<8x384xf32> to vector<8x128xf32>
    %456 = arith.addf %454, %455 : vector<8x128xf32>
    %457 = arith.negf %456 : vector<8x128xf32>
    %458 = math.exp %457 : vector<8x128xf32>
    %cst_122 = arith.constant 1.000000e+00 : f32
    %459 = vector.broadcast %cst_122 : f32 to vector<8x128xf32>
    %460 = arith.addf %459, %458 : vector<8x128xf32>
    %461 = arith.divf %459, %460 : vector<8x128xf32>
    %462 = vector.extract_strided_slice %453 {offsets = [0, 128], sizes = [8, 128], strides = [1, 1]} : vector<8x384xf32> to vector<8x128xf32>
    %463 = vector.extract_strided_slice %450 {offsets = [0, 128], sizes = [8, 128], strides = [1, 1]} : vector<8x384xf32> to vector<8x128xf32>
    %464 = arith.addf %462, %463 : vector<8x128xf32>
    %465 = arith.negf %464 : vector<8x128xf32>
    %466 = math.exp %465 : vector<8x128xf32>
    %cst_123 = arith.constant 1.000000e+00 : f32
    %467 = vector.broadcast %cst_123 : f32 to vector<8x128xf32>
    %468 = arith.addf %467, %466 : vector<8x128xf32>
    %469 = arith.divf %467, %468 : vector<8x128xf32>
    %470 = vector.extract_strided_slice %453 {offsets = [0, 256], sizes = [8, 128], strides = [1, 1]} : vector<8x384xf32> to vector<8x128xf32>
    %471 = vector.extract_strided_slice %450 {offsets = [0, 256], sizes = [8, 128], strides = [1, 1]} : vector<8x384xf32> to vector<8x128xf32>
    %472 = arith.addf %471, %307 : vector<8x128xf32>
    %473 = arith.mulf %461, %472 : vector<8x128xf32>
    %474 = arith.addf %470, %473 : vector<8x128xf32>
    %475 = math.tanh %474 : vector<8x128xf32>
    %476 = arith.subf %443, %475 : vector<8x128xf32>
    %477 = arith.mulf %469, %476 : vector<8x128xf32>
    %478 = arith.addf %475, %477 : vector<8x128xf32>
    %479 = arith.truncf %478 : vector<8x128xf32> to vector<8x128xbf16>
    %480 = arith.index_cast %c4_i32_118 : i32 to index
    %c0_124 = arith.constant 0 : index
    %c0_125 = arith.constant 0 : index
    %481 = vector.load %arg17[%480, %c0_124, %c0_125] : memref<8x8x128xbf16, #tpu.memory_space<vmem>>, vector<1x8x128xbf16>
    %482 = vector.shape_cast %481 : vector<1x8x128xbf16> to vector<8x128xbf16>
    %483 = vector.shape_cast %479 : vector<8x128xbf16> to vector<1x8x128xbf16>
    tpu.vector_store %arg17[%480, %c0_124, %c0_125], %483 {strides = array<i32>} : memref<8x8x128xbf16, #tpu.memory_space<vmem>>, vector<1x8x128xbf16>,
    %c5_i32_126 = arith.constant 5 : i32
    %484 = arith.truncf %478 : vector<8x128xf32> to vector<8x128xbf16>
    %cst_127 = arith.constant dense<0.000000e+00> : vector<8x384xf32>
    %485 = tpu.matmul %484, %304, %cst_127 {dimension_numbers = #tpu.dot_dimension_numbers<[1], [0], [0], [1], [0, 0, 1, 1], [], []>} : vector<8x128xbf16>, vector<128x384xbf16>, vector<8x384xf32> -> vector<8x384xf32>
    %486 = arith.index_cast %c5_i32_126 : i32 to index
    %c0_128 = arith.constant 0 : index
    %c0_129 = arith.constant 0 : index
    %487 = vector.load %arg15[%486, %c0_128, %c0_129] : memref<8x8x384xf32, #tpu.memory_space<vmem>>, vector<1x8x384xf32>
    %488 = vector.shape_cast %487 : vector<1x8x384xf32> to vector<8x384xf32>
    %489 = vector.extract_strided_slice %488 {offsets = [0, 0], sizes = [8, 128], strides = [1, 1]} : vector<8x384xf32> to vector<8x128xf32>
    %490 = vector.extract_strided_slice %485 {offsets = [0, 0], sizes = [8, 128], strides = [1, 1]} : vector<8x384xf32> to vector<8x128xf32>
    %491 = arith.addf %489, %490 : vector<8x128xf32>
    %492 = arith.negf %491 : vector<8x128xf32>
    %493 = math.exp %492 : vector<8x128xf32>
    %cst_130 = arith.constant 1.000000e+00 : f32
    %494 = vector.broadcast %cst_130 : f32 to vector<8x128xf32>
    %495 = arith.addf %494, %493 : vector<8x128xf32>
    %496 = arith.divf %494, %495 : vector<8x128xf32>
    %497 = vector.extract_strided_slice %488 {offsets = [0, 128], sizes = [8, 128], strides = [1, 1]} : vector<8x384xf32> to vector<8x128xf32>
    %498 = vector.extract_strided_slice %485 {offsets = [0, 128], sizes = [8, 128], strides = [1, 1]} : vector<8x384xf32> to vector<8x128xf32>
    %499 = arith.addf %497, %498 : vector<8x128xf32>
    %500 = arith.negf %499 : vector<8x128xf32>
    %501 = math.exp %500 : vector<8x128xf32>
    %cst_131 = arith.constant 1.000000e+00 : f32
    %502 = vector.broadcast %cst_131 : f32 to vector<8x128xf32>
    %503 = arith.addf %502, %501 : vector<8x128xf32>
    %504 = arith.divf %502, %503 : vector<8x128xf32>
    %505 = vector.extract_strided_slice %488 {offsets = [0, 256], sizes = [8, 128], strides = [1, 1]} : vector<8x384xf32> to vector<8x128xf32>
    %506 = vector.extract_strided_slice %485 {offsets = [0, 256], sizes = [8, 128], strides = [1, 1]} : vector<8x384xf32> to vector<8x128xf32>
    %507 = arith.addf %506, %307 : vector<8x128xf32>
    %508 = arith.mulf %496, %507 : vector<8x128xf32>
    %509 = arith.addf %505, %508 : vector<8x128xf32>
    %510 = math.tanh %509 : vector<8x128xf32>
    %511 = arith.subf %478, %510 : vector<8x128xf32>
    %512 = arith.mulf %504, %511 : vector<8x128xf32>
    %513 = arith.addf %510, %512 : vector<8x128xf32>
    %514 = arith.truncf %513 : vector<8x128xf32> to vector<8x128xbf16>
    %515 = arith.index_cast %c5_i32_126 : i32 to index
    %c0_132 = arith.constant 0 : index
    %c0_133 = arith.constant 0 : index
    %516 = vector.load %arg17[%515, %c0_132, %c0_133] : memref<8x8x128xbf16, #tpu.memory_space<vmem>>, vector<1x8x128xbf16>
    %517 = vector.shape_cast %516 : vector<1x8x128xbf16> to vector<8x128xbf16>
    %518 = vector.shape_cast %514 : vector<8x128xbf16> to vector<1x8x128xbf16>
    tpu.vector_store %arg17[%515, %c0_132, %c0_133], %518 {strides = array<i32>} : memref<8x8x128xbf16, #tpu.memory_space<vmem>>, vector<1x8x128xbf16>,
    %c6_i32_134 = arith.constant 6 : i32
    %519 = arith.truncf %513 : vector<8x128xf32> to vector<8x128xbf16>
    %cst_135 = arith.constant dense<0.000000e+00> : vector<8x384xf32>
    %520 = tpu.matmul %519, %304, %cst_135 {dimension_numbers = #tpu.dot_dimension_numbers<[1], [0], [0], [1], [0, 0, 1, 1], [], []>} : vector<8x128xbf16>, vector<128x384xbf16>, vector<8x384xf32> -> vector<8x384xf32>
    %521 = arith.index_cast %c6_i32_134 : i32 to index
    %c0_136 = arith.constant 0 : index
    %c0_137 = arith.constant 0 : index
    %522 = vector.load %arg15[%521, %c0_136, %c0_137] : memref<8x8x384xf32, #tpu.memory_space<vmem>>, vector<1x8x384xf32>
    %523 = vector.shape_cast %522 : vector<1x8x384xf32> to vector<8x384xf32>
    %524 = vector.extract_strided_slice %523 {offsets = [0, 0], sizes = [8, 128], strides = [1, 1]} : vector<8x384xf32> to vector<8x128xf32>
    %525 = vector.extract_strided_slice %520 {offsets = [0, 0], sizes = [8, 128], strides = [1, 1]} : vector<8x384xf32> to vector<8x128xf32>
    %526 = arith.addf %524, %525 : vector<8x128xf32>
    %527 = arith.negf %526 : vector<8x128xf32>
    %528 = math.exp %527 : vector<8x128xf32>
    %cst_138 = arith.constant 1.000000e+00 : f32
    %529 = vector.broadcast %cst_138 : f32 to vector<8x128xf32>
    %530 = arith.addf %529, %528 : vector<8x128xf32>
    %531 = arith.divf %529, %530 : vector<8x128xf32>
    %532 = vector.extract_strided_slice %523 {offsets = [0, 128], sizes = [8, 128], strides = [1, 1]} : vector<8x384xf32> to vector<8x128xf32>
    %533 = vector.extract_strided_slice %520 {offsets = [0, 128], sizes = [8, 128], strides = [1, 1]} : vector<8x384xf32> to vector<8x128xf32>
    %534 = arith.addf %532, %533 : vector<8x128xf32>
    %535 = arith.negf %534 : vector<8x128xf32>
    %536 = math.exp %535 : vector<8x128xf32>
    %cst_139 = arith.constant 1.000000e+00 : f32
    %537 = vector.broadcast %cst_139 : f32 to vector<8x128xf32>
    %538 = arith.addf %537, %536 : vector<8x128xf32>
    %539 = arith.divf %537, %538 : vector<8x128xf32>
    %540 = vector.extract_strided_slice %523 {offsets = [0, 256], sizes = [8, 128], strides = [1, 1]} : vector<8x384xf32> to vector<8x128xf32>
    %541 = vector.extract_strided_slice %520 {offsets = [0, 256], sizes = [8, 128], strides = [1, 1]} : vector<8x384xf32> to vector<8x128xf32>
    %542 = arith.addf %541, %307 : vector<8x128xf32>
    %543 = arith.mulf %531, %542 : vector<8x128xf32>
    %544 = arith.addf %540, %543 : vector<8x128xf32>
    %545 = math.tanh %544 : vector<8x128xf32>
    %546 = arith.subf %513, %545 : vector<8x128xf32>
    %547 = arith.mulf %539, %546 : vector<8x128xf32>
    %548 = arith.addf %545, %547 : vector<8x128xf32>
    %549 = arith.truncf %548 : vector<8x128xf32> to vector<8x128xbf16>
    %550 = arith.index_cast %c6_i32_134 : i32 to index
    %c0_140 = arith.constant 0 : index
    %c0_141 = arith.constant 0 : index
    %551 = vector.load %arg17[%550, %c0_140, %c0_141] : memref<8x8x128xbf16, #tpu.memory_space<vmem>>, vector<1x8x128xbf16>
    %552 = vector.shape_cast %551 : vector<1x8x128xbf16> to vector<8x128xbf16>
    %553 = vector.shape_cast %549 : vector<8x128xbf16> to vector<1x8x128xbf16>
    tpu.vector_store %arg17[%550, %c0_140, %c0_141], %553 {strides = array<i32>} : memref<8x8x128xbf16, #tpu.memory_space<vmem>>, vector<1x8x128xbf16>,
    %c7_i32_142 = arith.constant 7 : i32
    %554 = arith.truncf %548 : vector<8x128xf32> to vector<8x128xbf16>
    %cst_143 = arith.constant dense<0.000000e+00> : vector<8x384xf32>
    %555 = tpu.matmul %554, %304, %cst_143 {dimension_numbers = #tpu.dot_dimension_numbers<[1], [0], [0], [1], [0, 0, 1, 1], [], []>} : vector<8x128xbf16>, vector<128x384xbf16>, vector<8x384xf32> -> vector<8x384xf32>
    %556 = arith.index_cast %c7_i32_142 : i32 to index
    %c0_144 = arith.constant 0 : index
    %c0_145 = arith.constant 0 : index
    %557 = vector.load %arg15[%556, %c0_144, %c0_145] : memref<8x8x384xf32, #tpu.memory_space<vmem>>, vector<1x8x384xf32>
    %558 = vector.shape_cast %557 : vector<1x8x384xf32> to vector<8x384xf32>
    %559 = vector.extract_strided_slice %558 {offsets = [0, 0], sizes = [8, 128], strides = [1, 1]} : vector<8x384xf32> to vector<8x128xf32>
    %560 = vector.extract_strided_slice %555 {offsets = [0, 0], sizes = [8, 128], strides = [1, 1]} : vector<8x384xf32> to vector<8x128xf32>
    %561 = arith.addf %559, %560 : vector<8x128xf32>
    %562 = arith.negf %561 : vector<8x128xf32>
    %563 = math.exp %562 : vector<8x128xf32>
    %cst_146 = arith.constant 1.000000e+00 : f32
    %564 = vector.broadcast %cst_146 : f32 to vector<8x128xf32>
    %565 = arith.addf %564, %563 : vector<8x128xf32>
    %566 = arith.divf %564, %565 : vector<8x128xf32>
    %567 = vector.extract_strided_slice %558 {offsets = [0, 128], sizes = [8, 128], strides = [1, 1]} : vector<8x384xf32> to vector<8x128xf32>
    %568 = vector.extract_strided_slice %555 {offsets = [0, 128], sizes = [8, 128], strides = [1, 1]} : vector<8x384xf32> to vector<8x128xf32>
    %569 = arith.addf %567, %568 : vector<8x128xf32>
    %570 = arith.negf %569 : vector<8x128xf32>
    %571 = math.exp %570 : vector<8x128xf32>
    %cst_147 = arith.constant 1.000000e+00 : f32
    %572 = vector.broadcast %cst_147 : f32 to vector<8x128xf32>
    %573 = arith.addf %572, %571 : vector<8x128xf32>
    %574 = arith.divf %572, %573 : vector<8x128xf32>
    %575 = vector.extract_strided_slice %558 {offsets = [0, 256], sizes = [8, 128], strides = [1, 1]} : vector<8x384xf32> to vector<8x128xf32>
    %576 = vector.extract_strided_slice %555 {offsets = [0, 256], sizes = [8, 128], strides = [1, 1]} : vector<8x384xf32> to vector<8x128xf32>
    %577 = arith.addf %576, %307 : vector<8x128xf32>
    %578 = arith.mulf %566, %577 : vector<8x128xf32>
    %579 = arith.addf %575, %578 : vector<8x128xf32>
    %580 = math.tanh %579 : vector<8x128xf32>
    %581 = arith.subf %548, %580 : vector<8x128xf32>
    %582 = arith.mulf %574, %581 : vector<8x128xf32>
    %583 = arith.addf %580, %582 : vector<8x128xf32>
    %584 = arith.truncf %583 : vector<8x128xf32> to vector<8x128xbf16>
    %585 = arith.index_cast %c7_i32_142 : i32 to index
    %c0_148 = arith.constant 0 : index
    %c0_149 = arith.constant 0 : index
    %586 = vector.load %arg17[%585, %c0_148, %c0_149] : memref<8x8x128xbf16, #tpu.memory_space<vmem>>, vector<1x8x128xbf16>
    %587 = vector.shape_cast %586 : vector<1x8x128xbf16> to vector<8x128xbf16>
    %588 = vector.shape_cast %584 : vector<8x128xbf16> to vector<1x8x128xbf16>
    tpu.vector_store %arg17[%585, %c0_148, %c0_149], %588 {strides = array<i32>} : memref<8x8x128xbf16, #tpu.memory_space<vmem>>, vector<1x8x128xbf16>,
    %c8_i32_150 = arith.constant 8 : i32
    %c0_151 = arith.constant 0 : index
    %c0_152 = arith.constant 0 : index
    %c0_153 = arith.constant 0 : index
    %589 = vector.load %arg17[%c0_151, %c0_152, %c0_153] : memref<8x8x128xbf16, #tpu.memory_space<vmem>>, vector<8x8x128xbf16>
    %590 = vector.shape_cast %589 : vector<8x8x128xbf16> to vector<64x128xbf16>
    %c0_154 = arith.constant 0 : index
    %c0_155 = arith.constant 0 : index
    %591 = vector.load %arg9[%c0_154, %c0_155] : memref<128x384xbf16, #tpu.memory_space<vmem>>, vector<128x384xbf16>
    %cst_156 = arith.constant dense<0.000000e+00> : vector<64x384xf32>
    %592 = tpu.matmul %590, %591, %cst_156 {dimension_numbers = #tpu.dot_dimension_numbers<[1], [0], [0], [1], [0, 0, 1, 1], [], []>} : vector<64x128xbf16>, vector<128x384xbf16>, vector<64x384xf32> -> vector<64x384xf32>
    %c0_157 = arith.constant 0 : index
    %c0_158 = arith.constant 0 : index
    %593 = vector.load %arg11[%c0_157, %c0_158] : memref<1x384xf32, #tpu.memory_space<vmem>>, vector<1x384xf32>
    %594 = vector.broadcast %593 : vector<1x384xf32> to vector<64x384xf32>
    %595 = arith.addf %592, %594 : vector<64x384xf32>
    %596 = vector.shape_cast %595 : vector<64x384xf32> to vector<8x8x384xf32>
    %c0_159 = arith.constant 0 : index
    %c0_160 = arith.constant 0 : index
    %c0_161 = arith.constant 0 : index
    %597 = vector.load %arg15[%c0_159, %c0_160, %c0_161] : memref<8x8x384xf32, #tpu.memory_space<vmem>>, vector<8x8x384xf32>
    tpu.vector_store %arg15[%c0_159, %c0_160, %c0_161], %596 {strides = array<i32>} : memref<8x8x384xf32, #tpu.memory_space<vmem>>, vector<8x8x384xf32>,
    %c0_162 = arith.constant 0 : index
    %c0_163 = arith.constant 0 : index
    %598 = vector.load %arg10[%c0_162, %c0_163] : memref<128x384xbf16, #tpu.memory_space<vmem>>, vector<128x384xbf16>
    %c0_164 = arith.constant 0 : index
    %c0_165 = arith.constant 0 : index
    %599 = vector.load %arg12[%c0_164, %c0_165] : memref<1x128xf32, #tpu.memory_space<vmem>>, vector<1x128xf32>
    %600 = vector.shape_cast %599 : vector<1x128xf32> to vector<1x128xf32>
    %601 = vector.broadcast %600 : vector<1x128xf32> to vector<8x128xf32>
    %cst_166 = arith.constant 0.000000e+00 : f32
    %602 = vector.broadcast %cst_166 : f32 to vector<8x128xf32>
    %c0_i32_167 = arith.constant 0 : i32
    %603 = arith.truncf %602 : vector<8x128xf32> to vector<8x128xbf16>
    %cst_168 = arith.constant dense<0.000000e+00> : vector<8x384xf32>
    %604 = tpu.matmul %603, %598, %cst_168 {dimension_numbers = #tpu.dot_dimension_numbers<[1], [0], [0], [1], [0, 0, 1, 1], [], []>} : vector<8x128xbf16>, vector<128x384xbf16>, vector<8x384xf32> -> vector<8x384xf32>
    %605 = arith.index_cast %c0_i32_167 : i32 to index
    %c0_169 = arith.constant 0 : index
    %c0_170 = arith.constant 0 : index
    %606 = vector.load %arg15[%605, %c0_169, %c0_170] : memref<8x8x384xf32, #tpu.memory_space<vmem>>, vector<1x8x384xf32>
    %607 = vector.shape_cast %606 : vector<1x8x384xf32> to vector<8x384xf32>
    %608 = vector.extract_strided_slice %607 {offsets = [0, 0], sizes = [8, 128], strides = [1, 1]} : vector<8x384xf32> to vector<8x128xf32>
    %609 = vector.extract_strided_slice %604 {offsets = [0, 0], sizes = [8, 128], strides = [1, 1]} : vector<8x384xf32> to vector<8x128xf32>
    %610 = arith.addf %608, %609 : vector<8x128xf32>
    %611 = arith.negf %610 : vector<8x128xf32>
    %612 = math.exp %611 : vector<8x128xf32>
    %cst_171 = arith.constant 1.000000e+00 : f32
    %613 = vector.broadcast %cst_171 : f32 to vector<8x128xf32>
    %614 = arith.addf %613, %612 : vector<8x128xf32>
    %615 = arith.divf %613, %614 : vector<8x128xf32>
    %616 = vector.extract_strided_slice %607 {offsets = [0, 128], sizes = [8, 128], strides = [1, 1]} : vector<8x384xf32> to vector<8x128xf32>
    %617 = vector.extract_strided_slice %604 {offsets = [0, 128], sizes = [8, 128], strides = [1, 1]} : vector<8x384xf32> to vector<8x128xf32>
    %618 = arith.addf %616, %617 : vector<8x128xf32>
    %619 = arith.negf %618 : vector<8x128xf32>
    %620 = math.exp %619 : vector<8x128xf32>
    %cst_172 = arith.constant 1.000000e+00 : f32
    %621 = vector.broadcast %cst_172 : f32 to vector<8x128xf32>
    %622 = arith.addf %621, %620 : vector<8x128xf32>
    %623 = arith.divf %621, %622 : vector<8x128xf32>
    %624 = vector.extract_strided_slice %607 {offsets = [0, 256], sizes = [8, 128], strides = [1, 1]} : vector<8x384xf32> to vector<8x128xf32>
    %625 = vector.extract_strided_slice %604 {offsets = [0, 256], sizes = [8, 128], strides = [1, 1]} : vector<8x384xf32> to vector<8x128xf32>
    %626 = arith.addf %625, %601 : vector<8x128xf32>
    %627 = arith.mulf %615, %626 : vector<8x128xf32>
    %628 = arith.addf %624, %627 : vector<8x128xf32>
    %629 = math.tanh %628 : vector<8x128xf32>
    %630 = arith.subf %602, %629 : vector<8x128xf32>
    %631 = arith.mulf %623, %630 : vector<8x128xf32>
    %632 = arith.addf %629, %631 : vector<8x128xf32>
    %633 = arith.index_cast %c0_i32_167 : i32 to index
    %c0_173 = arith.constant 0 : index
    %c0_174 = arith.constant 0 : index
    %634 = vector.load %arg18[%633, %c0_173, %c0_174] : memref<8x8x128xf32, #tpu.memory_space<vmem>>, vector<1x8x128xf32>
    %635 = vector.shape_cast %634 : vector<1x8x128xf32> to vector<8x128xf32>
    %636 = vector.shape_cast %632 : vector<8x128xf32> to vector<1x8x128xf32>
    tpu.vector_store %arg18[%633, %c0_173, %c0_174], %636 {strides = array<i32>} : memref<8x8x128xf32, #tpu.memory_space<vmem>>, vector<1x8x128xf32>,
    %c1_i32_175 = arith.constant 1 : i32
    %637 = arith.truncf %632 : vector<8x128xf32> to vector<8x128xbf16>
    %cst_176 = arith.constant dense<0.000000e+00> : vector<8x384xf32>
    %638 = tpu.matmul %637, %598, %cst_176 {dimension_numbers = #tpu.dot_dimension_numbers<[1], [0], [0], [1], [0, 0, 1, 1], [], []>} : vector<8x128xbf16>, vector<128x384xbf16>, vector<8x384xf32> -> vector<8x384xf32>
    %639 = arith.index_cast %c1_i32_175 : i32 to index
    %c0_177 = arith.constant 0 : index
    %c0_178 = arith.constant 0 : index
    %640 = vector.load %arg15[%639, %c0_177, %c0_178] : memref<8x8x384xf32, #tpu.memory_space<vmem>>, vector<1x8x384xf32>
    %641 = vector.shape_cast %640 : vector<1x8x384xf32> to vector<8x384xf32>
    %642 = vector.extract_strided_slice %641 {offsets = [0, 0], sizes = [8, 128], strides = [1, 1]} : vector<8x384xf32> to vector<8x128xf32>
    %643 = vector.extract_strided_slice %638 {offsets = [0, 0], sizes = [8, 128], strides = [1, 1]} : vector<8x384xf32> to vector<8x128xf32>
    %644 = arith.addf %642, %643 : vector<8x128xf32>
    %645 = arith.negf %644 : vector<8x128xf32>
    %646 = math.exp %645 : vector<8x128xf32>
    %cst_179 = arith.constant 1.000000e+00 : f32
    %647 = vector.broadcast %cst_179 : f32 to vector<8x128xf32>
    %648 = arith.addf %647, %646 : vector<8x128xf32>
    %649 = arith.divf %647, %648 : vector<8x128xf32>
    %650 = vector.extract_strided_slice %641 {offsets = [0, 128], sizes = [8, 128], strides = [1, 1]} : vector<8x384xf32> to vector<8x128xf32>
    %651 = vector.extract_strided_slice %638 {offsets = [0, 128], sizes = [8, 128], strides = [1, 1]} : vector<8x384xf32> to vector<8x128xf32>
    %652 = arith.addf %650, %651 : vector<8x128xf32>
    %653 = arith.negf %652 : vector<8x128xf32>
    %654 = math.exp %653 : vector<8x128xf32>
    %cst_180 = arith.constant 1.000000e+00 : f32
    %655 = vector.broadcast %cst_180 : f32 to vector<8x128xf32>
    %656 = arith.addf %655, %654 : vector<8x128xf32>
    %657 = arith.divf %655, %656 : vector<8x128xf32>
    %658 = vector.extract_strided_slice %641 {offsets = [0, 256], sizes = [8, 128], strides = [1, 1]} : vector<8x384xf32> to vector<8x128xf32>
    %659 = vector.extract_strided_slice %638 {offsets = [0, 256], sizes = [8, 128], strides = [1, 1]} : vector<8x384xf32> to vector<8x128xf32>
    %660 = arith.addf %659, %601 : vector<8x128xf32>
    %661 = arith.mulf %649, %660 : vector<8x128xf32>
    %662 = arith.addf %658, %661 : vector<8x128xf32>
    %663 = math.tanh %662 : vector<8x128xf32>
    %664 = arith.subf %632, %663 : vector<8x128xf32>
    %665 = arith.mulf %657, %664 : vector<8x128xf32>
    %666 = arith.addf %663, %665 : vector<8x128xf32>
    %667 = arith.index_cast %c1_i32_175 : i32 to index
    %c0_181 = arith.constant 0 : index
    %c0_182 = arith.constant 0 : index
    %668 = vector.load %arg18[%667, %c0_181, %c0_182] : memref<8x8x128xf32, #tpu.memory_space<vmem>>, vector<1x8x128xf32>
    %669 = vector.shape_cast %668 : vector<1x8x128xf32> to vector<8x128xf32>
    %670 = vector.shape_cast %666 : vector<8x128xf32> to vector<1x8x128xf32>
    tpu.vector_store %arg18[%667, %c0_181, %c0_182], %670 {strides = array<i32>} : memref<8x8x128xf32, #tpu.memory_space<vmem>>, vector<1x8x128xf32>,
    %c2_i32_183 = arith.constant 2 : i32
    %671 = arith.truncf %666 : vector<8x128xf32> to vector<8x128xbf16>
    %cst_184 = arith.constant dense<0.000000e+00> : vector<8x384xf32>
    %672 = tpu.matmul %671, %598, %cst_184 {dimension_numbers = #tpu.dot_dimension_numbers<[1], [0], [0], [1], [0, 0, 1, 1], [], []>} : vector<8x128xbf16>, vector<128x384xbf16>, vector<8x384xf32> -> vector<8x384xf32>
    %673 = arith.index_cast %c2_i32_183 : i32 to index
    %c0_185 = arith.constant 0 : index
    %c0_186 = arith.constant 0 : index
    %674 = vector.load %arg15[%673, %c0_185, %c0_186] : memref<8x8x384xf32, #tpu.memory_space<vmem>>, vector<1x8x384xf32>
    %675 = vector.shape_cast %674 : vector<1x8x384xf32> to vector<8x384xf32>
    %676 = vector.extract_strided_slice %675 {offsets = [0, 0], sizes = [8, 128], strides = [1, 1]} : vector<8x384xf32> to vector<8x128xf32>
    %677 = vector.extract_strided_slice %672 {offsets = [0, 0], sizes = [8, 128], strides = [1, 1]} : vector<8x384xf32> to vector<8x128xf32>
    %678 = arith.addf %676, %677 : vector<8x128xf32>
    %679 = arith.negf %678 : vector<8x128xf32>
    %680 = math.exp %679 : vector<8x128xf32>
    %cst_187 = arith.constant 1.000000e+00 : f32
    %681 = vector.broadcast %cst_187 : f32 to vector<8x128xf32>
    %682 = arith.addf %681, %680 : vector<8x128xf32>
    %683 = arith.divf %681, %682 : vector<8x128xf32>
    %684 = vector.extract_strided_slice %675 {offsets = [0, 128], sizes = [8, 128], strides = [1, 1]} : vector<8x384xf32> to vector<8x128xf32>
    %685 = vector.extract_strided_slice %672 {offsets = [0, 128], sizes = [8, 128], strides = [1, 1]} : vector<8x384xf32> to vector<8x128xf32>
    %686 = arith.addf %684, %685 : vector<8x128xf32>
    %687 = arith.negf %686 : vector<8x128xf32>
    %688 = math.exp %687 : vector<8x128xf32>
    %cst_188 = arith.constant 1.000000e+00 : f32
    %689 = vector.broadcast %cst_188 : f32 to vector<8x128xf32>
    %690 = arith.addf %689, %688 : vector<8x128xf32>
    %691 = arith.divf %689, %690 : vector<8x128xf32>
    %692 = vector.extract_strided_slice %675 {offsets = [0, 256], sizes = [8, 128], strides = [1, 1]} : vector<8x384xf32> to vector<8x128xf32>
    %693 = vector.extract_strided_slice %672 {offsets = [0, 256], sizes = [8, 128], strides = [1, 1]} : vector<8x384xf32> to vector<8x128xf32>
    %694 = arith.addf %693, %601 : vector<8x128xf32>
    %695 = arith.mulf %683, %694 : vector<8x128xf32>
    %696 = arith.addf %692, %695 : vector<8x128xf32>
    %697 = math.tanh %696 : vector<8x128xf32>
    %698 = arith.subf %666, %697 : vector<8x128xf32>
    %699 = arith.mulf %691, %698 : vector<8x128xf32>
    %700 = arith.addf %697, %699 : vector<8x128xf32>
    %701 = arith.index_cast %c2_i32_183 : i32 to index
    %c0_189 = arith.constant 0 : index
    %c0_190 = arith.constant 0 : index
    %702 = vector.load %arg18[%701, %c0_189, %c0_190] : memref<8x8x128xf32, #tpu.memory_space<vmem>>, vector<1x8x128xf32>
    %703 = vector.shape_cast %702 : vector<1x8x128xf32> to vector<8x128xf32>
    %704 = vector.shape_cast %700 : vector<8x128xf32> to vector<1x8x128xf32>
    tpu.vector_store %arg18[%701, %c0_189, %c0_190], %704 {strides = array<i32>} : memref<8x8x128xf32, #tpu.memory_space<vmem>>, vector<1x8x128xf32>,
    %c3_i32_191 = arith.constant 3 : i32
    %705 = arith.truncf %700 : vector<8x128xf32> to vector<8x128xbf16>
    %cst_192 = arith.constant dense<0.000000e+00> : vector<8x384xf32>
    %706 = tpu.matmul %705, %598, %cst_192 {dimension_numbers = #tpu.dot_dimension_numbers<[1], [0], [0], [1], [0, 0, 1, 1], [], []>} : vector<8x128xbf16>, vector<128x384xbf16>, vector<8x384xf32> -> vector<8x384xf32>
    %707 = arith.index_cast %c3_i32_191 : i32 to index
    %c0_193 = arith.constant 0 : index
    %c0_194 = arith.constant 0 : index
    %708 = vector.load %arg15[%707, %c0_193, %c0_194] : memref<8x8x384xf32, #tpu.memory_space<vmem>>, vector<1x8x384xf32>
    %709 = vector.shape_cast %708 : vector<1x8x384xf32> to vector<8x384xf32>
    %710 = vector.extract_strided_slice %709 {offsets = [0, 0], sizes = [8, 128], strides = [1, 1]} : vector<8x384xf32> to vector<8x128xf32>
    %711 = vector.extract_strided_slice %706 {offsets = [0, 0], sizes = [8, 128], strides = [1, 1]} : vector<8x384xf32> to vector<8x128xf32>
    %712 = arith.addf %710, %711 : vector<8x128xf32>
    %713 = arith.negf %712 : vector<8x128xf32>
    %714 = math.exp %713 : vector<8x128xf32>
    %cst_195 = arith.constant 1.000000e+00 : f32
    %715 = vector.broadcast %cst_195 : f32 to vector<8x128xf32>
    %716 = arith.addf %715, %714 : vector<8x128xf32>
    %717 = arith.divf %715, %716 : vector<8x128xf32>
    %718 = vector.extract_strided_slice %709 {offsets = [0, 128], sizes = [8, 128], strides = [1, 1]} : vector<8x384xf32> to vector<8x128xf32>
    %719 = vector.extract_strided_slice %706 {offsets = [0, 128], sizes = [8, 128], strides = [1, 1]} : vector<8x384xf32> to vector<8x128xf32>
    %720 = arith.addf %718, %719 : vector<8x128xf32>
    %721 = arith.negf %720 : vector<8x128xf32>
    %722 = math.exp %721 : vector<8x128xf32>
    %cst_196 = arith.constant 1.000000e+00 : f32
    %723 = vector.broadcast %cst_196 : f32 to vector<8x128xf32>
    %724 = arith.addf %723, %722 : vector<8x128xf32>
    %725 = arith.divf %723, %724 : vector<8x128xf32>
    %726 = vector.extract_strided_slice %709 {offsets = [0, 256], sizes = [8, 128], strides = [1, 1]} : vector<8x384xf32> to vector<8x128xf32>
    %727 = vector.extract_strided_slice %706 {offsets = [0, 256], sizes = [8, 128], strides = [1, 1]} : vector<8x384xf32> to vector<8x128xf32>
    %728 = arith.addf %727, %601 : vector<8x128xf32>
    %729 = arith.mulf %717, %728 : vector<8x128xf32>
    %730 = arith.addf %726, %729 : vector<8x128xf32>
    %731 = math.tanh %730 : vector<8x128xf32>
    %732 = arith.subf %700, %731 : vector<8x128xf32>
    %733 = arith.mulf %725, %732 : vector<8x128xf32>
    %734 = arith.addf %731, %733 : vector<8x128xf32>
    %735 = arith.index_cast %c3_i32_191 : i32 to index
    %c0_197 = arith.constant 0 : index
    %c0_198 = arith.constant 0 : index
    %736 = vector.load %arg18[%735, %c0_197, %c0_198] : memref<8x8x128xf32, #tpu.memory_space<vmem>>, vector<1x8x128xf32>
    %737 = vector.shape_cast %736 : vector<1x8x128xf32> to vector<8x128xf32>
    %738 = vector.shape_cast %734 : vector<8x128xf32> to vector<1x8x128xf32>
    tpu.vector_store %arg18[%735, %c0_197, %c0_198], %738 {strides = array<i32>} : memref<8x8x128xf32, #tpu.memory_space<vmem>>, vector<1x8x128xf32>,
    %c4_i32_199 = arith.constant 4 : i32
    %739 = arith.truncf %734 : vector<8x128xf32> to vector<8x128xbf16>
    %cst_200 = arith.constant dense<0.000000e+00> : vector<8x384xf32>
    %740 = tpu.matmul %739, %598, %cst_200 {dimension_numbers = #tpu.dot_dimension_numbers<[1], [0], [0], [1], [0, 0, 1, 1], [], []>} : vector<8x128xbf16>, vector<128x384xbf16>, vector<8x384xf32> -> vector<8x384xf32>
    %741 = arith.index_cast %c4_i32_199 : i32 to index
    %c0_201 = arith.constant 0 : index
    %c0_202 = arith.constant 0 : index
    %742 = vector.load %arg15[%741, %c0_201, %c0_202] : memref<8x8x384xf32, #tpu.memory_space<vmem>>, vector<1x8x384xf32>
    %743 = vector.shape_cast %742 : vector<1x8x384xf32> to vector<8x384xf32>
    %744 = vector.extract_strided_slice %743 {offsets = [0, 0], sizes = [8, 128], strides = [1, 1]} : vector<8x384xf32> to vector<8x128xf32>
    %745 = vector.extract_strided_slice %740 {offsets = [0, 0], sizes = [8, 128], strides = [1, 1]} : vector<8x384xf32> to vector<8x128xf32>
    %746 = arith.addf %744, %745 : vector<8x128xf32>
    %747 = arith.negf %746 : vector<8x128xf32>
    %748 = math.exp %747 : vector<8x128xf32>
    %cst_203 = arith.constant 1.000000e+00 : f32
    %749 = vector.broadcast %cst_203 : f32 to vector<8x128xf32>
    %750 = arith.addf %749, %748 : vector<8x128xf32>
    %751 = arith.divf %749, %750 : vector<8x128xf32>
    %752 = vector.extract_strided_slice %743 {offsets = [0, 128], sizes = [8, 128], strides = [1, 1]} : vector<8x384xf32> to vector<8x128xf32>
    %753 = vector.extract_strided_slice %740 {offsets = [0, 128], sizes = [8, 128], strides = [1, 1]} : vector<8x384xf32> to vector<8x128xf32>
    %754 = arith.addf %752, %753 : vector<8x128xf32>
    %755 = arith.negf %754 : vector<8x128xf32>
    %756 = math.exp %755 : vector<8x128xf32>
    %cst_204 = arith.constant 1.000000e+00 : f32
    %757 = vector.broadcast %cst_204 : f32 to vector<8x128xf32>
    %758 = arith.addf %757, %756 : vector<8x128xf32>
    %759 = arith.divf %757, %758 : vector<8x128xf32>
    %760 = vector.extract_strided_slice %743 {offsets = [0, 256], sizes = [8, 128], strides = [1, 1]} : vector<8x384xf32> to vector<8x128xf32>
    %761 = vector.extract_strided_slice %740 {offsets = [0, 256], sizes = [8, 128], strides = [1, 1]} : vector<8x384xf32> to vector<8x128xf32>
    %762 = arith.addf %761, %601 : vector<8x128xf32>
    %763 = arith.mulf %751, %762 : vector<8x128xf32>
    %764 = arith.addf %760, %763 : vector<8x128xf32>
    %765 = math.tanh %764 : vector<8x128xf32>
    %766 = arith.subf %734, %765 : vector<8x128xf32>
    %767 = arith.mulf %759, %766 : vector<8x128xf32>
    %768 = arith.addf %765, %767 : vector<8x128xf32>
    %769 = arith.index_cast %c4_i32_199 : i32 to index
    %c0_205 = arith.constant 0 : index
    %c0_206 = arith.constant 0 : index
    %770 = vector.load %arg18[%769, %c0_205, %c0_206] : memref<8x8x128xf32, #tpu.memory_space<vmem>>, vector<1x8x128xf32>
    %771 = vector.shape_cast %770 : vector<1x8x128xf32> to vector<8x128xf32>
    %772 = vector.shape_cast %768 : vector<8x128xf32> to vector<1x8x128xf32>
    tpu.vector_store %arg18[%769, %c0_205, %c0_206], %772 {strides = array<i32>} : memref<8x8x128xf32, #tpu.memory_space<vmem>>, vector<1x8x128xf32>,
    %c5_i32_207 = arith.constant 5 : i32
    %773 = arith.truncf %768 : vector<8x128xf32> to vector<8x128xbf16>
    %cst_208 = arith.constant dense<0.000000e+00> : vector<8x384xf32>
    %774 = tpu.matmul %773, %598, %cst_208 {dimension_numbers = #tpu.dot_dimension_numbers<[1], [0], [0], [1], [0, 0, 1, 1], [], []>} : vector<8x128xbf16>, vector<128x384xbf16>, vector<8x384xf32> -> vector<8x384xf32>
    %775 = arith.index_cast %c5_i32_207 : i32 to index
    %c0_209 = arith.constant 0 : index
    %c0_210 = arith.constant 0 : index
    %776 = vector.load %arg15[%775, %c0_209, %c0_210] : memref<8x8x384xf32, #tpu.memory_space<vmem>>, vector<1x8x384xf32>
    %777 = vector.shape_cast %776 : vector<1x8x384xf32> to vector<8x384xf32>
    %778 = vector.extract_strided_slice %777 {offsets = [0, 0], sizes = [8, 128], strides = [1, 1]} : vector<8x384xf32> to vector<8x128xf32>
    %779 = vector.extract_strided_slice %774 {offsets = [0, 0], sizes = [8, 128], strides = [1, 1]} : vector<8x384xf32> to vector<8x128xf32>
    %780 = arith.addf %778, %779 : vector<8x128xf32>
    %781 = arith.negf %780 : vector<8x128xf32>
    %782 = math.exp %781 : vector<8x128xf32>
    %cst_211 = arith.constant 1.000000e+00 : f32
    %783 = vector.broadcast %cst_211 : f32 to vector<8x128xf32>
    %784 = arith.addf %783, %782 : vector<8x128xf32>
    %785 = arith.divf %783, %784 : vector<8x128xf32>
    %786 = vector.extract_strided_slice %777 {offsets = [0, 128], sizes = [8, 128], strides = [1, 1]} : vector<8x384xf32> to vector<8x128xf32>
    %787 = vector.extract_strided_slice %774 {offsets = [0, 128], sizes = [8, 128], strides = [1, 1]} : vector<8x384xf32> to vector<8x128xf32>
    %788 = arith.addf %786, %787 : vector<8x128xf32>
    %789 = arith.negf %788 : vector<8x128xf32>
    %790 = math.exp %789 : vector<8x128xf32>
    %cst_212 = arith.constant 1.000000e+00 : f32
    %791 = vector.broadcast %cst_212 : f32 to vector<8x128xf32>
    %792 = arith.addf %791, %790 : vector<8x128xf32>
    %793 = arith.divf %791, %792 : vector<8x128xf32>
    %794 = vector.extract_strided_slice %777 {offsets = [0, 256], sizes = [8, 128], strides = [1, 1]} : vector<8x384xf32> to vector<8x128xf32>
    %795 = vector.extract_strided_slice %774 {offsets = [0, 256], sizes = [8, 128], strides = [1, 1]} : vector<8x384xf32> to vector<8x128xf32>
    %796 = arith.addf %795, %601 : vector<8x128xf32>
    %797 = arith.mulf %785, %796 : vector<8x128xf32>
    %798 = arith.addf %794, %797 : vector<8x128xf32>
    %799 = math.tanh %798 : vector<8x128xf32>
    %800 = arith.subf %768, %799 : vector<8x128xf32>
    %801 = arith.mulf %793, %800 : vector<8x128xf32>
    %802 = arith.addf %799, %801 : vector<8x128xf32>
    %803 = arith.index_cast %c5_i32_207 : i32 to index
    %c0_213 = arith.constant 0 : index
    %c0_214 = arith.constant 0 : index
    %804 = vector.load %arg18[%803, %c0_213, %c0_214] : memref<8x8x128xf32, #tpu.memory_space<vmem>>, vector<1x8x128xf32>
    %805 = vector.shape_cast %804 : vector<1x8x128xf32> to vector<8x128xf32>
    %806 = vector.shape_cast %802 : vector<8x128xf32> to vector<1x8x128xf32>
    tpu.vector_store %arg18[%803, %c0_213, %c0_214], %806 {strides = array<i32>} : memref<8x8x128xf32, #tpu.memory_space<vmem>>, vector<1x8x128xf32>,
    %c6_i32_215 = arith.constant 6 : i32
    %807 = arith.truncf %802 : vector<8x128xf32> to vector<8x128xbf16>
    %cst_216 = arith.constant dense<0.000000e+00> : vector<8x384xf32>
    %808 = tpu.matmul %807, %598, %cst_216 {dimension_numbers = #tpu.dot_dimension_numbers<[1], [0], [0], [1], [0, 0, 1, 1], [], []>} : vector<8x128xbf16>, vector<128x384xbf16>, vector<8x384xf32> -> vector<8x384xf32>
    %809 = arith.index_cast %c6_i32_215 : i32 to index
    %c0_217 = arith.constant 0 : index
    %c0_218 = arith.constant 0 : index
    %810 = vector.load %arg15[%809, %c0_217, %c0_218] : memref<8x8x384xf32, #tpu.memory_space<vmem>>, vector<1x8x384xf32>
    %811 = vector.shape_cast %810 : vector<1x8x384xf32> to vector<8x384xf32>
    %812 = vector.extract_strided_slice %811 {offsets = [0, 0], sizes = [8, 128], strides = [1, 1]} : vector<8x384xf32> to vector<8x128xf32>
    %813 = vector.extract_strided_slice %808 {offsets = [0, 0], sizes = [8, 128], strides = [1, 1]} : vector<8x384xf32> to vector<8x128xf32>
    %814 = arith.addf %812, %813 : vector<8x128xf32>
    %815 = arith.negf %814 : vector<8x128xf32>
    %816 = math.exp %815 : vector<8x128xf32>
    %cst_219 = arith.constant 1.000000e+00 : f32
    %817 = vector.broadcast %cst_219 : f32 to vector<8x128xf32>
    %818 = arith.addf %817, %816 : vector<8x128xf32>
    %819 = arith.divf %817, %818 : vector<8x128xf32>
    %820 = vector.extract_strided_slice %811 {offsets = [0, 128], sizes = [8, 128], strides = [1, 1]} : vector<8x384xf32> to vector<8x128xf32>
    %821 = vector.extract_strided_slice %808 {offsets = [0, 128], sizes = [8, 128], strides = [1, 1]} : vector<8x384xf32> to vector<8x128xf32>
    %822 = arith.addf %820, %821 : vector<8x128xf32>
    %823 = arith.negf %822 : vector<8x128xf32>
    %824 = math.exp %823 : vector<8x128xf32>
    %cst_220 = arith.constant 1.000000e+00 : f32
    %825 = vector.broadcast %cst_220 : f32 to vector<8x128xf32>
    %826 = arith.addf %825, %824 : vector<8x128xf32>
    %827 = arith.divf %825, %826 : vector<8x128xf32>
    %828 = vector.extract_strided_slice %811 {offsets = [0, 256], sizes = [8, 128], strides = [1, 1]} : vector<8x384xf32> to vector<8x128xf32>
    %829 = vector.extract_strided_slice %808 {offsets = [0, 256], sizes = [8, 128], strides = [1, 1]} : vector<8x384xf32> to vector<8x128xf32>
    %830 = arith.addf %829, %601 : vector<8x128xf32>
    %831 = arith.mulf %819, %830 : vector<8x128xf32>
    %832 = arith.addf %828, %831 : vector<8x128xf32>
    %833 = math.tanh %832 : vector<8x128xf32>
    %834 = arith.subf %802, %833 : vector<8x128xf32>
    %835 = arith.mulf %827, %834 : vector<8x128xf32>
    %836 = arith.addf %833, %835 : vector<8x128xf32>
    %837 = arith.index_cast %c6_i32_215 : i32 to index
    %c0_221 = arith.constant 0 : index
    %c0_222 = arith.constant 0 : index
    %838 = vector.load %arg18[%837, %c0_221, %c0_222] : memref<8x8x128xf32, #tpu.memory_space<vmem>>, vector<1x8x128xf32>
    %839 = vector.shape_cast %838 : vector<1x8x128xf32> to vector<8x128xf32>
    %840 = vector.shape_cast %836 : vector<8x128xf32> to vector<1x8x128xf32>
    tpu.vector_store %arg18[%837, %c0_221, %c0_222], %840 {strides = array<i32>} : memref<8x8x128xf32, #tpu.memory_space<vmem>>, vector<1x8x128xf32>,
    %c7_i32_223 = arith.constant 7 : i32
    %841 = arith.truncf %836 : vector<8x128xf32> to vector<8x128xbf16>
    %cst_224 = arith.constant dense<0.000000e+00> : vector<8x384xf32>
    %842 = tpu.matmul %841, %598, %cst_224 {dimension_numbers = #tpu.dot_dimension_numbers<[1], [0], [0], [1], [0, 0, 1, 1], [], []>} : vector<8x128xbf16>, vector<128x384xbf16>, vector<8x384xf32> -> vector<8x384xf32>
    %843 = arith.index_cast %c7_i32_223 : i32 to index
    %c0_225 = arith.constant 0 : index
    %c0_226 = arith.constant 0 : index
    %844 = vector.load %arg15[%843, %c0_225, %c0_226] : memref<8x8x384xf32, #tpu.memory_space<vmem>>, vector<1x8x384xf32>
    %845 = vector.shape_cast %844 : vector<1x8x384xf32> to vector<8x384xf32>
    %846 = vector.extract_strided_slice %845 {offsets = [0, 0], sizes = [8, 128], strides = [1, 1]} : vector<8x384xf32> to vector<8x128xf32>
    %847 = vector.extract_strided_slice %842 {offsets = [0, 0], sizes = [8, 128], strides = [1, 1]} : vector<8x384xf32> to vector<8x128xf32>
    %848 = arith.addf %846, %847 : vector<8x128xf32>
    %849 = arith.negf %848 : vector<8x128xf32>
    %850 = math.exp %849 : vector<8x128xf32>
    %cst_227 = arith.constant 1.000000e+00 : f32
    %851 = vector.broadcast %cst_227 : f32 to vector<8x128xf32>
    %852 = arith.addf %851, %850 : vector<8x128xf32>
    %853 = arith.divf %851, %852 : vector<8x128xf32>
    %854 = vector.extract_strided_slice %845 {offsets = [0, 128], sizes = [8, 128], strides = [1, 1]} : vector<8x384xf32> to vector<8x128xf32>
    %855 = vector.extract_strided_slice %842 {offsets = [0, 128], sizes = [8, 128], strides = [1, 1]} : vector<8x384xf32> to vector<8x128xf32>
    %856 = arith.addf %854, %855 : vector<8x128xf32>
    %857 = arith.negf %856 : vector<8x128xf32>
    %858 = math.exp %857 : vector<8x128xf32>
    %cst_228 = arith.constant 1.000000e+00 : f32
    %859 = vector.broadcast %cst_228 : f32 to vector<8x128xf32>
    %860 = arith.addf %859, %858 : vector<8x128xf32>
    %861 = arith.divf %859, %860 : vector<8x128xf32>
    %862 = vector.extract_strided_slice %845 {offsets = [0, 256], sizes = [8, 128], strides = [1, 1]} : vector<8x384xf32> to vector<8x128xf32>
    %863 = vector.extract_strided_slice %842 {offsets = [0, 256], sizes = [8, 128], strides = [1, 1]} : vector<8x384xf32> to vector<8x128xf32>
    %864 = arith.addf %863, %601 : vector<8x128xf32>
    %865 = arith.mulf %853, %864 : vector<8x128xf32>
    %866 = arith.addf %862, %865 : vector<8x128xf32>
    %867 = math.tanh %866 : vector<8x128xf32>
    %868 = arith.subf %836, %867 : vector<8x128xf32>
    %869 = arith.mulf %861, %868 : vector<8x128xf32>
    %870 = arith.addf %867, %869 : vector<8x128xf32>
    %871 = arith.index_cast %c7_i32_223 : i32 to index
    %c0_229 = arith.constant 0 : index
    %c0_230 = arith.constant 0 : index
    %872 = vector.load %arg18[%871, %c0_229, %c0_230] : memref<8x8x128xf32, #tpu.memory_space<vmem>>, vector<1x8x128xf32>
    %873 = vector.shape_cast %872 : vector<1x8x128xf32> to vector<8x128xf32>
    %874 = vector.shape_cast %870 : vector<8x128xf32> to vector<1x8x128xf32>
    tpu.vector_store %arg18[%871, %c0_229, %c0_230], %874 {strides = array<i32>} : memref<8x8x128xf32, #tpu.memory_space<vmem>>, vector<1x8x128xf32>,
    %c8_i32_231 = arith.constant 8 : i32
    %c0_232 = arith.constant 0 : index
    %c0_233 = arith.constant 0 : index
    %c0_234 = arith.constant 0 : index
    %875 = vector.load %arg18[%c0_232, %c0_233, %c0_234] : memref<8x8x128xf32, #tpu.memory_space<vmem>>, vector<8x8x128xf32>
    %876 = tpu.transpose %875, [1, 0, 2] : vector<8x8x128xf32> -> vector<8x8x128xf32>
    %877 = vector.extract_strided_slice %876 {offsets = [0, 0, 0], sizes = [2, 8, 32], strides = [1, 1, 1]} : vector<8x8x128xf32> to vector<2x8x32xf32>
    %c0_235 = arith.constant 0 : index
    %c0_236 = arith.constant 0 : index
    %c0_237 = arith.constant 0 : index
    %878 = vector.load %arg13[%c0_235, %c0_236, %c0_237] : memref<2x8x32xf32, #tpu.memory_space<vmem>>, vector<2x8x32xf32>
    tpu.vector_store %arg13[%c0_235, %c0_236, %c0_237], %877 {strides = array<i32>} : memref<2x8x32xf32, #tpu.memory_space<vmem>>, vector<2x8x32xf32>,
    %879 = vector.extract_strided_slice %289 {offsets = [0, 0], sizes = [2, 32], strides = [1, 1]} : vector<8x128xf32> to vector<2x32xf32>
    %c0_238 = arith.constant 0 : index
    %c0_239 = arith.constant 0 : index
    %c0_240 = arith.constant 0 : index
    %880 = vector.load %arg14[%c0_238, %c0_239, %c0_240] : memref<3x2x32xf32, #tpu.memory_space<vmem>>, vector<1x2x32xf32>
    %881 = vector.shape_cast %880 : vector<1x2x32xf32> to vector<2x32xf32>
    %882 = vector.shape_cast %879 : vector<2x32xf32> to vector<1x2x32xf32>
    tpu.vector_store %arg14[%c0_238, %c0_239, %c0_240], %882 {strides = array<i32>} : memref<3x2x32xf32, #tpu.memory_space<vmem>>, vector<1x2x32xf32>,
    %883 = vector.extract_strided_slice %583 {offsets = [0, 0], sizes = [2, 32], strides = [1, 1]} : vector<8x128xf32> to vector<2x32xf32>
    %c1 = arith.constant 1 : index
    %c0_241 = arith.constant 0 : index
    %c0_242 = arith.constant 0 : index
    %884 = vector.load %arg14[%c1, %c0_241, %c0_242] : memref<3x2x32xf32, #tpu.memory_space<vmem>>, vector<1x2x32xf32>
    %885 = vector.shape_cast %884 : vector<1x2x32xf32> to vector<2x32xf32>
    %886 = vector.shape_cast %883 : vector<2x32xf32> to vector<1x2x32xf32>
    tpu.vector_store %arg14[%c1, %c0_241, %c0_242], %886 {strides = array<i32>} : memref<3x2x32xf32, #tpu.memory_space<vmem>>, vector<1x2x32xf32>,
    %887 = vector.extract_strided_slice %870 {offsets = [0, 0], sizes = [2, 32], strides = [1, 1]} : vector<8x128xf32> to vector<2x32xf32>
    %c2 = arith.constant 2 : index
    %c0_243 = arith.constant 0 : index
    %c0_244 = arith.constant 0 : index
    %888 = vector.load %arg14[%c2, %c0_243, %c0_244] : memref<3x2x32xf32, #tpu.memory_space<vmem>>, vector<1x2x32xf32>
    %889 = vector.shape_cast %888 : vector<1x2x32xf32> to vector<2x32xf32>
    %890 = vector.shape_cast %887 : vector<2x32xf32> to vector<1x2x32xf32>
    tpu.vector_store %arg14[%c2, %c0_243, %c0_244], %890 {strides = array<i32>} : memref<3x2x32xf32, #tpu.memory_space<vmem>>, vector<1x2x32xf32>,
    return
  }
}

</mosaic_0001>

<bundles_post_ra>
// kernel: gru_forward.1
= control target key start
LH: loop header
LB: loop body
LE: loop exit
PB: predicated region body
PF: predicated region fallthrough
CT: control target
= control target key end

     0   :  { %20 = vsyncpa [#allocation7], 0  ;;  %vm58_vm0 = vcmask 1047556   ;;  %v4967_v41 = vmov 1983009808   ;;  %s7283_s0 = inlined_call_operand.vmem [shape: bf16[8,8,128], index: 0, kind: input, shape index: {}]   ;;  %s7284_s1 = inlined_call_operand.vmem [shape: bf16[128,384], index: 1, kind: input, shape index: {}]   ;;  %s7285_s2 = inlined_call_operand.vmem [shape: bf16[128,384], index: 2, kind: input, shape index: {}]   ;;  %s7286_s3 = inlined_call_operand.vmem [shape: f32[1,384], index: 3, kind: input, shape index: {}]   ;;  %s7287_s4 = inlined_call_operand.vmem [shape: f32[1,128], index: 4, kind: input, shape index: {}]   ;;  %s7288_s5 = inlined_call_operand.vmem [shape: bf16[128,384], index: 5, kind: input, shape index: {}]   ;;  %s7289_s6 = inlined_call_operand.vmem [shape: bf16[128,384], index: 6, kind: input, shape index: {}]   ;;  %s7290_s7 = inlined_call_operand.vmem [shape: f32[1,384], index: 7, kind: input, shape index: {}]   ;;  %s7291_s8 = inlined_call_operand.vmem [shape: f32[1,128], index: 8, kind: input, shape index: {}]   ;;  %s7292_s9 = inlined_call_operand.vmem [shape: bf16[128,384], index: 9, kind: input, shape index: {}]   ;;  %s7293_s10 = inlined_call_operand.vmem [shape: bf16[128,384], index: 10, kind: input, shape index: {}]   ;;  %s7294_s11 = inlined_call_operand.vmem [shape: f32[1,384], index: 11, kind: input, shape index: {}]   ;;  %s7295_s12 = inlined_call_operand.vmem [shape: f32[1,128], index: 12, kind: input, shape index: {}]   ;;  %s7296_s13 = inlined_call_operand.hbm [shape: f32[2,8,32], index: 13, kind: output, shape index: {0}]   ;;  %s7297_s14 = inlined_call_operand.hbm [shape: f32[3,2,32], index: 14, kind: output, shape index: {1}]  }
   0x1   :  { %v3938_v0 = vld [vmem:[%s7284_s1 + $0xa8] sm:$0xf]  ;;  %v4530_v1 = vld [vmem:[%s7284_s1 + $0xb0] sm:$0xf0]  ;;  %v3926_v5 = vld [vmem:[%s7284_s1 + $0x90] sm:$0xf]  ;;  %v61_v42 = vunpack.c.l.s4 %v4967_v41 }
   0x2   :  { %v4034_v2 = vld [vmem:[%s7285_s2 + $0xa8] sm:$0xf]  ;;  %v3939_v3 = vor.u32 %v4530_v1, %v3938_v0  ;;  %v4554_v4 = vld [vmem:[%s7285_s2 + $0xb0] sm:$0xf0]  ;;  %v4527_v6 = vld [vmem:[%s7284_s1 + $0x98] sm:$0xf0] }
   0x3   :  { %v5069_v7 = vor.u32 %v4554_v4, %v4034_v2  ;;  %v4022_v8 = vld [vmem:[%s7285_s2 + $0x90] sm:$0xf]  ;;  %v4551_v9 = vld [vmem:[%s7285_s2 + $0x98] sm:$0xf0]  ;;  %v3927_v10 = vor.u32 %v4527_v6, %v3926_v5  ;;  %v3914_v12 = vld [vmem:[%s7284_s1 + $0x78] sm:$0xf]  ;;  %v5166_v53 = vunpack.c.0.s8 %v61_v42 }
   0x4   :  { %322 = vmatpush.bf16.msra.mxu0 %v3939_v3  ;;  %v5078_v11 = vor.u32 %v4551_v9, %v4022_v8  ;;  %v4524_v13 = vld [vmem:[%s7284_s1 + $0x80] sm:$0xf0]  ;;  %v4010_v14 = vld [vmem:[%s7285_s2 + $0x78] sm:$0xf]  ;;  %v3902_v18 = vld [vmem:[%s7284_s1 + $0x60] sm:$0xf] }
   0x5   :  { %597 = vmatpush.bf16.msra.mxu3 %v5069_v7  ;;  %v4548_v15 = vld [vmem:[%s7285_s2 + $0x80] sm:$0xf0]  ;;  %v3915_v16 = vor.u32 %v4524_v13, %v3914_v12  ;;  %v4521_v19 = vld [vmem:[%s7284_s1 + $0x68] sm:$0xf0]  ;;  %v3998_v20 = vld [vmem:[%s7285_s2 + $0x60] sm:$0xf] }
   0x6   :  { %v5093_v17 = vor.u32 %v4548_v15, %v4010_v14  ;;  %v4545_v21 = vld [vmem:[%s7285_s2 + $0x68] sm:$0xf0]  ;;  %v3890_v22 = vld [vmem:[%s7284_s1 + $0x48] sm:$0xf]  ;;  %v4518_v23 = vld [vmem:[%s7284_s1 + $0x50] sm:$0xf0]  ;;  %v3903_v24 = vor.u32 %v4521_v19, %v3902_v18 }
   0x7   :  { %v3986_v25 = vld [vmem:[%s7285_s2 + $0x48] sm:$0xf]  ;;  %v4542_v26 = vld [vmem:[%s7285_s2 + $0x50] sm:$0xf0]  ;;  %v49_v27 = vld [vmem:[%s7283_s0] sm:$0xf]  ;;  %v5123_v28 = vor.u32 %v4545_v21, %v3998_v20  ;;  %v3891_v33 = vor.u32 %v4518_v23, %v3890_v22 }
   0x8   :  { %323 = vmatpush.bf16.msra.mxu0 %v3927_v10  ;;  %v50_v29 = vld [vmem:[%s7283_s0 + $0x4] sm:$0xf]  ;;  %v51_v30 = vld [vmem:[%s7283_s0 + $0x8] sm:$0xf]  ;;  %v52_v31 = vld [vmem:[%s7283_s0 + $0xc] sm:$0xf]  ;;  %v5153_v45 = vor.u32 %v4542_v26, %v3986_v25 }
   0x9   :  { %598 = vmatpush.bf16.msra.mxu3 %v5078_v11  ;;  %v53_v32 = vld [vmem:[%s7283_s0 + $0x10] sm:$0xf]  ;;  %v54_v35 = vld [vmem:[%s7283_s0 + $0x14] sm:$0xf]  ;;  %v55_v36 = vld [vmem:[%s7283_s0 + $0x18] sm:$0xf] }
   0xa   :  { %v3878_v34 = vld [vmem:[%s7284_s1 + $0x30] sm:$0xf]  ;;  %v56_v37 = vld [vmem:[%s7283_s0 + $0x1c] sm:$0xf]  ;;  %v57_v38 = vrot.slane %v53_v32, 4  ;;  %v64_v39 = vrot.slane %v55_v36, 4 }
   0xb   :  { %v4515_v40 = vld [vmem:[%s7284_s1 + $0x38] sm:$0xf0]  ;;  %v86_v43 = vrot.slane %v54_v35, 4  ;;  %v92_v44 = vrot.slane %v56_v37, 4  ;;  %v4968_v48 = vmov 1934713408  }
   0xc   :  { %324 = vmatpush.bf16.msra.mxu0 %v3915_v16  ;;  %v59_v46 = vsel %vm58_vm0, %v57_v38, %v49_v27  ;;  %v65_v47 = vsel %vm58_vm0, %v64_v39, %v51_v30  ;;  %v75_v49 = vunpack.c.l.s4 %v4968_v48  ;;  %v4529_v50 = vld [vmem:[%s7284_s1 + $0xac] sm:$0xf]  ;;  %v3974_v51 = vld [vmem:[%s7285_s2 + $0x30] sm:$0xf]  ;;  %v4539_v52 = vld [vmem:[%s7285_s2 + $0x38] sm:$0xf0]  ;;  %v3879_v57 = vor.u32 %v4515_v40, %v3878_v34 }
   0xd   :  { %599 = vmatpush.bf16.msra.mxu3 %v5093_v17  ;;  %7305 = vst [vmem:[#allocation12_spill] sm:$0xff] %v5166_v53  ;;  %v87_v54 = vsel %vm58_vm0, %v86_v43, %v50_v29  ;;  %v93_v55 = vsel %vm58_vm0, %v92_v44, %v52_v31  ;;  %v3940_v56 = vld [vmem:[%s7284_s1 + $0xb4] sm:$0xf0]  ;;  %v4526_v59 = vld [vmem:[%s7284_s1 + $0x94] sm:$0xf]  ;;  %v5183_v62 = vperm.slane %v59_v46, %v5166_v53 }
   0xe   :  { %v3943_v58 = vor.u32 %v4529_v50, %v3940_v56  ;;  %v3928_v60 = vld [vmem:[%s7284_s1 + $0x9c] sm:$0xf0]  ;;  %v3866_v61 = vld [vmem:[%s7284_s1 + $0x18] sm:$0xf]  ;;  %v5186_v63 = vperm.slane %v65_v47, %v5166_v53  ;;  %v5189_v0 = vperm.slane %v87_v54, %v5166_v53  ;;  %v5192_v1 = vperm.slane %v93_v55, %v5166_v53  ;;  %v4512_v3 = vld [vmem:[%s7284_s1 + $0x20] sm:$0xf0] }
   0xf   :  { %v5195_v2 = vor.u32 %v4539_v52, %v3974_v51  ;;  %v3962_v4 = vld [vmem:[%s7285_s2 + $0x18] sm:$0xf]  ;;  %v4536_v5 = vld [vmem:[%s7285_s2 + $0x20] sm:$0xf0]  ;;  %v5206_v6 = vunpack.c.0.s8 %v75_v49  ;;  %v3931_v8 = vor.u32 %v4526_v59, %v3928_v60  ;;  %v4523_v12 = vld [vmem:[%s7284_s1 + $0x7c] sm:$0xf]  ;;  %v3867_v15 = vor.u32 %v4512_v3, %v3866_v61 }
  0x10   :  { %325 = vmatpush.bf16.msra.mxu0 %v3903_v24  ;;  %351 = vmatpush.bf16.msra.mxu1 %v3943_v58  ;;  %v70_v9 = vrot.slane %v5186_v63, 4  ;;  %v98_v10 = vrot.slane %v5192_v1, 4  ;;  %v3916_v13 = vld [vmem:[%s7284_s1 + $0x84] sm:$0xf0]  ;;  %v3854_v14 = vld [vmem:[%s7284_s1] sm:$0xf]  ;;  %v5219_v16 = vor.u32 %v4536_v5, %v3962_v4 }
  0x11   :  { %600 = vmatpush.bf16.msra.mxu3 %v5123_v28  ;;  %7306 = vst [vmem:[#allocation13_spill] sm:$0xff] %v5206_v6  ;;  %v4509_v18 = vld [vmem:[%s7284_s1 + $0x8] sm:$0xf0]  ;;  %v3950_v19 = vld [vmem:[%s7285_s2] sm:$0xf]  ;;  %v3919_v29 = vor.u32 %v4523_v12, %v3916_v13 }
  0x12   :  { %v4533_v20 = vld [vmem:[%s7285_s2 + $0x8] sm:$0xf0]  ;;  %v71_v21 = vsel %vm58_vm0, %v70_v9, %v5183_v62  ;;  %v99_v22 = vsel %vm58_vm0, %v98_v10, %v5189_v0  ;;  %v4036_v24 = vld [vmem:[%s7285_s2 + $0xb4] sm:$0xf0]  ;;  %v4042_v27 = vld [vmem:[%s7285_s2 + $0xb0] sm:$0xf]  ;;  %v3855_v38 = vor.u32 %v4509_v18, %v3854_v14 }
  0x13   :  { %v4553_v23 = vld [vmem:[%s7285_s2 + $0xac] sm:$0xf]  ;;  %v77_v25 = vperm.slane %v71_v21, %v5206_v6  ;;  %v105_v26 = vperm.slane %v99_v22, %v5206_v6  ;;  %v4555_v30 = vld [vmem:[%s7285_s2 + $0xb8] sm:$0xf0]  ;;  %v3946_v31 = vld [vmem:[%s7284_s1 + $0xb0] sm:$0xf]  ;;  %v5262_v42 = vor.u32 %v4533_v20, %v3950_v19 }
  0x14   :  { %326 = vmatpush.bf16.msra.mxu0 %v3891_v33  ;;  %352 = vmatpush.bf16.msra.mxu1 %v3931_v8  ;;  %v4531_v32 = vld [vmem:[%s7284_s1 + $0xb8] sm:$0xf0]  ;;  %v4520_v36 = vld [vmem:[%s7284_s1 + $0x64] sm:$0xf]  ;;  %v3904_v37 = vld [vmem:[%s7284_s1 + $0x6c] sm:$0xf0]  ;;  %v5264_v46 = vor.u32 %v4555_v30, %v4042_v27  ;;  %v5272_v49 = vor.u32 %v4553_v23, %v4036_v24 }
  0x15   :  { %601 = vmatpush.bf16.msra.mxu3 %v5153_v45  ;;  %v116_v33 = vpack.i.b16 %v105_v26, %v77_v25  ;;  %v117_v34 = vshrl.u32 %v77_v25, 16  ;;  %v118_v35 = vshrl.u32 %v105_v26, 16  ;;  %v82_v39 = vrot.slane %v77_v25, 4  ;;  %v4550_v47 = vld [vmem:[%s7285_s2 + $0x94] sm:$0xf] }
  0x16   :  { %v110_v40 = vrot.slane %v105_v26, 4  ;;  %v3947_v41 = vor.u32 %v4531_v32, %v3946_v31  ;;  %v4030_v48 = vld [vmem:[%s7285_s2 + $0x98] sm:$0xf]  ;;  %v4552_v50 = vld [vmem:[%s7285_s2 + $0xa0] sm:$0xf0]  ;;  %v3907_v51 = vor.u32 %v4520_v36, %v3904_v37  ;;  %v7298_v23 = vmov 0  }
  0x17   :  { %v119_v43 = vpack.i.b16 %v118_v35, %v117_v34  ;;  %v178_v44 = vunpack.c.l.b16 %v116_v33  ;;  %v3934_v52 = vld [vmem:[%s7284_s1 + $0x98] sm:$0xf]  ;;  %v4528_v54 = vld [vmem:[%s7284_s1 + $0xa0] sm:$0xf0]  ;;  %v4024_v56 = vld [vmem:[%s7285_s2 + $0x9c] sm:$0xf0]  ;;  %v5304_v8 = vor.u32 %v4552_v50, %v4030_v48 }
  0x18   :  { %327 = vmatpush.bf16.msra.mxu0 %v3879_v57  ;;  %353 = vmatpush.bf16.msra.mxu1 %v3919_v29  ;;  %v4517_v57 = vld [vmem:[%s7284_s1 + $0x4c] sm:$0xf]  ;;  %v3892_v58 = vld [vmem:[%s7284_s1 + $0x54] sm:$0xf0]  ;;  %v3935_v59 = vor.u32 %v4528_v54, %v3934_v52  ;;  %v83_v60 = vsel %vm58_vm0, 0, %v82_v39  ;;  %v111_v61 = vsel %vm58_vm0, 0, %v110_v40  ;;  %v5310_v10 = vor.u32 %v4550_v47, %v4024_v56 }
  0x19   :  { %602 = vmatpush.bf16.msra.mxu3 %v5195_v2  ;;  %380 = vmatpush.bf16.msra.mxu2 %v3947_v41  ;;  %v179_v55 = vunpack.c.l.b16 %v119_v43  ;;  %v3922_v3 = vld [vmem:[%s7284_s1 + $0x80] sm:$0xf]  ;;  %v4547_v5 = vld [vmem:[%s7285_s2 + $0x7c] sm:$0xf]  ;;  %v4525_v9 = vld [vmem:[%s7284_s1 + $0x88] sm:$0xf0]  ;;  %v122_v37 = vpack.i.b16 %v111_v61, %v83_v60 }
  0x1a   :  { %v4012_v12 = vld [vmem:[%s7285_s2 + $0x84] sm:$0xf0]  ;;  %v4018_v13 = vld [vmem:[%s7285_s2 + $0x80] sm:$0xf]  ;;  %v4549_v14 = vld [vmem:[%s7285_s2 + $0x88] sm:$0xf0]  ;;  %v3923_v22 = vor.u32 %v4525_v9, %v3922_v3 }
  0x1b   :  { %v5298_v4 = vpack.c.b16 %v179_v55, %v178_v44  ;;  %v123_v18 = vshrl.u32 %v83_v60, 16  ;;  %v124_v19 = vshrl.u32 %v111_v61, 16  ;;  %v4514_v20 = vld [vmem:[%s7284_s1 + $0x34] sm:$0xf]  ;;  %v3880_v21 = vld [vmem:[%s7284_s1 + $0x3c] sm:$0xf0]  ;;  %v5342_v29 = vor.u32 %v4549_v14, %v4018_v13 }
  0x1c   :  { %328 = vmatpush.bf16.msra.mxu0 %v3867_v15  ;;  %354 = vmatpush.bf16.msra.mxu1 %v3907_v51  ;;  %v3895_v15 = vor.u32 %v4517_v57, %v3892_v58  ;;  %v3910_v24 = vld [vmem:[%s7284_s1 + $0x68] sm:$0xf]  ;;  %v4522_v25 = vld [vmem:[%s7284_s1 + $0x70] sm:$0xf0]  ;;  %v4544_v26 = vld [vmem:[%s7285_s2 + $0x64] sm:$0xf]  ;;  %v5352_v33 = vor.u32 %v4547_v5, %v4012_v12  ;;  %v3883_v34 = vor.u32 %v4514_v20, %v3880_v21 }
  0x1d   :  { %603 = vmatpush.bf16.msra.mxu3 %v5219_v16  ;;  %381 = vmatpush.bf16.msra.mxu2 %v3935_v59  ;;  %v4000_v27 = vld [vmem:[%s7285_s2 + $0x6c] sm:$0xf0]  ;;  %v4006_v30 = vld [vmem:[%s7285_s2 + $0x68] sm:$0xf]  ;;  %v4546_v31 = vld [vmem:[%s7285_s2 + $0x70] sm:$0xf0] }
  0x1e   :  { %v72_v32 = vrot.slane %v5183_v62, 4  ;;  %v4511_v35 = vld [vmem:[%s7284_s1 + $0x1c] sm:$0xf]  ;;  %v3868_v36 = vld [vmem:[%s7284_s1 + $0x24] sm:$0xf0]  ;;  %v100_v39 = vrot.slane %v5189_v0, 4  ;;  %v3911_v62 = vor.u32 %v4522_v25, %v3910_v24 }
  0x1f   :  { %v3898_v40 = vld [vmem:[%s7284_s1 + $0x50] sm:$0xf]  ;;  %v4519_v41 = vld [vmem:[%s7284_s1 + $0x58] sm:$0xf0] }
  0x20   :  { %329 = vmatpush.bf16.msra.mxu0 %v3855_v38  ;;  %355 = vmatpush.bf16.msra.mxu1 %v3895_v15  ;;  %v125_v38 = vpack.i.b16 %v124_v19, %v123_v18 }
  0x21   :  { %604 = vmatpush.bf16.msra.mxu3 %v5262_v42  ;;  %382 = vmatpush.bf16.msra.mxu2 %v3923_v22 }
  0x23   :  { %330 = vmatmul.bf16.vlgmr.msra.gmra.mxu0 %v5298_v4 }
  0x24   :  { %623 = vmatpush.bf16.msrb.mxu0 %v5264_v46  ;;  %605 = vmatmul.bf16.vlgmr.msra.gmra.mxu3 %v7298_v23 }
  0x25   :  { %610 = vmatpush.bf16.msrb.mxu3 %v5272_v49 }
  0x28   :  { %624 = vmatpush.bf16.msrb.mxu0 %v5304_v8 }
  0x29   :  { %611 = vmatpush.bf16.msrb.mxu3 %v5310_v10 }
  0x2a   :  { %21 = vsyncpa [#allocation9], 0  ;;  %v5368_v43 = vor.u32 %v4546_v31, %v4006_v30  ;;  %v5371_v44 = vor.u32 %v4544_v26, %v4000_v27  ;;  %v4541_v0 = vld [vmem:[%s7285_s2 + $0x4c] sm:$0xf]  ;;  %356 = vmatpush.bf16.msra.mxu1 %v3883_v34  ;;  %v3871_v47 = vor.u32 %v4511_v35, %v3868_v36  ;;  %v3994_v48 = vld [vmem:[%s7285_s2 + $0x50] sm:$0xf]  ;;  %v180_v52 = vunpack.c.l.b16 %v122_v37  ;;  %383 = vmatpush.bf16.msra.mxu2 %v3911_v62 }
  0x2b   :  { %v4543_v50 = vld [vmem:[%s7285_s2 + $0x58] sm:$0xf0]  ;;  %v3988_v51 = vld [vmem:[%s7285_s2 + $0x54] sm:$0xf0]  ;;  %v181_v54 = vunpack.c.l.b16 %v125_v38  ;;  %v4508_v55 = vld [vmem:[%s7284_s1 + $0x4] sm:$0xf]  ;;  %v3899_v57 = vor.u32 %v4519_v41, %v3898_v40  ;;  %v73_v58 = vsel %vm58_vm0, %v5186_v63, %v72_v32  ;;  %v101_v59 = vsel %vm58_vm0, %v5192_v1, %v100_v39 }
  0x2c   :  { %625 = vmatpush.bf16.msrb.mxu0 %v5342_v29  ;;  %v3856_v56 = vld [vmem:[%s7284_s1 + $0xc] sm:$0xf0]  ;;  %v3886_v60 = vld [vmem:[%s7284_s1 + $0x38] sm:$0xf]  ;;  %v4516_v61 = vld [vmem:[%s7284_s1 + $0x40] sm:$0xf0]  ;;  %v5402_v3 = vor.u32 %v4543_v50, %v3994_v48  ;;  %v5405_v5 = vor.u32 %v4541_v0, %v3988_v51  ;;  %v81_v15 = vperm.slane %v73_v58, %v5206_v6  ;;  %v109_v18 = vperm.slane %v101_v59, %v5206_v6 }
  0x2d   :  { %612 = vmatpush.bf16.msrb.mxu3 %v5352_v33  ;;  %v3859_v63 = vor.u32 %v4508_v55, %v3856_v56  ;;  %v3982_v1 = vld [vmem:[%s7285_s2 + $0x38] sm:$0xf]  ;;  %v4540_v9 = vld [vmem:[%s7285_s2 + $0x40] sm:$0xf0]  ;;  %v5413_v12 = vpack.c.b16 %v181_v54, %v180_v52  ;;  %v4538_v13 = vld [vmem:[%s7285_s2 + $0x34] sm:$0xf]  ;;  %v3887_v19 = vor.u32 %v4516_v61, %v3886_v60 }
  0x2e   :  { %357 = vmatpush.bf16.msra.mxu1 %v3871_v47  ;;  %v3976_v14 = vld [vmem:[%s7285_s2 + $0x3c] sm:$0xf0]  ;;  %384 = vmatpush.bf16.msra.mxu2 %v3899_v57  ;;  %v4513_v21 = vld [vmem:[%s7284_s1 + $0x28] sm:$0xf0]  ;;  %v5430_v22 = vor.u32 %v4540_v9, %v3982_v1  ;;  %v4535_v25 = vld [vmem:[%s7285_s2 + $0x1c] sm:$0xf]  ;;  %v128_v0 = vpack.i.b16 %v109_v18, %v81_v15 }
  0x2f   :  { %v3874_v20 = vld [vmem:[%s7284_s1 + $0x20] sm:$0xf]  ;;  %v5433_v24 = vor.u32 %v4538_v13, %v3976_v14  ;;  %v3964_v26 = vld [vmem:[%s7285_s2 + $0x24] sm:$0xf0]  ;;  %v129_v27 = vshrl.u32 %v81_v15, 16  ;;  %v130_v30 = vshrl.u32 %v109_v18, 16 }
  0x30   :  { %626 = vmatpush.bf16.msrb.mxu0 %v5368_v43  ;;  %v3875_v31 = vor.u32 %v4513_v21, %v3874_v20  ;;  %v3970_v32 = vld [vmem:[%s7285_s2 + $0x20] sm:$0xf]  ;;  %v4537_v34 = vld [vmem:[%s7285_s2 + $0x28] sm:$0xf0]  ;;  %v3862_v35 = vld [vmem:[%s7284_s1 + $0x8] sm:$0xf]  ;;  %v5460_v38 = vor.u32 %v4535_v25, %v3964_v26  ;;  %v182_v52 = vunpack.c.l.b16 %v128_v0 }
  0x31   :  { %613 = vmatpush.bf16.msrb.mxu3 %v5371_v44  ;;  %v4510_v36 = vld [vmem:[%s7284_s1 + $0x10] sm:$0xf0]  ;;  %v5457_v37 = vor.u32 %v4537_v34, %v3970_v32  ;;  %v3958_v39 = vld [vmem:[%s7285_s2 + $0x8] sm:$0xf]  ;;  %v4532_v40 = vld [vmem:[%s7285_s2 + $0x4] sm:$0xf]  ;;  %v131_v47 = vpack.i.b16 %v130_v30, %v129_v27 }
  0x32   :  { %358 = vmatpush.bf16.msra.mxu1 %v3859_v63  ;;  %385 = vmatpush.bf16.msra.mxu2 %v3887_v19  ;;  %v4534_v62 = vld [vmem:[%s7285_s2 + $0x10] sm:$0xf0]  ;;  %v3952_v41 = vld [vmem:[%s7285_s2 + $0xc] sm:$0xf0]  ;;  %v3863_v48 = vor.u32 %v4510_v36, %v3862_v35  ;;  %v84_v55 = vrot.slane %v81_v15, 4  ;;  %v112_v56 = vrot.slane %v109_v18, 4 }
  0x33   :  { %335 = vmatmul.bf16.gmra.mxu0 %v5413_v12  ;;  %v5476_v50 = vor.u32 %v4534_v62, %v3958_v39  ;;  %v5479_v51 = vor.u32 %v4532_v40, %v3952_v41  ;;  %v183_v54 = vunpack.c.l.b16 %v131_v47  ;;  %v170_v15 = vld [vmem:[%s7286_s3] sm:$0x7]  ;;  %s3835_s15 = sshll.u32 %s7297_s14, 4  ;;  %s4971_s1 = smov 32   ;;  %s3836_s15 = int_to_ptr.hbm [resolvable:$true] %s3835_s15 }
  0x34   :  { %627 = vmatpush.bf16.msrb.mxu0 %v5402_v3  ;;  %v85_v58 = vsel %vm58_vm0, 0, %v84_v55  ;;  %v113_v59 = vsel %vm58_vm0, 0, %v112_v56  ;;  %v5557_v19 = vperm.slane %v170_v15, 0  ;;  %v5565_v32 = vperm.slane %v170_v15, 1  ;;  %s4972_s14 = smov 2   ;;  %s4973_s16 = smov [#allocation6]  }
  0x35   :  { %614 = vmatpush.bf16.msrb.mxu3 %v5405_v5  ;;  %359 = vmatmul.bf16.vlgmr.msra.gmra.mxu1 %v5298_v4  ;;  %v188_v57 = vpack.c.b16 %v183_v54, %v182_v52  ;;  %v135_v60 = vshrl.u32 %v85_v58, 16  ;;  %v136_v61 = vshrl.u32 %v113_v59, 16  ;;  %s3820_s17 = sshll.u32 %s4973_s16, 4  ;;  %s3822_s19 = sshll.u32 %s7296_s13, 4  ;;  %s3821_s17 = int_to_ptr.vmem [resolvable:$true] %s3820_s17  ;;  %s3823_s19 = int_to_ptr.hbm [resolvable:$true] %s3822_s19 }
  0x36   :  { %688 = vmatpush.bf16.msrb.mxu1 %v5069_v7  ;;  %386 = vmatpush.bf16.msra.mxu2 %v3875_v31 }
  0x37   :  { %v137_v63 = vpack.i.b16 %v136_v61, %v135_v60 }
  0x38   :  { %628 = vmatpush.bf16.msrb.mxu0 %v5430_v22 }
  0x39   :  { %615 = vmatpush.bf16.msrb.mxu3 %v5433_v24  ;;  %v185_v9 = vunpack.c.l.b16 %v137_v63  ;;  %v5578_v63 = vperm.slane %v170_v15, 2 }
  0x3a   :  { %689 = vmatpush.bf16.msrb.mxu1 %v5078_v11  ;;  %387 = vmatpush.bf16.msra.mxu2 %v3863_v48 }
  0x3c   :  { %629 = vmatpush.bf16.msrb.mxu0 %v5457_v37 }
  0x3d   :  { %616 = vmatpush.bf16.msrb.mxu3 %v5460_v38  ;;  %388 = vmatmul.bf16.vlgmr.msra.gmra.mxu2 %v5298_v4  ;;  %v134_v4 = vpack.i.b16 %v113_v59, %v85_v58 }
  0x3e   :  { %701 = vmatpush.bf16.msrb.mxu2 %v5272_v49  ;;  %690 = vmatpush.bf16.msrb.mxu1 %v5093_v17 }
  0x3f   :  { %v184_v1 = vunpack.c.l.b16 %v134_v4 }
  0x40   :  { %630 = vmatpush.bf16.msrb.mxu0 %v5476_v50 }
  0x41   :  { %617 = vmatpush.bf16.msrb.mxu3 %v5479_v51  ;;  %v189_v13 = vpack.c.b16 %v185_v9, %v184_v1 }
  0x42   :  { %702 = vmatpush.bf16.msrb.mxu2 %v5310_v10  ;;  %691 = vmatpush.bf16.msrb.mxu1 %v5123_v28 }
  0x43   :  { %340 = vmatmul.bf16.gmra.mxu0 %v188_v57 }
  0x44   :  { %781 = vmatpush.bf16.msra.mxu0 %v5069_v7  ;;  %618 = vmatmul.bf16.vlgmr.msrb.gmra.mxu3 %v7298_v23 }
  0x45   :  { %714 = vmatpush.bf16.msra.mxu3 %v5264_v46  ;;  %364 = vmatmul.bf16.gmra.mxu1 %v5413_v12 }
  0x46   :  { %703 = vmatpush.bf16.msrb.mxu2 %v5352_v33  ;;  %692 = vmatpush.bf16.msrb.mxu1 %v5153_v45 }
  0x48   :  { %782 = vmatpush.bf16.msra.mxu0 %v5078_v11 }
  0x49   :  { %715 = vmatpush.bf16.msra.mxu3 %v5304_v8 }
  0x4a   :  { %704 = vmatpush.bf16.msrb.mxu2 %v5371_v44  ;;  %693 = vmatpush.bf16.msrb.mxu1 %v5195_v2 }
  0x4c   :  { %783 = vmatpush.bf16.msra.mxu0 %v5093_v17 }
  0x4d   :  { %716 = vmatpush.bf16.msra.mxu3 %v5342_v29  ;;  %393 = vmatmul.bf16.gmra.mxu2 %v5413_v12 }
  0x4e   :  { %705 = vmatpush.bf16.msrb.mxu2 %v5405_v5  ;;  %694 = vmatpush.bf16.msrb.mxu1 %v5219_v16 }
  0x50   :  { %784 = vmatpush.bf16.msra.mxu0 %v5123_v28 }
  0x51   :  { %717 = vmatpush.bf16.msra.mxu3 %v5368_v43 }
  0x52   :  { %706 = vmatpush.bf16.msrb.mxu2 %v5433_v24  ;;  %695 = vmatpush.bf16.msrb.mxu1 %v5262_v42 }
  0x53   :  { %345 = vmatmul.bf16.gmra.mxu0 %v189_v13 }
  0x54   :  { %785 = vmatpush.bf16.msra.mxu0 %v5153_v45 }
  0x55   :  { %718 = vmatpush.bf16.msra.mxu3 %v5402_v3  ;;  %369 = vmatmul.bf16.gmra.mxu1 %v188_v57 }
  0x56   :  { %794 = vmatpush.bf16.msra.mxu1 %v5272_v49  ;;  %707 = vmatpush.bf16.msrb.mxu2 %v5460_v38 }
  0x58   :  { %786 = vmatpush.bf16.msra.mxu0 %v5195_v2 }
  0x59   :  { %719 = vmatpush.bf16.msra.mxu3 %v5430_v22 }
  0x5a   :  { %795 = vmatpush.bf16.msra.mxu1 %v5310_v10  ;;  %708 = vmatpush.bf16.msrb.mxu2 %v5479_v51 }
  0x5c   :  { %787 = vmatpush.bf16.msra.mxu0 %v5219_v16 }
  0x5d   :  { %720 = vmatpush.bf16.msra.mxu3 %v5457_v37  ;;  %398 = vmatmul.bf16.gmra.mxu2 %v188_v57 }
  0x5e   :  { %807 = vmatpush.bf16.msra.mxu2 %v5264_v46  ;;  %796 = vmatpush.bf16.msra.mxu1 %v5352_v33 }
  0x60   :  { %788 = vmatpush.bf16.msra.mxu0 %v5262_v42 }
  0x61   :  { %721 = vmatpush.bf16.msra.mxu3 %v5476_v50 }
  0x62   :  { %808 = vmatpush.bf16.msra.mxu2 %v5304_v8  ;;  %797 = vmatpush.bf16.msra.mxu1 %v5371_v44 }
  0x63   :  { %631 = vmatmul.bf16.vlgmr.msrb.gmra.mxu0 %v7298_v23 }
  0x64   :  { %887 = vmatpush.bf16.msrb.mxu0 %v5272_v49 }
  0x65   :  { %874 = vmatpush.bf16.msrb.mxu3 %v5069_v7  ;;  %374 = vmatmul.bf16.gmra.mxu1 %v189_v13 }
  0x66   :  { %809 = vmatpush.bf16.msra.mxu2 %v5342_v29  ;;  %798 = vmatpush.bf16.msra.mxu1 %v5405_v5 }
  0x68   :  { %888 = vmatpush.bf16.msrb.mxu0 %v5310_v10 }
  0x69   :  { %875 = vmatpush.bf16.msrb.mxu3 %v5078_v11 }
  0x6a   :  { %810 = vmatpush.bf16.msra.mxu2 %v5368_v43  ;;  %799 = vmatpush.bf16.msra.mxu1 %v5433_v24 }
  0x6c   :  { %889 = vmatpush.bf16.msrb.mxu0 %v5352_v33 }
  0x6d   :  { %876 = vmatpush.bf16.msrb.mxu3 %v5093_v17  ;;  %403 = vmatmul.bf16.gmra.mxu2 %v189_v13 }
  0x6e   :  { %811 = vmatpush.bf16.msra.mxu2 %v5402_v3  ;;  %800 = vmatpush.bf16.msra.mxu1 %v5460_v38 }
  0x70   :  { %890 = vmatpush.bf16.msrb.mxu0 %v5371_v44 }
  0x71   :  { %877 = vmatpush.bf16.msrb.mxu3 %v5123_v28 }
  0x72   :  { %812 = vmatpush.bf16.msra.mxu2 %v5430_v22  ;;  %801 = vmatpush.bf16.msra.mxu1 %v5479_v51 }
  0x74   :  { %891 = vmatpush.bf16.msrb.mxu0 %v5405_v5 }
  0x75   :  { %878 = vmatpush.bf16.msrb.mxu3 %v5153_v45 }
  0x76   :  { %813 = vmatpush.bf16.msra.mxu2 %v5457_v37 }
  0x78   :  { %892 = vmatpush.bf16.msrb.mxu0 %v5433_v24 }
  0x79   :  { %879 = vmatpush.bf16.msrb.mxu3 %v5195_v2 }
  0x7a   :  { %814 = vmatpush.bf16.msra.mxu2 %v5476_v50 }
  0x7c   :  { %893 = vmatpush.bf16.msrb.mxu0 %v5460_v38 }
  0x7d   :  { %880 = vmatpush.bf16.msrb.mxu3 %v5219_v16 }
  0x80   :  { %894 = vmatpush.bf16.msrb.mxu0 %v5479_v51 }
  0x81   :  { %881 = vmatpush.bf16.msrb.mxu3 %v5262_v42 }
  0xa0   :  { %v331_v12 = vpop.f32.mrf.mxu0 }
  0xa1   :  { %v332_v20 = vadd.f32 %v331_v12, %v5557_v19 }
  0xa7   :  { %v606_v14 = vpop.f32.mrf.mxu3 }
  0xa8   :  { %v5555_v18 = vpop.f32.mrf.mxu0  ;;  %v639_v26 = vadd.f32 %v606_v14, %v332_v20 }
  0xaa   :  { %v4044_v30 = vmul.f32 -1.442695, %v639_v26  ;;  %v5588_v26 = vld [vmem:[%s7287_s4] ss:$0 sm:$0xff] }
  0xac   :  { %4672 = vpow2.f32 %v4044_v30 }
  0xaf   :  { %v608_v21 = vpop.f32.mrf.mxu3 }
  0xb0   :  { %v336_v25 = vpop.f32.mrf.mxu0 }
  0xb1   :  { %v5561_v27 = vadd.f32 %v336_v25, %v5557_v19 }
  0xb2   :  { %v360_v34 = vpop.f32.mrf.mxu1  ;;  %v4673_v35 = vpop.eup %4672 }
  0xb3   :  { %v361_v62 = vadd.f32 %v360_v34, %v5565_v32  ;;  %v643_v40 = vadd.f32 1.0, %v4673_v35 }
  0xb5   :  { %4674 = vrcp.f32 %v643_v40  ;;  %v655_v25 = vand.u32 2147483648, %v643_v40  ;;  %vm649_vm2 = vweird.f32 %v643_v40  ;;  %v653_v15 = vand.u32 2147483647, %v643_v40 }
  0xb7   :  { %vm654_vm4 = vcmp.eq.f32.partialorder %v653_v15, 8.507059e+37 }
  0xb8   :  { %v5563_v31 = vpop.f32.mrf.mxu0 }
  0xbb   :  { %v4675_v54 = vpop.eup %4674 }
  0xbc   :  { %v645_v57 = vmul.f32 %v4675_v54, %v643_v40  ;;  %vm650_vm1 = vweird.f32 %v4675_v54 }
  0xbd   :  { %vm651_vm3 = vmor %vm649_vm2, %vm650_vm1 }
  0xbe   :  { %v646_v4 = vsub.f32 1.0, %v645_v57 }
  0xc0   :  { %v341_v36 = vpop.f32.mrf.mxu0  ;;  %v389_v47 = vpop.f32.mrf.mxu2  ;;  %v647_v1 = vmul.f32 %v4675_v54, %v646_v4 }
  0xc1   :  { %v5568_v39 = vadd.f32 %v341_v36, %v5557_v19 }
  0xc2   :  { %v648_v20 = vadd.f32 %v4675_v54, %v647_v1 }
  0xc4   :  { %v652_v30 = vsel %vm651_vm3, %v4675_v54, %v648_v20 }
  0xc7   :  { %v619_v41 = vpop.f32.mrf.mxu3 }
  0xc8   :  { %v659_v0 = vadd.f32 %v619_v41, %v361_v62  ;;  %v5571_v52 = vpop.f32.mrf.mxu0  ;;  %v5573_v58 = vpop.f32.mrf.mxu2  ;;  %v656_v62 = vor.u32 1.1754944e-38, %v655_v25  ;;  %v390_v41 = vadd.f32 %v389_v47, %v5578_v63 }
  0xca   :  { %v4045_v48 = vmul.f32 -1.442695, %v659_v0 }
  0xcc   :  { %4676 = vpow2.f32 %v4045_v48  ;;  %v657_v48 = vsel %vm654_vm4, %v656_v62, %v652_v30 }
  0xcf   :  { %v621_v55 = vpop.f32.mrf.mxu3 }
  0xd0   :  { %v346_v60 = vpop.f32.mrf.mxu0  ;;  %v394_v9 = vpop.f32.mrf.mxu2 }
  0xd1   :  { %v5576_v61 = vadd.f32 %v346_v60, %v5557_v19  ;;  %v5583_v12 = vadd.f32 %v394_v9, %v5578_v63 }
  0xd2   :  { %v4677_v56 = vpop.eup %4676 }
  0xd3   :  { %v663_v59 = vadd.f32 1.0, %v4677_v56  ;;  %7307 = vst [vmem:[#allocation14_spill] sm:$0xff] %v5576_v61 }
  0xd5   :  { %4678 = vrcp.f32 %v663_v59  ;;  %vm669_vm5 = vweird.f32 %v663_v59  ;;  %v675_v60 = vand.u32 2147483648, %v663_v59  ;;  %v673_v1 = vand.u32 2147483647, %v663_v59 }
  0xd7   :  { %v676_v47 = vor.u32 1.1754944e-38, %v675_v60  ;;  %vm674_vm8 = vcmp.eq.f32.partialorder %v673_v1, 8.507059e+37 }
  0xd8   :  { %v5580_v13 = vpop.f32.mrf.mxu0  ;;  %v5590_v34 = vpop.f32.mrf.mxu2 }
  0xd9   :  { %7308 = vst [vmem:[#allocation15_spill] sm:$0xff] %v5580_v13 }
  0xdb   :  { %v4679_v14 = vpop.eup %4678 }
  0xdc   :  { %v665_v21 = vmul.f32 %v4679_v14, %v663_v59  ;;  %vm670_vm6 = vweird.f32 %v4679_v14 }
  0xdd   :  { %vm671_vm7 = vmor %vm669_vm5, %vm670_vm6 }
  0xde   :  { %v666_v35 = vsub.f32 1.0, %v665_v21 }
  0xe0   :  { %v632_v36 = vpop.f32.mrf.mxu0  ;;  %v667_v56 = vmul.f32 %v4679_v14, %v666_v35  ;;  %v399_v40 = vpop.f32.mrf.mxu2 }
  0xe1   :  { %v679_v0 = vadd.f32 %v5588_v26, %v632_v36  ;;  %v5595_v9 = vadd.f32 %v399_v40, %v5578_v63 }
  0xe2   :  { %v668_v4 = vadd.f32 %v4679_v14, %v667_v56 }
  0xe3   :  { %v680_v55 = vmul.f32 %v679_v0, %v657_v48 }
  0xe4   :  { %v672_v20 = vsel %vm671_vm7, %v4679_v14, %v668_v4 }
  0xe5   :  { %v681_v57 = vadd.f32 %v680_v55, %v390_v41  ;;  %v677_v15 = vsel %vm674_vm8, %v676_v47, %v672_v20  ;;  %v362_v41 = vpop.f32.mrf.mxu1 }
  0xe6   :  { %v363_v20 = vadd.f32 %v362_v41, %v5565_v32 }
  0xe7   :  { %4680 = vtanh.f32 %v681_v57 }
  0xe8   :  { %v634_v54 = vpop.f32.mrf.mxu0  ;;  %v5597_v30 = vpop.f32.mrf.mxu2 }
  0xe9   :  { %v334_v54 = vadd.f32 %v5555_v18, %v5557_v19 }
  0xed   :  { %v4681_v21 = vpop.eup %4680  ;;  %v5630_v0 = vpop.f32.mrf.mxu1 }
  0xee   :  { %v683_v25 = vsub.f32 0.0, %v4681_v21 }
  0xf0   :  { %v684_v35 = vmul.f32 %v683_v25, %v677_v15  ;;  %v404_v59 = vpop.f32.mrf.mxu2 }
  0xf1   :  { %v5605_v14 = vadd.f32 %v404_v59, %v5578_v63 }
  0xf2   :  { %v5599_v36 = vadd.f32 %v4681_v21, %v684_v35 }
  0xf3   :  { %7309 = vst [vmem:[#allocation16_spill] sm:$0xff] %v5605_v14 }
  0xf4   :  { %v686_v62 = vpack.c.bf16 %v5599_v36, %v5599_v36 }
  0xf5   :  { %v5632_v48 = vpop.f32.mrf.mxu1 }
  0xf6   :  { %687 = vst [vmem:[#allocation3] sm:$0xf] %v686_v62  ;;  %696 = vmatmul.bf16.vlgmr.msrb.gmra.mxu1 %v686_v62  ;;  %709 = vmatmul.bf16.vlgmr.msrb.gmra.mxu2 %v686_v62 }
  0xf7   :  { %722 = vmatmul.bf16.vlgmr.msra.gmra.mxu3 %v686_v62  ;;  %900 = vmatpush.bf16.msrb.mxu1 %v5264_v46 }
  0xf8   :  { %967 = vmatpush.bf16.msrb.mxu2 %v5069_v7  ;;  %980 = vmatpush.bf16.msra.mxu3 %v5272_v49  ;;  %v5642_v40 = vpop.f32.mrf.mxu2 }
  0xf9   :  { %7311 = vst [vmem:[#allocation18_spill] sm:$0xff] %v5642_v40 }
  0xfb   :  { %901 = vmatpush.bf16.msrb.mxu1 %v5304_v8 }
  0xfc   :  { %968 = vmatpush.bf16.msrb.mxu2 %v5078_v11  ;;  %981 = vmatpush.bf16.msra.mxu3 %v5310_v10 }
  0xfd   :  { %v5634_v55 = vpop.f32.mrf.mxu1 }
  0xff   :  { %902 = vmatpush.bf16.msrb.mxu1 %v5342_v29 }
 0x100   :  { %969 = vmatpush.bf16.msrb.mxu2 %v5093_v17  ;;  %982 = vmatpush.bf16.msra.mxu3 %v5352_v33 }
 0x103   :  { %903 = vmatpush.bf16.msrb.mxu1 %v5368_v43 }
 0x104   :  { %970 = vmatpush.bf16.msrb.mxu2 %v5123_v28  ;;  %983 = vmatpush.bf16.msra.mxu3 %v5371_v44 }
 0x105   :  { %v5636_v56 = vpop.f32.mrf.mxu1 }
 0x107   :  { %904 = vmatpush.bf16.msrb.mxu1 %v5402_v3 }
 0x108   :  { %971 = vmatpush.bf16.msrb.mxu2 %v5153_v45  ;;  %984 = vmatpush.bf16.msra.mxu3 %v5405_v5 }
 0x10b   :  { %905 = vmatpush.bf16.msrb.mxu1 %v5430_v22 }
 0x10c   :  { %972 = vmatpush.bf16.msrb.mxu2 %v5195_v2  ;;  %985 = vmatpush.bf16.msra.mxu3 %v5433_v24 }
 0x10d   :  { %v5638_v57 = vpop.f32.mrf.mxu1 }
 0x10f   :  { %906 = vmatpush.bf16.msrb.mxu1 %v5457_v37 }
 0x110   :  { %973 = vmatpush.bf16.msrb.mxu2 %v5219_v16  ;;  %986 = vmatpush.bf16.msra.mxu3 %v5460_v38 }
 0x113   :  { %907 = vmatpush.bf16.msrb.mxu1 %v5476_v50 }
 0x114   :  { %974 = vmatpush.bf16.msrb.mxu2 %v5262_v42  ;;  %987 = vmatpush.bf16.msra.mxu3 %v5479_v51 }
 0x115   :  { %v5640_v60 = vpop.f32.mrf.mxu1 }
 0x116   :  { %7310 = vst [vmem:[#allocation17_spill] sm:$0xff] %v5640_v60 }
 0x173   :  { %v697_v4 = vpop.f32.mrf.mxu1 }
 0x174   :  { %v731_v1 = vadd.f32 %v697_v4, %v334_v54 }
 0x176   :  { %v4046_v47 = vmul.f32 -1.442695, %v731_v1 }
 0x178   :  { %4682 = vpow2.f32 %v4046_v47 }
 0x179   :  { %v710_v21 = vpop.f32.mrf.mxu2 }
 0x17a   :  { %v751_v25 = vadd.f32 %v710_v21, %v363_v20  ;;  %v723_v15 = vpop.f32.mrf.mxu3 }
 0x17b   :  { %v699_v35 = vpop.f32.mrf.mxu1 }
 0x17c   :  { %v4047_v62 = vmul.f32 -1.442695, %v751_v25 }
 0x17e   :  { %v4683_v59 = vpop.eup %4682  ;;  %4684 = vpow2.f32 %v4047_v62 }
 0x17f   :  { %v735_v23 = vadd.f32 1.0, %v4683_v59 }
 0x181   :  { %4686 = vrcp.f32 %v735_v23  ;;  %v712_v6 = vpop.f32.mrf.mxu2  ;;  %v747_v1 = vand.u32 2147483648, %v735_v23  ;;  %v745_v47 = vand.u32 2147483647, %v735_v23  ;;  %vm741_vm10 = vweird.f32 %v735_v23 }
 0x182   :  { %v725_v53 = vpop.f32.mrf.mxu3 }
 0x183   :  { %v748_v25 = vor.u32 1.1754944e-38, %v747_v1  ;;  %vm746_vm12 = vcmp.eq.f32.partialorder %v745_v47, 8.507059e+37  ;;  %v771_v53 = vadd.f32 %v5588_v26, %v723_v15 }
 0x184   :  { %v4685_v40 = vpop.eup %4684 }
 0x185   :  { %v755_v13 = vadd.f32 1.0, %v4685_v40  ;;  %v392_v40 = vadd.f32 %v5573_v58, %v5578_v63 }
 0x187   :  { %v4687_v18 = vpop.eup %4686  ;;  %4688 = vrcp.f32 %v755_v13  ;;  %v767_v61 = vand.u32 2147483648, %v755_v13  ;;  %vm761_vm14 = vweird.f32 %v755_v13 }
 0x188   :  { %v737_v54 = vmul.f32 %v4687_v18, %v735_v23  ;;  %vm742_vm9 = vweird.f32 %v4687_v18  ;;  %v765_v23 = vand.u32 2147483647, %v755_v13 }
 0x189   :  { %vm743_vm11 = vmor %vm741_vm10, %vm742_vm9 }
 0x18a   :  { %v738_v4 = vsub.f32 1.0, %v737_v54  ;;  %vm766_vm1 = vcmp.eq.f32.partialorder %v765_v23, 8.507059e+37 }
 0x18c   :  { %v739_v41 = vmul.f32 %v4687_v18, %v738_v4 }
 0x18d   :  { %v4689_v20 = vpop.eup %4688 }
 0x18e   :  { %v757_v21 = vmul.f32 %v4689_v20, %v755_v13  ;;  %v740_v35 = vadd.f32 %v4687_v18, %v739_v41  ;;  %vm762_vm13 = vweird.f32 %v4689_v20 }
 0x18f   :  { %vm763_vm15 = vmor %vm761_vm14, %vm762_vm13 }
 0x190   :  { %v758_v62 = vsub.f32 1.0, %v757_v21  ;;  %v744_v59 = vsel %vm743_vm11, %v4687_v18, %v740_v35  ;;  %v768_v18 = vor.u32 1.1754944e-38, %v767_v61  ;;  %v366_v61 = vadd.f32 %v5630_v0, %v5565_v32 }
 0x191   :  { %v749_v6 = vsel %vm746_vm12, %v748_v25, %v744_v59 }
 0x192   :  { %v772_v54 = vmul.f32 %v771_v53, %v749_v6  ;;  %v759_v60 = vmul.f32 %v4689_v20, %v758_v62 }
 0x194   :  { %v773_v4 = vadd.f32 %v772_v54, %v392_v40  ;;  %v760_v14 = vadd.f32 %v4689_v20, %v759_v60 }
 0x196   :  { %4690 = vtanh.f32 %v773_v4  ;;  %v764_v1 = vsel %vm763_vm15, %v4689_v20, %v760_v14 }
 0x197   :  { %v769_v15 = vsel %vm766_vm1, %v768_v18, %v764_v1 }
 0x19c   :  { %v4691_v41 = vpop.eup %4690 }
 0x19d   :  { %v775_v47 = vsub.f32 %v5599_v36, %v4691_v41 }
 0x19f   :  { %v776_v21 = vmul.f32 %v775_v47, %v769_v15 }
 0x1a1   :  { %v5651_v35 = vadd.f32 %v4691_v41, %v776_v21 }
 0x1a3   :  { %v778_v58 = vpack.c.bf16 %v5651_v35, %v5651_v35 }
 0x1a5   :  { %780 = vst [vmem:[#allocation3 + $0x4] sm:$0xf] %v778_v58  ;;  %789 = vmatmul.bf16.vlgmr.msra.gmra.mxu0 %v778_v58  ;;  %802 = vmatmul.bf16.vlgmr.msra.gmra.mxu1 %v778_v58 }
 0x1a6   :  { %815 = vmatmul.bf16.vlgmr.msra.gmra.mxu2 %v778_v58  ;;  %993 = vmatpush.bf16.msra.mxu0 %v5264_v46 }
 0x1a7   :  { %1060 = vmatpush.bf16.msra.mxu1 %v5069_v7  ;;  %1073 = vmatpush.bf16.msra.mxu2 %v5272_v49 }
 0x1aa   :  { %994 = vmatpush.bf16.msra.mxu0 %v5304_v8 }
 0x1ab   :  { %1061 = vmatpush.bf16.msra.mxu1 %v5078_v11  ;;  %1074 = vmatpush.bf16.msra.mxu2 %v5310_v10 }
 0x1ae   :  { %995 = vmatpush.bf16.msra.mxu0 %v5342_v29 }
 0x1af   :  { %1062 = vmatpush.bf16.msra.mxu1 %v5093_v17  ;;  %1075 = vmatpush.bf16.msra.mxu2 %v5352_v33 }
 0x1b2   :  { %996 = vmatpush.bf16.msra.mxu0 %v5368_v43 }
 0x1b3   :  { %1063 = vmatpush.bf16.msra.mxu1 %v5123_v28  ;;  %1076 = vmatpush.bf16.msra.mxu2 %v5371_v44 }
 0x1b6   :  { %997 = vmatpush.bf16.msra.mxu0 %v5402_v3 }
 0x1b7   :  { %1064 = vmatpush.bf16.msra.mxu1 %v5153_v45  ;;  %1077 = vmatpush.bf16.msra.mxu2 %v5405_v5 }
 0x1ba   :  { %998 = vmatpush.bf16.msra.mxu0 %v5430_v22 }
 0x1bb   :  { %1065 = vmatpush.bf16.msra.mxu1 %v5195_v2  ;;  %1078 = vmatpush.bf16.msra.mxu2 %v5433_v24 }
 0x1be   :  { %999 = vmatpush.bf16.msra.mxu0 %v5457_v37 }
 0x1bf   :  { %1066 = vmatpush.bf16.msra.mxu1 %v5219_v16  ;;  %1079 = vmatpush.bf16.msra.mxu2 %v5460_v38 }
 0x1c2   :  { %1000 = vmatpush.bf16.msra.mxu0 %v5476_v50 }
 0x1c3   :  { %1067 = vmatpush.bf16.msra.mxu1 %v5262_v42  ;;  %1080 = vmatpush.bf16.msra.mxu2 %v5479_v51 }
 0x222   :  { %v790_v13 = vpop.f32.mrf.mxu0  ;;  %v803_v36 = vpop.f32.mrf.mxu1 }
 0x223   :  { %v824_v14 = vadd.f32 %v790_v13, %v5561_v27  ;;  %v844_v60 = vadd.f32 %v803_v36, %v366_v61 }
 0x225   :  { %v4048_v20 = vmul.f32 -1.442695, %v824_v14  ;;  %v4049_v25 = vmul.f32 -1.442695, %v844_v60 }
 0x227   :  { %4692 = vpow2.f32 %v4048_v20 }
 0x228   :  { %4694 = vpow2.f32 %v4049_v25 }
 0x229   :  { %v816_v62 = vpop.f32.mrf.mxu2 }
 0x22a   :  { %v792_v59 = vpop.f32.mrf.mxu0  ;;  %v805_v53 = vpop.f32.mrf.mxu1  ;;  %v864_v14 = vadd.f32 %v5588_v26, %v816_v62 }
 0x22d   :  { %v4693_v6 = vpop.eup %4692 }
 0x22e   :  { %v4695_v40 = vpop.eup %4694  ;;  %v828_v54 = vadd.f32 1.0, %v4693_v6 }
 0x22f   :  { %v848_v4 = vadd.f32 1.0, %v4695_v40 }
 0x230   :  { %4696 = vrcp.f32 %v828_v54  ;;  %v840_v47 = vand.u32 2147483648, %v828_v54  ;;  %v838_v21 = vand.u32 2147483647, %v828_v54  ;;  %vm834_vm3 = vweird.f32 %v828_v54 }
 0x231   :  { %4698 = vrcp.f32 %v848_v4  ;;  %v818_v23 = vpop.f32.mrf.mxu2  ;;  %v860_v6 = vand.u32 2147483648, %v848_v4  ;;  %vm854_vm7 = vweird.f32 %v848_v4  ;;  %v858_v40 = vand.u32 2147483647, %v848_v4 }
 0x232   :  { %v841_v13 = vor.u32 1.1754944e-38, %v840_v47  ;;  %vm839_vm5 = vcmp.eq.f32.partialorder %v838_v21, 8.507059e+37  ;;  %v339_v21 = vadd.f32 %v5563_v31, %v5557_v19 }
 0x233   :  { %vm859_vm9 = vcmp.eq.f32.partialorder %v858_v40, 8.507059e+37 }
 0x236   :  { %v4697_v0 = vpop.eup %4696 }
 0x237   :  { %v4699_v1 = vpop.eup %4698  ;;  %v830_v41 = vmul.f32 %v4697_v0, %v828_v54  ;;  %vm835_vm2 = vweird.f32 %v4697_v0 }
 0x238   :  { %v850_v27 = vmul.f32 %v4699_v1, %v848_v4  ;;  %vm836_vm4 = vmor %vm834_vm3, %vm835_vm2  ;;  %vm855_vm6 = vweird.f32 %v4699_v1 }
 0x239   :  { %v831_v18 = vsub.f32 1.0, %v830_v41  ;;  %vm856_vm8 = vmor %vm854_vm7, %vm855_vm6  ;;  %v861_v41 = vor.u32 1.1754944e-38, %v860_v6 }
 0x23a   :  { %v851_v61 = vsub.f32 1.0, %v850_v27 }
 0x23b   :  { %v832_v15 = vmul.f32 %v4697_v0, %v831_v18 }
 0x23c   :  { %v852_v25 = vmul.f32 %v4699_v1, %v851_v61 }
 0x23d   :  { %v833_v58 = vadd.f32 %v4697_v0, %v832_v15 }
 0x23e   :  { %v853_v53 = vadd.f32 %v4699_v1, %v852_v25 }
 0x23f   :  { %v837_v36 = vsel %vm836_vm4, %v4697_v0, %v833_v58 }
 0x240   :  { %v842_v60 = vsel %vm839_vm5, %v841_v13, %v837_v36  ;;  %v857_v54 = vsel %vm856_vm8, %v4699_v1, %v853_v53 }
 0x241   :  { %v865_v20 = vmul.f32 %v864_v14, %v842_v60  ;;  %v862_v18 = vsel %vm859_vm9, %v861_v41, %v857_v54 }
 0x243   :  { %v866_v59 = vadd.f32 %v865_v20, %v5583_v12 }
 0x245   :  { %4700 = vtanh.f32 %v866_v59 }
 0x24b   :  { %v4701_v23 = vpop.eup %4700 }
 0x24c   :  { %v868_v0 = vsub.f32 %v5651_v35, %v4701_v23  ;;  %v368_v35 = vadd.f32 %v5632_v48, %v5565_v32 }
 0x24e   :  { %v869_v62 = vmul.f32 %v868_v0, %v862_v18 }
 0x250   :  { %v5685_v27 = vadd.f32 %v4701_v23, %v869_v62 }
 0x252   :  { %v871_v12 = vpack.c.bf16 %v5685_v27, %v5685_v27 }
 0x254   :  { %873 = vst [vmem:[#allocation3 + $0x8] sm:$0xf] %v871_v12  ;;  %882 = vmatmul.bf16.vlgmr.msrb.gmra.mxu3 %v871_v12  ;;  %895 = vmatmul.bf16.vlgmr.msrb.gmra.mxu0 %v871_v12 }
 0x255   :  { %908 = vmatmul.bf16.vlgmr.msrb.gmra.mxu1 %v871_v12  ;;  %1086 = vmatpush.bf16.msrb.mxu3 %v5264_v46 }
 0x256   :  { %1153 = vmatpush.bf16.msrb.mxu0 %v5069_v7  ;;  %1166 = vmatpush.bf16.msrb.mxu1 %v5272_v49 }
 0x259   :  { %1087 = vmatpush.bf16.msrb.mxu3 %v5304_v8 }
 0x25a   :  { %1154 = vmatpush.bf16.msrb.mxu0 %v5078_v11  ;;  %1167 = vmatpush.bf16.msrb.mxu1 %v5310_v10 }
 0x25d   :  { %1088 = vmatpush.bf16.msrb.mxu3 %v5342_v29 }
 0x25e   :  { %1155 = vmatpush.bf16.msrb.mxu0 %v5093_v17  ;;  %1168 = vmatpush.bf16.msrb.mxu1 %v5352_v33 }
 0x261   :  { %1089 = vmatpush.bf16.msrb.mxu3 %v5368_v43 }
 0x262   :  { %1156 = vmatpush.bf16.msrb.mxu0 %v5123_v28  ;;  %1169 = vmatpush.bf16.msrb.mxu1 %v5371_v44 }
 0x265   :  { %1090 = vmatpush.bf16.msrb.mxu3 %v5402_v3 }
 0x266   :  { %1157 = vmatpush.bf16.msrb.mxu0 %v5153_v45  ;;  %1170 = vmatpush.bf16.msrb.mxu1 %v5405_v5 }
 0x269   :  { %1091 = vmatpush.bf16.msrb.mxu3 %v5430_v22 }
 0x26a   :  { %1158 = vmatpush.bf16.msrb.mxu0 %v5195_v2  ;;  %1171 = vmatpush.bf16.msrb.mxu1 %v5433_v24 }
 0x26d   :  { %1092 = vmatpush.bf16.msrb.mxu3 %v5457_v37 }
 0x26e   :  { %1159 = vmatpush.bf16.msrb.mxu0 %v5219_v16  ;;  %1172 = vmatpush.bf16.msrb.mxu1 %v5460_v38 }
 0x271   :  { %1093 = vmatpush.bf16.msrb.mxu3 %v5476_v50 }
 0x272   :  { %1160 = vmatpush.bf16.msrb.mxu0 %v5262_v42  ;;  %1173 = vmatpush.bf16.msrb.mxu1 %v5479_v51 }
 0x2d1   :  { %v896_v4 = vpop.f32.mrf.mxu0 }
 0x2d2   :  { %v937_v1 = vadd.f32 %v896_v4, %v368_v35  ;;  %v909_v47 = vpop.f32.mrf.mxu1 }
 0x2d3   :  { %v957_v35 = vadd.f32 %v5588_v26, %v909_v47 }
 0x2d4   :  { %v4051_v15 = vmul.f32 -1.442695, %v937_v1 }
 0x2d6   :  { %4702 = vpow2.f32 %v4051_v15  ;;  %v397_v15 = vadd.f32 %v5590_v34, %v5578_v63 }
 0x2d7   :  { %v883_v58 = vpop.f32.mrf.mxu3 }
 0x2d8   :  { %v917_v61 = vadd.f32 %v883_v58, %v339_v21 }
 0x2d9   :  { %v898_v13 = vpop.f32.mrf.mxu0 }
 0x2da   :  { %v4050_v36 = vmul.f32 -1.442695, %v917_v61  ;;  %v911_v14 = vpop.f32.mrf.mxu1 }
 0x2dc   :  { %4704 = vpow2.f32 %v4050_v36  ;;  %v4703_v60 = vpop.eup %4702 }
 0x2dd   :  { %v941_v59 = vadd.f32 1.0, %v4703_v60 }
 0x2df   :  { %v885_v20 = vpop.f32.mrf.mxu3  ;;  %v953_v36 = vand.u32 2147483648, %v941_v59  ;;  %vm947_vm15 = vweird.f32 %v941_v59  ;;  %v951_v14 = vand.u32 2147483647, %v941_v59 }
 0x2e1   :  { %vm952_vm2 = vcmp.eq.f32.partialorder %v951_v14, 8.507059e+37 }
 0x2e2   :  { %v4705_v25 = vpop.eup %4704 }
 0x2e3   :  { %v921_v53 = vadd.f32 1.0, %v4705_v25  ;;  %v954_v25 = vor.u32 1.1754944e-38, %v953_v36 }
 0x2e5   :  { %4706 = vrcp.f32 %v921_v53  ;;  %v933_v31 = vand.u32 2147483648, %v921_v53  ;;  %v931_v0 = vand.u32 2147483647, %v921_v53  ;;  %vm927_vm11 = vweird.f32 %v921_v53 }
 0x2e6   :  { %4708 = vrcp.f32 %v941_v59 }
 0x2e7   :  { %v934_v12 = vor.u32 1.1754944e-38, %v933_v31  ;;  %vm932_vm13 = vcmp.eq.f32.partialorder %v931_v0, 8.507059e+37 }
 0x2eb   :  { %v4707_v48 = vpop.eup %4706 }
 0x2ec   :  { %v4709_v6 = vpop.eup %4708  ;;  %v923_v40 = vmul.f32 %v4707_v48, %v921_v53  ;;  %vm928_vm10 = vweird.f32 %v4707_v48 }
 0x2ed   :  { %v943_v23 = vmul.f32 %v4709_v6, %v941_v59  ;;  %vm929_vm12 = vmor %vm927_vm11, %vm928_vm10  ;;  %vm948_vm14 = vweird.f32 %v4709_v6 }
 0x2ee   :  { %v924_v54 = vsub.f32 1.0, %v923_v40  ;;  %vm949_vm1 = vmor %vm947_vm15, %vm948_vm14 }
 0x2ef   :  { %v944_v62 = vsub.f32 1.0, %v943_v23 }
 0x2f0   :  { %v925_v41 = vmul.f32 %v4707_v48, %v924_v54 }
 0x2f1   :  { %v945_v58 = vmul.f32 %v4709_v6, %v944_v62 }
 0x2f2   :  { %v926_v18 = vadd.f32 %v4707_v48, %v925_v41 }
 0x2f3   :  { %v946_v13 = vadd.f32 %v4709_v6, %v945_v58 }
 0x2f4   :  { %v930_v4 = vsel %vm929_vm12, %v4707_v48, %v926_v18 }
 0x2f5   :  { %v935_v1 = vsel %vm932_vm13, %v934_v12, %v930_v4  ;;  %v950_v60 = vsel %vm949_vm1, %v4709_v6, %v946_v13 }
 0x2f6   :  { %v958_v21 = vmul.f32 %v957_v35, %v935_v1  ;;  %v955_v53 = vsel %vm952_vm2, %v954_v25, %v950_v60 }
 0x2f8   :  { %v959_v61 = vadd.f32 %v958_v21, %v397_v15 }
 0x2fa   :  { %4710 = vtanh.f32 %v959_v61 }
 0x300   :  { %v4711_v20 = vpop.eup %4710 }
 0x301   :  { %v961_v47 = vsub.f32 %v5685_v27, %v4711_v20 }
 0x303   :  { %v962_v48 = vmul.f32 %v961_v47, %v955_v53  ;;  %v344_v47 = vadd.f32 %v5571_v52, %v5557_v19 }
 0x305   :  { %v5721_v40 = vadd.f32 %v4711_v20, %v962_v48 }
 0x307   :  { %v964_v34 = vpack.c.bf16 %v5721_v40, %v5721_v40 }
 0x309   :  { %966 = vst [vmem:[#allocation3 + $0xc] sm:$0xf] %v964_v34  ;;  %975 = vmatmul.bf16.vlgmr.msrb.gmra.mxu2 %v964_v34  ;;  %988 = vmatmul.bf16.vlgmr.msra.gmra.mxu3 %v964_v34 }
 0x30a   :  { %1001 = vmatmul.bf16.vlgmr.msra.gmra.mxu0 %v964_v34  ;;  %1179 = vmatpush.bf16.msrb.mxu2 %v5264_v46 }
 0x30b   :  { %1246 = vmatpush.bf16.msra.mxu3 %v5069_v7  ;;  %1259 = vmatpush.bf16.msra.mxu0 %v5272_v49 }
 0x30e   :  { %1180 = vmatpush.bf16.msrb.mxu2 %v5304_v8 }
 0x30f   :  { %1247 = vmatpush.bf16.msra.mxu3 %v5078_v11  ;;  %1260 = vmatpush.bf16.msra.mxu0 %v5310_v10  ;;  %v371_v11 = vadd.f32 %v5634_v55, %v5565_v32 }
 0x312   :  { %1181 = vmatpush.bf16.msrb.mxu2 %v5342_v29 }
 0x313   :  { %1248 = vmatpush.bf16.msra.mxu3 %v5093_v17  ;;  %1261 = vmatpush.bf16.msra.mxu0 %v5352_v33 }
 0x316   :  { %1182 = vmatpush.bf16.msrb.mxu2 %v5368_v43 }
 0x317   :  { %1249 = vmatpush.bf16.msra.mxu3 %v5123_v28  ;;  %1262 = vmatpush.bf16.msra.mxu0 %v5371_v44 }
 0x31a   :  { %1183 = vmatpush.bf16.msrb.mxu2 %v5402_v3 }
 0x31b   :  { %1250 = vmatpush.bf16.msra.mxu3 %v5153_v45  ;;  %1263 = vmatpush.bf16.msra.mxu0 %v5405_v5 }
 0x31e   :  { %1184 = vmatpush.bf16.msrb.mxu2 %v5430_v22 }
 0x31f   :  { %1251 = vmatpush.bf16.msra.mxu3 %v5195_v2  ;;  %1264 = vmatpush.bf16.msra.mxu0 %v5433_v24 }
 0x322   :  { %1185 = vmatpush.bf16.msrb.mxu2 %v5457_v37 }
 0x323   :  { %1252 = vmatpush.bf16.msra.mxu3 %v5219_v16  ;;  %1265 = vmatpush.bf16.msra.mxu0 %v5460_v38 }
 0x326   :  { %1186 = vmatpush.bf16.msrb.mxu2 %v5476_v50 }
 0x327   :  { %1253 = vmatpush.bf16.msra.mxu3 %v5262_v42  ;;  %1266 = vmatpush.bf16.msra.mxu0 %v5479_v51 }
 0x387   :  { %v1002_v7 = vpop.f32.mrf.mxu0 }
 0x388   :  { %v1050_v18 = vadd.f32 %v5588_v26, %v1002_v7 }
 0x38c   :  { %v976_v17 = vpop.f32.mrf.mxu2  ;;  %v989_v28 = vpop.f32.mrf.mxu3 }
 0x38d   :  { %v1010_v45 = vadd.f32 %v976_v17, %v5568_v39  ;;  %v1030_v2 = vadd.f32 %v989_v28, %v371_v11  ;;  %v4576_v17 = vld [vmem:[%s7288_s5 + $0x80] sm:$0xf0] }
 0x38f   :  { %v4052_v49 = vmul.f32 -1.442695, %v1010_v45  ;;  %v4053_v10 = vmul.f32 -1.442695, %v1030_v2  ;;  %v1004_v16 = vpop.f32.mrf.mxu0  ;;  %v4126_v45 = vld [vmem:[%s7288_s5 + $0x60] sm:$0xf] }
 0x390   :  { %v4573_v2 = vld [vmem:[%s7288_s5 + $0x68] sm:$0xf0] }
 0x391   :  { %4712 = vpow2.f32 %v4052_v49  ;;  %v4127_v16 = vor.u32 %v4573_v2, %v4126_v45  ;;  %v4600_v45 = vld [vmem:[%s7289_s6 + $0x80] sm:$0xf0] }
 0x392   :  { %4714 = vpow2.f32 %v4053_v10 }
 0x394   :  { %v978_v33 = vpop.f32.mrf.mxu2  ;;  %v991_v44 = vpop.f32.mrf.mxu3 }
 0x397   :  { %v4713_v5 = vpop.eup %4712 }
 0x398   :  { %v4715_v42 = vpop.eup %4714  ;;  %v1014_v24 = vadd.f32 1.0, %v4713_v5 }
 0x399   :  { %v1034_v38 = vadd.f32 1.0, %v4715_v42  ;;  %v4114_v42 = vld [vmem:[%s7288_s5 + $0x48] sm:$0xf] }
 0x39a   :  { %4716 = vrcp.f32 %v1014_v24  ;;  %v1026_v6 = vand.u32 2147483648, %v1014_v24  ;;  %v1024_v23 = vand.u32 2147483647, %v1014_v24  ;;  %vm1020_vm4 = vweird.f32 %v1014_v24 }
 0x39b   :  { %4718 = vrcp.f32 %v1034_v38  ;;  %v1046_v21 = vand.u32 2147483648, %v1034_v38  ;;  %vm1040_vm8 = vweird.f32 %v1034_v38  ;;  %v1044_v58 = vand.u32 2147483647, %v1034_v38 }
 0x39c   :  { %v1027_v41 = vor.u32 1.1754944e-38, %v1026_v6  ;;  %vm1025_vm6 = vcmp.eq.f32.partialorder %v1024_v23, 8.507059e+37  ;;  %v4564_v23 = vld [vmem:[%s7288_s5 + $0x20] sm:$0xf0] }
 0x39d   :  { %v1047_v36 = vor.u32 1.1754944e-38, %v1046_v21  ;;  %vm1045_vm10 = vcmp.eq.f32.partialorder %v1044_v58, 8.507059e+37 }
 0x3a0   :  { %v4717_v51 = vpop.eup %4716 }
 0x3a1   :  { %v4719_v55 = vpop.eup %4718  ;;  %v1016_v27 = vmul.f32 %v4717_v51, %v1014_v24  ;;  %vm1021_vm3 = vweird.f32 %v4717_v51  ;;  %v4570_v24 = vld [vmem:[%s7288_s5 + $0x50] sm:$0xf0] }
 0x3a2   :  { %v1036_v39 = vmul.f32 %v4719_v55, %v1034_v38  ;;  %vm1022_vm5 = vmor %vm1020_vm4, %vm1021_vm3  ;;  %vm1041_vm7 = vweird.f32 %v4719_v55 }
 0x3a3   :  { %v1017_v59 = vsub.f32 1.0, %v1016_v27  ;;  %vm1042_vm9 = vmor %vm1040_vm8, %vm1041_vm7  ;;  %v4567_v27 = vld [vmem:[%s7288_s5 + $0x38] sm:$0xf0] }
 0x3a4   :  { %v1037_v0 = vsub.f32 1.0, %v1036_v39 }
 0x3a5   :  { %v1018_v54 = vmul.f32 %v4717_v51, %v1017_v59 }
 0x3a6   :  { %v1038_v4 = vmul.f32 %v4719_v55, %v1037_v0 }
 0x3a7   :  { %v1019_v31 = vadd.f32 %v4717_v51, %v1018_v54  ;;  %v4090_v54 = vld [vmem:[%s7288_s5 + $0x18] sm:$0xf] }
 0x3a8   :  { %v1039_v15 = vadd.f32 %v4719_v55, %v1038_v4  ;;  %v4091_v0 = vor.u32 %v4564_v23, %v4090_v54  ;;  %v4210_v23 = vld [vmem:[%s7289_s6 + $0x48] sm:$0xf] }
 0x3a9   :  { %v1023_v62 = vsel %vm1022_vm5, %v4717_v51, %v1019_v31  ;;  %v4115_v51 = vor.u32 %v4570_v24, %v4114_v42 }
 0x3aa   :  { %v1028_v12 = vsel %vm1025_vm6, %v1027_v41, %v1023_v62  ;;  %v1043_v61 = vsel %vm1042_vm9, %v4719_v55, %v1039_v15  ;;  %v4102_v55 = vld [vmem:[%s7288_s5 + $0x30] sm:$0xf] }
 0x3ab   :  { %v1051_v35 = vmul.f32 %v1050_v18, %v1028_v12  ;;  %v1048_v60 = vsel %vm1045_vm10, %v1047_v36, %v1043_v61  ;;  %v4103_v39 = vor.u32 %v4567_v27, %v4102_v55  ;;  %v4078_v12 = vld [vmem:[%s7288_s5] sm:$0xf]  ;;  %v4170_v55 = vld [vmem:[%s7288_s5 + $0xb0] sm:$0xf] }
 0x3ad   :  { %v1052_v1 = vadd.f32 %v1051_v35, %v5595_v9  ;;  %v4561_v35 = vld [vmem:[%s7288_s5 + $0x8] sm:$0xf0] }
 0x3ae   :  { %v4079_v58 = vor.u32 %v4561_v35, %v4078_v12  ;;  %v4580_v35 = vld [vmem:[%s7288_s5 + $0xa0] sm:$0xf0] }
 0x3af   :  { %4720 = vtanh.f32 %v1052_v1 }
 0x3b5   :  { %v4721_v13 = vpop.eup %4720 }
 0x3b6   :  { %v1054_v14 = vsub.f32 %v5721_v40, %v4721_v13 }
 0x3b8   :  { %v1055_v20 = vmul.f32 %v1054_v14, %v1048_v60  ;;  %v402_v60 = vadd.f32 %v5597_v30, %v5578_v63 }
 0x3ba   :  { %v5755_v25 = vadd.f32 %v4721_v13, %v1055_v20 }
 0x3bc   :  { %v1057_v9 = vpack.c.bf16 %v5755_v25, %v5755_v25 }
 0x3be   :  { %1059 = vst [vmem:[#allocation3 + $0x10] sm:$0xf] %v1057_v9  ;;  %1068 = vmatmul.bf16.vlgmr.msra.gmra.mxu1 %v1057_v9  ;;  %1081 = vmatmul.bf16.vlgmr.msra.gmra.mxu2 %v1057_v9 }
 0x3bf   :  { %1094 = vmatmul.bf16.vlgmr.msrb.gmra.mxu3 %v1057_v9  ;;  %1272 = vmatpush.bf16.msra.mxu1 %v5264_v46  ;;  %v4162_v46 = vld [vmem:[%s7288_s5 + $0xa8] sm:$0xf] }
 0x3c3   :  { %1273 = vmatpush.bf16.msra.mxu1 %v5304_v8  ;;  %v4582_v8 = vld [vmem:[%s7288_s5 + $0xb0] sm:$0xf0] }
 0x3c7   :  { %1274 = vmatpush.bf16.msra.mxu1 %v5342_v29  ;;  %v4163_v29 = vor.u32 %v4582_v8, %v4162_v46 }
 0x3c9   :  { %1539 = vmatpush.bf16.msra.mxu2 %v4163_v29 }
 0x3cb   :  { %1275 = vmatpush.bf16.msra.mxu1 %v5368_v43 }
 0x3cf   :  { %1276 = vmatpush.bf16.msra.mxu1 %v5402_v3  ;;  %v373_v3 = vadd.f32 %v5636_v56, %v5565_v32  ;;  %v4138_v56 = vld [vmem:[%s7288_s5 + $0x78] sm:$0xf] }
 0x3d0   :  { %v4139_v28 = vor.u32 %v4576_v17, %v4138_v56  ;;  %v4603_v56 = vld [vmem:[%s7289_s6 + $0x98] sm:$0xf0] }
 0x3d3   :  { %1277 = vmatpush.bf16.msra.mxu1 %v5430_v22  ;;  %v4150_v22 = vld [vmem:[%s7288_s5 + $0x90] sm:$0xf] }
 0x3d7   :  { %1278 = vmatpush.bf16.msra.mxu1 %v5457_v37  ;;  %v4579_v37 = vld [vmem:[%s7288_s5 + $0x98] sm:$0xf0] }
 0x3d8   :  { %v4151_v52 = vor.u32 %v4579_v37, %v4150_v22 }
 0x3da   :  { %1540 = vmatpush.bf16.msra.mxu2 %v4151_v52  ;;  %v5830_v52 = vld [vmem:[#allocation3 + $0x8] sm:$0xff] }
 0x3db   :  { %1279 = vmatpush.bf16.msra.mxu1 %v5476_v50 }
 0x3de   :  { %1541 = vmatpush.bf16.msra.mxu2 %v4139_v28  ;;  %v4234_v28 = vld [vmem:[%s7289_s6 + $0x78] sm:$0xf] }
 0x3df   :  { %v5860_v2 = vor.u32 %v4600_v45, %v4234_v28  ;;  %v4174_v28 = vld [vmem:[%s7289_s6] sm:$0xf]  ;;  %v4585_v45 = vld [vmem:[%s7289_s6 + $0x8] sm:$0xf0] }
 0x3e2   :  { %1542 = vmatpush.bf16.msra.mxu2 %v4127_v16 }
 0x3e6   :  { %1543 = vmatpush.bf16.msra.mxu2 %v4115_v51  ;;  %v4164_v51 = vld [vmem:[%s7288_s5 + $0xb4] sm:$0xf0] }
 0x3ea   :  { %1544 = vmatpush.bf16.msra.mxu2 %v4103_v39 }
 0x3ee   :  { %1545 = vmatpush.bf16.msra.mxu2 %v4091_v0  ;;  %v4578_v0 = vld [vmem:[%s7288_s5 + $0x94] sm:$0xf] }
 0x3f2   :  { %1546 = vmatpush.bf16.msra.mxu2 %v4079_v58  ;;  %v4198_v58 = vld [vmem:[%s7289_s6 + $0x30] sm:$0xf] }
 0x43b   :  { %v1069_v53 = vpop.f32.mrf.mxu1 }
 0x43c   :  { %v1103_v48 = vadd.f32 %v1069_v53, %v344_v47 }
 0x43e   :  { %v4054_v43 = vmul.f32 -1.442695, %v1103_v48 }
 0x440   :  { %4722 = vpow2.f32 %v4054_v43 }
 0x441   :  { %v1082_v50 = vpop.f32.mrf.mxu2 }
 0x442   :  { %v1123_v40 = vadd.f32 %v1082_v50, %v373_v3  ;;  %v1095_v34 = vpop.f32.mrf.mxu3  ;;  %v5827_v50 = vld [vmem:[#allocation3] sm:$0xff] }
 0x443   :  { %v1071_v7 = vpop.f32.mrf.mxu1  ;;  %v1143_v36 = vadd.f32 %v5588_v26, %v1095_v34  ;;  %v4606_v34 = vld [vmem:[%s7289_s6 + $0xb0] sm:$0xf0] }
 0x444   :  { %v4055_v11 = vmul.f32 -1.442695, %v1123_v40  ;;  %v4258_v40 = vld [vmem:[%s7289_s6 + $0xa8] sm:$0xf] }
 0x445   :  { %v5842_v7 = vor.u32 %v4606_v34, %v4258_v40 }
 0x446   :  { %v4723_v49 = vpop.eup %4722  ;;  %4724 = vpow2.f32 %v4055_v11  ;;  %v4246_v11 = vld [vmem:[%s7289_s6 + $0x90] sm:$0xf] }
 0x447   :  { %v1107_v10 = vadd.f32 1.0, %v4723_v49  ;;  %v5851_v17 = vor.u32 %v4603_v56, %v4246_v11  ;;  %v376_v49 = vadd.f32 %v5638_v57, %v5565_v32  ;;  %v4581_v57 = vld [vmem:[%s7288_s5 + $0xac] sm:$0xf]  ;;  %v4574_v11 = vld [vmem:[%s7288_s5 + $0x70] sm:$0xf0] }
 0x448   :  { %v4167_v27 = vor.u32 %v4581_v57, %v4164_v51 }
 0x449   :  { %4726 = vrcp.f32 %v1107_v10  ;;  %v1084_v33 = vpop.f32.mrf.mxu2  ;;  %v1119_v41 = vand.u32 2147483648, %v1107_v10  ;;  %v1117_v62 = vand.u32 2147483647, %v1107_v10  ;;  %vm1113_vm12 = vweird.f32 %v1107_v10 }
 0x44a   :  { %v1097_v44 = vpop.f32.mrf.mxu3  ;;  %v4222_v33 = vld [vmem:[%s7289_s6 + $0x60] sm:$0xf]  ;;  %1568 = vmatpush.bf16.msrb.mxu3 %v4167_v27 }
 0x44b   :  { %v1120_v21 = vor.u32 1.1754944e-38, %v1119_v41  ;;  %vm1118_vm14 = vcmp.eq.f32.partialorder %v1117_v62, 8.507059e+37  ;;  %v4597_v44 = vld [vmem:[%s7289_s6 + $0x68] sm:$0xf0]  ;;  %v4158_v62 = vld [vmem:[%s7288_s5 + $0x98] sm:$0xf] }
 0x44c   :  { %v4725_v5 = vpop.eup %4724  ;;  %v4104_v27 = vld [vmem:[%s7288_s5 + $0x3c] sm:$0xf0] }
 0x44d   :  { %v1127_v38 = vadd.f32 1.0, %v4725_v5  ;;  %v7312_v5 = vld [vmem:[#allocation14_spill] sm:$0xff] }
 0x44f   :  { %v4727_v59 = vpop.eup %4726  ;;  %4728 = vrcp.f32 %v1127_v38  ;;  %v1139_v48 = vand.u32 2147483648, %v1127_v38  ;;  %vm1133_vm1 = vweird.f32 %v1127_v38  ;;  %v1137_v46 = vand.u32 2147483647, %v1127_v38 }
 0x450   :  { %v1109_v6 = vmul.f32 %v4727_v59, %v1107_v10  ;;  %vm1114_vm11 = vweird.f32 %v4727_v59 }
 0x451   :  { %vm1115_vm13 = vmor %vm1113_vm12, %vm1114_vm11  ;;  %v1140_v43 = vor.u32 1.1754944e-38, %v1139_v48  ;;  %vm1138_vm3 = vcmp.eq.f32.partialorder %v1137_v46, 8.507059e+37 }
 0x452   :  { %v1110_v31 = vsub.f32 1.0, %v1109_v6 }
 0x454   :  { %v1111_v18 = vmul.f32 %v4727_v59, %v1110_v31  ;;  %v4594_v31 = vld [vmem:[%s7289_s6 + $0x50] sm:$0xf0] }
 0x455   :  { %v4729_v4 = vpop.eup %4728  ;;  %v5893_v41 = vor.u32 %v4594_v31, %v4210_v23 }
 0x456   :  { %v1129_v1 = vmul.f32 %v4729_v4, %v1127_v38  ;;  %v1112_v15 = vadd.f32 %v4727_v59, %v1111_v18  ;;  %vm1134_vm15 = vweird.f32 %v4729_v4  ;;  %v5872_v38 = vor.u32 %v4597_v44, %v4222_v33  ;;  %v4152_v18 = vld [vmem:[%s7288_s5 + $0x9c] sm:$0xf0]  ;;  %v4122_v44 = vld [vmem:[%s7288_s5 + $0x50] sm:$0xf] }
 0x457   :  { %vm1135_vm2 = vmor %vm1133_vm1, %vm1134_vm15  ;;  %v4155_v12 = vor.u32 %v4578_v0, %v4152_v18 }
 0x458   :  { %v1130_v61 = vsub.f32 1.0, %v1129_v1  ;;  %v1116_v13 = vsel %vm1115_vm13, %v4727_v59, %v1112_v15  ;;  %v4583_v59 = vld [vmem:[%s7288_s5 + $0xb8] sm:$0xf0]  ;;  %v4159_v1 = vor.u32 %v4580_v35, %v4158_v62  ;;  %v4092_v35 = vld [vmem:[%s7288_s5 + $0x24] sm:$0xf0] }
 0x459   :  { %v1121_v14 = vsel %vm1118_vm14, %v1120_v21, %v1116_v13  ;;  %v4171_v54 = vor.u32 %v4583_v59, %v4170_v55  ;;  %1569 = vmatpush.bf16.msrb.mxu3 %v4155_v12  ;;  %v4566_v55 = vld [vmem:[%s7288_s5 + $0x34] sm:$0xf]  ;;  %v4563_v12 = vld [vmem:[%s7288_s5 + $0x1c] sm:$0xf] }
 0x45a   :  { %v1144_v20 = vmul.f32 %v1143_v36, %v1121_v14  ;;  %v1131_v9 = vmul.f32 %v4729_v4, %v1130_v61  ;;  %v4591_v61 = vld [vmem:[%s7289_s6 + $0x38] sm:$0xf0]  ;;  %v4140_v14 = vld [vmem:[%s7288_s5 + $0x84] sm:$0xf0] }
 0x45b   :  { %v5916_v13 = vor.u32 %v4591_v61, %v4198_v58  ;;  %v4575_v36 = vld [vmem:[%s7288_s5 + $0x7c] sm:$0xf] }
 0x45c   :  { %v1145_v47 = vadd.f32 %v1144_v20, %v402_v60  ;;  %v1132_v53 = vadd.f32 %v4729_v4, %v1131_v9  ;;  %v4146_v60 = vld [vmem:[%s7288_s5 + $0x80] sm:$0xf]  ;;  %v4143_v20 = vor.u32 %v4575_v36, %v4140_v14  ;;  %v4577_v9 = vld [vmem:[%s7288_s5 + $0x88] sm:$0xf0] }
 0x45e   :  { %4730 = vtanh.f32 %v1145_v47  ;;  %v1136_v8 = vsel %vm1135_vm2, %v4729_v4, %v1132_v53  ;;  %v4147_v53 = vor.u32 %v4577_v9, %v4146_v60  ;;  %1570 = vmatpush.bf16.msrb.mxu3 %v4143_v20  ;;  %v6004_v20 = vld [vmem:[%s7287_s4] ss:$0 sm:$0xff] }
 0x45f   :  { %v1141_v3 = vsel %vm1138_vm3, %v1140_v43, %v1136_v8  ;;  %v4186_v8 = vld [vmem:[%s7289_s6 + $0x18] sm:$0xf] }
 0x464   :  { %v4731_v29 = vpop.eup %4730 }
 0x465   :  { %v1147_v26 = vsub.f32 %v5755_v25, %v4731_v29 }
 0x467   :  { %v1148_v22 = vmul.f32 %v1147_v26, %v1141_v3  ;;  %v4572_v3 = vld [vmem:[%s7288_s5 + $0x64] sm:$0xf] }
 0x469   :  { %v5823_v30 = vadd.f32 %v4731_v29, %v1148_v22  ;;  %v4588_v29 = vld [vmem:[%s7289_s6 + $0x20] sm:$0xf0]  ;;  %v4128_v22 = vld [vmem:[%s7288_s5 + $0x6c] sm:$0xf0] }
 0x46a   :  { %v5939_v26 = vor.u32 %v4588_v29, %v4186_v8  ;;  %v4131_v34 = vor.u32 %v4572_v3, %v4128_v22 }
 0x46b   :  { %v1150_v37 = vpack.c.bf16 %v5823_v30, %v5823_v30 }
 0x46c   :  { %1571 = vmatpush.bf16.msrb.mxu3 %v4131_v34 }
 0x46d   :  { %1152 = vst [vmem:[#allocation3 + $0x14] sm:$0xf] %v1150_v37  ;;  %1161 = vmatmul.bf16.vlgmr.msrb.gmra.mxu0 %v1150_v37  ;;  %1174 = vmatmul.bf16.vlgmr.msrb.gmra.mxu1 %v1150_v37 }
 0x46e   :  { %1187 = vmatmul.bf16.vlgmr.msrb.gmra.mxu2 %v1150_v37  ;;  %1814 = vmatpush.bf16.msrb.mxu1 %v5842_v7  ;;  %v4134_v37 = vld [vmem:[%s7288_s5 + $0x68] sm:$0xf] }
 0x46f   :  { %1597 = vmatpush.bf16.msrb.mxu0 %v4171_v54  ;;  %v4135_v56 = vor.u32 %v4574_v11, %v4134_v37  ;;  %v4568_v54 = vld [vmem:[%s7288_s5 + $0x40] sm:$0xf0]  ;;  %v7313_v37 = vld [vmem:[#allocation16_spill] sm:$0xff] }
 0x472   :  { %1815 = vmatpush.bf16.msrb.mxu1 %v5851_v17 }
 0x473   :  { %1598 = vmatpush.bf16.msrb.mxu0 %v4159_v1  ;;  %v4098_v1 = vld [vmem:[%s7288_s5 + $0x20] sm:$0xf] }
 0x474   :  { %v5833_v25 = vld [vmem:[#allocation3 + $0x10] sm:$0xff] }
 0x476   :  { %1816 = vmatpush.bf16.msrb.mxu1 %v5860_v2 }
 0x477   :  { %1599 = vmatpush.bf16.msrb.mxu0 %v4147_v53  ;;  %v4560_v53 = vld [vmem:[%s7288_s5 + $0x4] sm:$0xf] }
 0x47a   :  { %1817 = vmatpush.bf16.msrb.mxu1 %v5872_v38 }
 0x47b   :  { %1600 = vmatpush.bf16.msrb.mxu0 %v4135_v56 }
 0x47e   :  { %1547 = vmatmul.bf16.vlgmr.msra.gmra.mxu2 %v5827_v50  ;;  %1818 = vmatpush.bf16.msrb.mxu1 %v5893_v41 }
 0x482   :  { %1819 = vmatpush.bf16.msrb.mxu1 %v5916_v13 }
 0x486   :  { %1820 = vmatpush.bf16.msrb.mxu1 %v5939_v26 }
 0x48e   :  { %1552 = vmatmul.bf16.gmra.mxu2 %v5830_v52 }
 0x49e   :  { %1557 = vmatmul.bf16.gmra.mxu2 %v5833_v25 }
 0x4ea   :  { %v1162_v10 = vpop.f32.mrf.mxu0  ;;  %v1175_v16 = vpop.f32.mrf.mxu1 }
 0x4eb   :  { %v1196_v42 = vadd.f32 %v1162_v10, %v7312_v5  ;;  %v1216_v24 = vadd.f32 %v1175_v16, %v376_v49  ;;  %v5961_v49 = vor.u32 %v4585_v45, %v4174_v28  ;;  %v4569_v10 = vld [vmem:[%s7288_s5 + $0x4c] sm:$0xf]  ;;  %v4116_v16 = vld [vmem:[%s7288_s5 + $0x54] sm:$0xf0]  ;;  %v4571_v5 = vld [vmem:[%s7288_s5 + $0x58] sm:$0xf0] }
 0x4ec   :  { %v4119_v33 = vor.u32 %v4569_v10, %v4116_v16 }
 0x4ed   :  { %v4056_v6 = vmul.f32 -1.442695, %v1196_v42  ;;  %v4057_v39 = vmul.f32 -1.442695, %v1216_v24  ;;  %1821 = vmatpush.bf16.msrb.mxu1 %v5961_v49  ;;  %v4123_v24 = vor.u32 %v4571_v5, %v4122_v44  ;;  %v4605_v5 = vld [vmem:[%s7289_s6 + $0xac] sm:$0xf] }
 0x4ee   :  { %1572 = vmatpush.bf16.msrb.mxu3 %v4119_v33 }
 0x4ef   :  { %4732 = vpow2.f32 %v4056_v6  ;;  %1601 = vmatpush.bf16.msrb.mxu0 %v4123_v24  ;;  %v4107_v6 = vor.u32 %v4566_v55, %v4104_v27  ;;  %v4599_v27 = vld [vmem:[%s7289_s6 + $0x7c] sm:$0xf] }
 0x4f0   :  { %4734 = vpow2.f32 %v4057_v39  ;;  %v4110_v39 = vld [vmem:[%s7288_s5 + $0x38] sm:$0xf] }
 0x4f1   :  { %v5907_v4 = vpop.f32.mrf.mxu2  ;;  %v4111_v18 = vor.u32 %v4568_v54, %v4110_v39  ;;  %v4596_v39 = vld [vmem:[%s7289_s6 + $0x64] sm:$0xf]  ;;  %v4224_v54 = vld [vmem:[%s7289_s6 + $0x6c] sm:$0xf0] }
 0x4f2   :  { %v1164_v15 = vpop.f32.mrf.mxu0  ;;  %v1177_v21 = vpop.f32.mrf.mxu1  ;;  %1573 = vmatpush.bf16.msrb.mxu3 %v4107_v6  ;;  %v1236_v9 = vadd.f32 %v6004_v20, %v5907_v4  ;;  %v4562_v4 = vld [vmem:[%s7288_s5 + $0x10] sm:$0xf0] }
 0x4f3   :  { %1602 = vmatpush.bf16.msrb.mxu0 %v4111_v18  ;;  %v4095_v15 = vor.u32 %v4563_v12, %v4092_v35  ;;  %v4565_v21 = vld [vmem:[%s7288_s5 + $0x28] sm:$0xf0]  ;;  %v4200_v12 = vld [vmem:[%s7289_s6 + $0x3c] sm:$0xf0]  ;;  %v7314_v35 = vmov 0  }
 0x4f4   :  { %v4099_v61 = vor.u32 %v4565_v21, %v4098_v1  ;;  %v4188_v21 = vld [vmem:[%s7289_s6 + $0x24] sm:$0xf0] }
 0x4f5   :  { %v4733_v47 = vpop.eup %4732 }
 0x4f6   :  { %v4735_v48 = vpop.eup %4734  ;;  %v1200_v46 = vadd.f32 1.0, %v4733_v47  ;;  %1574 = vmatpush.bf16.msrb.mxu3 %v4095_v15  ;;  %v4587_v15 = vld [vmem:[%s7289_s6 + $0x1c] sm:$0xf] }
 0x4f7   :  { %v5937_v43 = vadd.f32 1.0, %v4735_v48  ;;  %1603 = vmatpush.bf16.msrb.mxu0 %v4099_v61  ;;  %v4080_v48 = vld [vmem:[%s7288_s5 + $0xc] sm:$0xf0] }
 0x4f8   :  { %4736 = vrcp.f32 %v1200_v46  ;;  %v1210_v31 = vand.u32 2147483647, %v1200_v46  ;;  %v1212_v0 = vand.u32 2147483648, %v1200_v46  ;;  %vm1206_vm5 = vweird.f32 %v1200_v46  ;;  %v4176_v61 = vld [vmem:[%s7289_s6 + $0xc] sm:$0xf0] }
 0x4f9   :  { %4738 = vrcp.f32 %v5937_v43  ;;  %v1190_v40 = vpop.f32.mrf.mxu2  ;;  %v4083_v29 = vor.u32 %v4560_v53, %v4080_v48  ;;  %v1232_v11 = vand.u32 2147483648, %v5937_v43  ;;  %vm1226_vm9 = vweird.f32 %v5937_v43  ;;  %v7316_v48 = vld [vmem:[#allocation15_spill] sm:$0xff] }
 0x4fa   :  { %v1213_v14 = vor.u32 1.1754944e-38, %v1212_v0  ;;  %vm1211_vm7 = vcmp.eq.f32.partialorder %v1210_v31, 8.507059e+37  ;;  %v1230_v56 = vand.u32 2147483647, %v5937_v43  ;;  %v4593_v31 = vld [vmem:[%s7289_s6 + $0x4c] sm:$0xf] }
 0x4fb   :  { %1575 = vmatpush.bf16.msrb.mxu3 %v4083_v29  ;;  %v1233_v10 = vor.u32 1.1754944e-38, %v1232_v11  ;;  %v4212_v0 = vld [vmem:[%s7289_s6 + $0x54] sm:$0xf0]  ;;  %v4266_v11 = vld [vmem:[%s7289_s6 + $0xb0] sm:$0xf] }
 0x4fc   :  { %vm1231_vm11 = vcmp.eq.f32.partialorder %v1230_v56, 8.507059e+37  ;;  %v6078_v18 = vor.u32 %v4593_v31, %v4212_v0  ;;  %v4218_v31 = vld [vmem:[%s7289_s6 + $0x50] sm:$0xf]  ;;  %v4595_v0 = vld [vmem:[%s7289_s6 + $0x58] sm:$0xf0] }
 0x4fe   :  { %v4737_v42 = vpop.eup %4736 }
 0x4ff   :  { %v4739_v57 = vpop.eup %4738  ;;  %v1202_v51 = vmul.f32 %v4737_v42, %v1200_v46  ;;  %vm1207_vm4 = vweird.f32 %v4737_v42  ;;  %v4086_v46 = vld [vmem:[%s7288_s5 + $0x8] sm:$0xf] }
 0x500   :  { %v1222_v23 = vmul.f32 %v4739_v57, %v5937_v43  ;;  %vm1208_vm6 = vmor %vm1206_vm5, %vm1207_vm4  ;;  %v4087_v22 = vor.u32 %v4562_v4, %v4086_v46  ;;  %vm1227_vm8 = vweird.f32 %v4739_v57  ;;  %v349_v46 = vadd.f32 %v7316_v48, %v5557_v19  ;;  %v4607_v19 = vld [vmem:[%s7289_s6 + $0xb8] sm:$0xf0] }
 0x501   :  { %v1203_v59 = vsub.f32 1.0, %v1202_v51  ;;  %vm1228_vm10 = vmor %vm1226_vm9, %vm1227_vm8  ;;  %v4248_v51 = vld [vmem:[%s7289_s6 + $0x9c] sm:$0xf0]  ;;  %vm3810_vm5 = vcmask 254976  }
 0x502   :  { %v1223_v36 = vsub.f32 1.0, %v1222_v23  ;;  %1604 = vmatpush.bf16.msrb.mxu0 %v4087_v22  ;;  %v6067_v23 = vor.u32 %v4596_v39, %v4224_v54 }
 0x503   :  { %v1204_v62 = vmul.f32 %v4737_v42, %v1203_v59  ;;  %v4236_v59 = vld [vmem:[%s7289_s6 + $0x84] sm:$0xf0] }
 0x504   :  { %v1224_v3 = vmul.f32 %v4739_v57, %v1223_v36  ;;  %v6056_v6 = vor.u32 %v4599_v27, %v4236_v59 }
 0x505   :  { %v1205_v58 = vadd.f32 %v4737_v42, %v1204_v62  ;;  %v4590_v62 = vld [vmem:[%s7289_s6 + $0x34] sm:$0xf] }
 0x506   :  { %v1225_v34 = vadd.f32 %v4739_v57, %v1224_v3  ;;  %v6092_v1 = vor.u32 %v4590_v62, %v4200_v12 }
 0x507   :  { %v1209_v60 = vsel %vm1208_vm6, %v4737_v42, %v1205_v58  ;;  %v4260_v42 = vld [vmem:[%s7289_s6 + $0xb4] sm:$0xf0]  ;;  %v4584_v58 = vld [vmem:[%s7289_s6 + $0x4] sm:$0xf] }
 0x508   :  { %v1214_v47 = vsel %vm1211_vm7, %v1213_v14, %v1209_v60  ;;  %v1229_v28 = vsel %vm1228_vm10, %v4739_v57, %v1225_v34  ;;  %v6035_v57 = vor.u32 %v4605_v5, %v4260_v42  ;;  %v6114_v36 = vor.u32 %v4584_v58, %v4176_v61  ;;  %v4601_v5 = vld [vmem:[%s7289_s6 + $0x88] sm:$0xf0] }
 0x509   :  { %v1237_v8 = vmul.f32 %v1236_v9, %v1214_v47  ;;  %v1234_v33 = vsel %vm1231_vm11, %v1233_v10, %v1229_v28  ;;  %v6149_v28 = vor.u32 %v4607_v19, %v4266_v11  ;;  %v4604_v10 = vld [vmem:[%s7289_s6 + $0xa0] sm:$0xf0]  ;;  %v6196_v58 = vor.u32 %v4595_v0, %v4218_v31  ;;  %v4586_v11 = vld [vmem:[%s7289_s6 + $0x10] sm:$0xf0]  ;;  %v1379_v0 = vld [vmem:[%s7290_s7] sm:$0x7] }
 0x50b   :  { %v1238_v40 = vadd.f32 %v1237_v8, %v7313_v37  ;;  %1840 = vmatpush.bf16.msrb.mxu2 %v6149_v28 }
 0x50d   :  { %4740 = vtanh.f32 %v1238_v40 }
 0x513   :  { %v4741_v45 = vpop.eup %4740 }
 0x514   :  { %v1240_v16 = vsub.f32 %v5823_v30, %v4741_v45  ;;  %v4602_v30 = vld [vmem:[%s7289_s6 + $0x94] sm:$0xf] }
 0x515   :  { %v6045_v55 = vor.u32 %v4602_v30, %v4248_v51  ;;  %v4230_v30 = vld [vmem:[%s7289_s6 + $0x68] sm:$0xf]  ;;  %v4598_v51 = vld [vmem:[%s7289_s6 + $0x70] sm:$0xf0] }
 0x516   :  { %v1241_v44 = vmul.f32 %v1240_v16, %v1234_v33  ;;  %v6183_v39 = vor.u32 %v4598_v51, %v4230_v30 }
 0x518   :  { %v6031_v24 = vadd.f32 %v4741_v45, %v1241_v44  ;;  %v4254_v45 = vld [vmem:[%s7289_s6 + $0x98] sm:$0xf]  ;;  %v4242_v44 = vld [vmem:[%s7289_s6 + $0x80] sm:$0xf] }
 0x519   :  { %v6161_v16 = vor.u32 %v4604_v10, %v4254_v45 }
 0x51a   :  { %v1243_v43 = vpack.c.bf16 %v6031_v24, %v6031_v24 }
 0x51b   :  { %1841 = vmatpush.bf16.msrb.mxu2 %v6161_v16 }
 0x51c   :  { %1245 = vst [vmem:[#allocation3 + $0x18] sm:$0xf] %v1243_v43  ;;  %1254 = vmatmul.bf16.vlgmr.msra.gmra.mxu3 %v1243_v43  ;;  %1267 = vmatmul.bf16.vlgmr.msra.gmra.mxu0 %v1243_v43 }
 0x51d   :  { %1280 = vmatmul.bf16.vlgmr.msra.gmra.mxu1 %v1243_v43  ;;  %1905 = vmatpush.bf16.msra.mxu3 %v5842_v7  ;;  %v6172_v43 = vor.u32 %v4601_v5, %v4242_v44 }
 0x51e   :  { %1827 = vmatpush.bf16.msra.mxu1 %v6035_v57  ;;  %1918 = vmatpush.bf16.msra.mxu0 %v6035_v57 }
 0x51f   :  { %1842 = vmatpush.bf16.msrb.mxu2 %v6172_v43 }
 0x521   :  { %1906 = vmatpush.bf16.msra.mxu3 %v5851_v17 }
 0x522   :  { %1828 = vmatpush.bf16.msra.mxu1 %v6045_v55  ;;  %1919 = vmatpush.bf16.msra.mxu0 %v6045_v55 }
 0x523   :  { %1843 = vmatpush.bf16.msrb.mxu2 %v6183_v39 }
 0x525   :  { %1907 = vmatpush.bf16.msra.mxu3 %v5860_v2 }
 0x526   :  { %1829 = vmatpush.bf16.msra.mxu1 %v6056_v6  ;;  %1920 = vmatpush.bf16.msra.mxu0 %v6056_v6 }
 0x527   :  { %1844 = vmatpush.bf16.msrb.mxu2 %v6196_v58 }
 0x529   :  { %1908 = vmatpush.bf16.msra.mxu3 %v5872_v38 }
 0x52a   :  { %1830 = vmatpush.bf16.msra.mxu1 %v6067_v23  ;;  %1921 = vmatpush.bf16.msra.mxu0 %v6067_v23 }
 0x52c   :  { %1576 = vmatmul.bf16.vlgmr.msrb.gmra.mxu3 %v5827_v50  ;;  %1605 = vmatmul.bf16.vlgmr.msrb.gmra.mxu0 %v5827_v50  ;;  %v6103_v50 = vor.u32 %v4587_v15, %v4188_v21 }
 0x52d   :  { %1822 = vmatmul.bf16.vlgmr.msrb.gmra.mxu1 %v7314_v35  ;;  %1909 = vmatpush.bf16.msra.mxu3 %v5893_v41 }
 0x52e   :  { %1831 = vmatpush.bf16.msra.mxu1 %v6078_v18  ;;  %1922 = vmatpush.bf16.msra.mxu0 %v6078_v18 }
 0x531   :  { %1910 = vmatpush.bf16.msra.mxu3 %v5916_v13 }
 0x532   :  { %1832 = vmatpush.bf16.msra.mxu1 %v6092_v1  ;;  %1923 = vmatpush.bf16.msra.mxu0 %v6092_v1 }
 0x535   :  { %1911 = vmatpush.bf16.msra.mxu3 %v5939_v26 }
 0x536   :  { %1833 = vmatpush.bf16.msra.mxu1 %v6103_v50  ;;  %1924 = vmatpush.bf16.msra.mxu0 %v6103_v50 }
 0x539   :  { %1912 = vmatpush.bf16.msra.mxu3 %v5961_v49 }
 0x53a   :  { %1834 = vmatpush.bf16.msra.mxu1 %v6114_v36  ;;  %1925 = vmatpush.bf16.msra.mxu0 %v6114_v36 }
 0x53c   :  { %1581 = vmatmul.bf16.gmra.mxu3 %v5830_v52  ;;  %1610 = vmatmul.bf16.gmra.mxu0 %v5830_v52  ;;  %v7315_v52 = vld [vmem:[#allocation17_spill] sm:$0xff] }
 0x53d   :  { %2010 = vmatpush.bf16.msrb.mxu3 %v6035_v57  ;;  %1835 = vmatmul.bf16.vlgmr.msra.gmra.mxu1 %v7314_v35  ;;  %v378_v14 = vadd.f32 %v7315_v52, %v5565_v32 }
 0x53e   :  { %1931 = vmatpush.bf16.msrb.mxu1 %v6149_v28  ;;  %2023 = vmatpush.bf16.msrb.mxu0 %v6149_v28 }
 0x541   :  { %2011 = vmatpush.bf16.msrb.mxu3 %v6045_v55 }
 0x542   :  { %1932 = vmatpush.bf16.msrb.mxu1 %v6161_v16  ;;  %2024 = vmatpush.bf16.msrb.mxu0 %v6161_v16 }
 0x545   :  { %2012 = vmatpush.bf16.msrb.mxu3 %v6056_v6 }
 0x546   :  { %1933 = vmatpush.bf16.msrb.mxu1 %v6172_v43  ;;  %2025 = vmatpush.bf16.msrb.mxu0 %v6172_v43 }
 0x549   :  { %2013 = vmatpush.bf16.msrb.mxu3 %v6067_v23 }
 0x54a   :  { %1934 = vmatpush.bf16.msrb.mxu1 %v6183_v39  ;;  %2026 = vmatpush.bf16.msrb.mxu0 %v6183_v39 }
 0x54c   :  { %1586 = vmatmul.bf16.gmra.mxu3 %v5833_v25  ;;  %1615 = vmatmul.bf16.gmra.mxu0 %v5833_v25 }
 0x54d   :  { %2014 = vmatpush.bf16.msrb.mxu3 %v6078_v18 }
 0x54e   :  { %1935 = vmatpush.bf16.msrb.mxu1 %v6196_v58  ;;  %2027 = vmatpush.bf16.msrb.mxu0 %v6196_v58 }
 0x551   :  { %2015 = vmatpush.bf16.msrb.mxu3 %v6092_v1 }
 0x555   :  { %2016 = vmatpush.bf16.msrb.mxu3 %v6103_v50 }
 0x559   :  { %2017 = vmatpush.bf16.msrb.mxu3 %v6114_v36 }
 0x599   :  { %v1268_v60 = vpop.f32.mrf.mxu0 }
 0x59a   :  { %v1309_v9 = vadd.f32 %v1268_v60, %v378_v14  ;;  %v6135_v47 = vpop.f32.mrf.mxu1  ;;  %v4206_v14 = vld [vmem:[%s7289_s6 + $0x38] sm:$0xf]  ;;  %v4592_v60 = vld [vmem:[%s7289_s6 + $0x40] sm:$0xf0] }
 0x59b   :  { %v1329_v48 = vadd.f32 %v6004_v20, %v6135_v47  ;;  %v4589_v20 = vld [vmem:[%s7289_s6 + $0x28] sm:$0xf0] }
 0x59c   :  { %v4059_v53 = vmul.f32 -1.442695, %v1309_v9 }
 0x59e   :  { %4742 = vpow2.f32 %v4059_v53 }
 0x59f   :  { %v1255_v8 = vpop.f32.mrf.mxu3 }
 0x5a0   :  { %v1289_v29 = vadd.f32 %v1255_v8, %v349_v46 }
 0x5a1   :  { %v1270_v25 = vpop.f32.mrf.mxu0 }
 0x5a2   :  { %v4058_v4 = vmul.f32 -1.442695, %v1289_v29  ;;  %v1283_v3 = vpop.f32.mrf.mxu1  ;;  %v6211_v29 = vor.u32 %v4592_v60, %v4206_v14  ;;  %v7317_v25 = vld [vmem:[#allocation18_spill] sm:$0xff]  ;;  %v6289_v60 = vperm.slane %v1379_v0, 1 }
 0x5a4   :  { %4744 = vpow2.f32 %v4058_v4  ;;  %v4743_v22 = vpop.eup %4742  ;;  %v407_v4 = vadd.f32 %v7317_v25, %v5578_v63  ;;  %1845 = vmatpush.bf16.msrb.mxu2 %v6211_v29  ;;  %1936 = vmatpush.bf16.msrb.mxu1 %v6211_v29  ;;  %v4182_v63 = vld [vmem:[%s7289_s6 + $0x8] sm:$0xf] }
 0x5a5   :  { %v6139_v34 = vadd.f32 1.0, %v4743_v22  ;;  %v4194_v22 = vld [vmem:[%s7289_s6 + $0x20] sm:$0xf]  ;;  %2028 = vmatpush.bf16.msrb.mxu0 %v6211_v29 }
 0x5a7   :  { %v1257_v37 = vpop.f32.mrf.mxu3  ;;  %v1325_v45 = vand.u32 2147483648, %v6139_v34  ;;  %vm1319_vm2 = vweird.f32 %v6139_v34  ;;  %v1323_v10 = vand.u32 2147483647, %v6139_v34 }
 0x5a9   :  { %vm1324_vm4 = vcmp.eq.f32.partialorder %v1323_v10, 8.507059e+37 }
 0x5aa   :  { %v4745_v40 = vpop.eup %4744  ;;  %v6141_v32 = vpop.f32.mrf.mxu1 }
 0x5ab   :  { %v1293_v56 = vadd.f32 1.0, %v4745_v40  ;;  %v6225_v40 = vor.u32 %v4589_v20, %v4194_v22 }
 0x5ad   :  { %4746 = vrcp.f32 %v1293_v56  ;;  %v1305_v12 = vand.u32 2147483648, %v1293_v56  ;;  %v1303_v21 = vand.u32 2147483647, %v1293_v56  ;;  %vm1299_vm13 = vweird.f32 %v1293_v56  ;;  %1846 = vmatpush.bf16.msrb.mxu2 %v6225_v40  ;;  %1937 = vmatpush.bf16.msrb.mxu1 %v6225_v40 }
 0x5ae   :  { %4748 = vrcp.f32 %v6139_v34  ;;  %2029 = vmatpush.bf16.msrb.mxu0 %v6225_v40 }
 0x5af   :  { %v1306_v53 = vor.u32 1.1754944e-38, %v1305_v12  ;;  %vm1304_vm15 = vcmp.eq.f32.partialorder %v1303_v21, 8.507059e+37 }
 0x5b2   :  { %v1825_v33 = vpop.f32.mrf.mxu1 }
 0x5b3   :  { %v4747_v42 = vpop.eup %4746  ;;  %v6241_v33 = vor.u32 %v4586_v11, %v4182_v63 }
 0x5b4   :  { %v6180_v27 = vpop.eup %4748  ;;  %v1295_v59 = vmul.f32 %v4747_v42, %v1293_v56  ;;  %vm1300_vm12 = vweird.f32 %v4747_v42 }
 0x5b5   :  { %v1315_v62 = vmul.f32 %v6180_v27, %v6139_v34  ;;  %vm1301_vm14 = vmor %vm1299_vm13, %vm1300_vm12  ;;  %vm1320_vm1 = vweird.f32 %v6180_v27  ;;  %1847 = vmatpush.bf16.msrb.mxu2 %v6241_v33  ;;  %1938 = vmatpush.bf16.msrb.mxu1 %v6241_v33 }
 0x5b6   :  { %v1296_v54 = vsub.f32 1.0, %v1295_v59  ;;  %vm1321_vm3 = vmor %vm1319_vm2, %vm1320_vm1  ;;  %2030 = vmatpush.bf16.msrb.mxu0 %v6241_v33 }
 0x5b7   :  { %v1316_v9 = vsub.f32 1.0, %v1315_v62  ;;  %v6281_v62 = vperm.slane %v1379_v0, 0 }
 0x5b8   :  { %v1297_v15 = vmul.f32 %v4747_v42, %v1296_v54  ;;  %v1548_v54 = vpop.f32.mrf.mxu2 }
 0x5b9   :  { %v1317_v47 = vmul.f32 %v6180_v27, %v1316_v9  ;;  %1997 = vmatpush.bf16.msra.mxu2 %v5842_v7  ;;  %2089 = vmatpush.bf16.msra.mxu1 %v5842_v7  ;;  %v1577_v9 = vpop.f32.mrf.mxu3 }
 0x5ba   :  { %v1298_v61 = vadd.f32 %v4747_v42, %v1297_v15  ;;  %v6199_v52 = vpop.f32.mrf.mxu1  ;;  %v1549_v15 = vadd.f32 %v1548_v54, %v6281_v62 }
 0x5bb   :  { %v1318_v56 = vadd.f32 %v6180_v27, %v1317_v47 }
 0x5bc   :  { %v1302_v46 = vsel %vm1301_vm14, %v4747_v42, %v1298_v61  ;;  %v1326_v42 = vor.u32 1.1754944e-38, %v1325_v45  ;;  %v1856_v21 = vadd.f32 %v6141_v32, %v1549_v15 }
 0x5bd   :  { %v1307_v8 = vsel %vm1304_vm15, %v1306_v53, %v1302_v46  ;;  %v1322_v44 = vsel %vm1321_vm3, %v6180_v27, %v1318_v56  ;;  %1998 = vmatpush.bf16.msra.mxu2 %v5851_v17  ;;  %2090 = vmatpush.bf16.msra.mxu1 %v5851_v17  ;;  %v1578_v53 = vadd.f32 %v1577_v9, %v6289_v60 }
 0x5be   :  { %v1330_v3 = vmul.f32 %v1329_v48, %v1307_v8  ;;  %v1327_v34 = vsel %vm1324_vm4, %v1326_v42, %v1322_v44  ;;  %v4268_v14 = vmul.f32 -1.442695, %v1856_v21  ;;  %v6304_v44 = vld [vmem:[%s7291_s8] ss:$0 sm:$0xff]  ;;  %v6306_v42 = vperm.slane %v1379_v0, 2 }
 0x5bf   :  { %v1876_v8 = vadd.f32 %v6199_v52, %v1578_v53 }
 0x5c0   :  { %v1331_v37 = vadd.f32 %v1330_v3, %v407_v4  ;;  %v6276_v31 = vpop.f32.mrf.mxu2 }
 0x5c1   :  { %1999 = vmatpush.bf16.msra.mxu2 %v5860_v2  ;;  %2091 = vmatpush.bf16.msra.mxu1 %v5860_v2  ;;  %v4269_v4 = vmul.f32 -1.442695, %v1876_v8 }
 0x5c2   :  { %4750 = vtanh.f32 %v1331_v37  ;;  %v1838_v19 = vpop.f32.mrf.mxu1 }
 0x5c3   :  { %4752 = vpow2.f32 %v4268_v14 }
 0x5c5   :  { %2000 = vmatpush.bf16.msra.mxu2 %v5872_v38  ;;  %2092 = vmatpush.bf16.msra.mxu1 %v5872_v38 }
 0x5c8   :  { %v4751_v5 = vpop.eup %4750  ;;  %v6283_v12 = vpop.f32.mrf.mxu2 }
 0x5c9   :  { %v1333_v30 = vsub.f32 %v6031_v24, %v4751_v5  ;;  %2001 = vmatpush.bf16.msra.mxu2 %v5893_v41  ;;  %2093 = vmatpush.bf16.msra.mxu1 %v5893_v41  ;;  %v4753_v48 = vpop.eup %4752 }
 0x5ca   :  { %v1860_v25 = vadd.f32 1.0, %v4753_v48 }
 0x5cb   :  { %v1334_v51 = vmul.f32 %v1333_v30, %v1327_v34  ;;  %v1606_v34 = vpop.f32.mrf.mxu0 }
 0x5cc   :  { %4754 = vrcp.f32 %v1860_v25  ;;  %v1872_v10 = vand.u32 2147483648, %v1860_v25  ;;  %vm1866_vm7 = vweird.f32 %v1860_v25  ;;  %v1607_v15 = vadd.f32 %v1606_v34, %v6306_v42 }
 0x5cd   :  { %v1335_v59 = vadd.f32 %v4751_v5, %v1334_v51  ;;  %2002 = vmatpush.bf16.msra.mxu2 %v5916_v13  ;;  %2094 = vmatpush.bf16.msra.mxu1 %v5916_v13  ;;  %4756 = vpow2.f32 %v4269_v4  ;;  %v1870_v5 = vand.u32 2147483647, %v1860_v25 }
 0x5cf   :  { %v1336_v27 = vpack.c.bf16 %v1335_v59, %v1335_v59  ;;  %3811 = vst.msk [vmem:[#allocation8] sm:$0x3] %vm3810_vm5, %v1335_v59  ;;  %vm1871_vm9 = vcmp.eq.f32.partialorder %v1870_v5, 8.507059e+37 }
 0x5d0   :  { %v6287_v61 = vpop.f32.mrf.mxu2 }
 0x5d1   :  { %1338 = vst [vmem:[#allocation3 + $0x1c] sm:$0xf] %v1336_v27  ;;  %2003 = vmatpush.bf16.msra.mxu2 %v5939_v26  ;;  %2095 = vmatpush.bf16.msra.mxu1 %v5939_v26  ;;  %v1873_v27 = vor.u32 1.1754944e-38, %v1872_v10 }
 0x5d2   :  { %v4755_v32 = vpop.eup %4754 }
 0x5d3   :  { %v4757_v22 = vpop.eup %4756  ;;  %v1862_v47 = vmul.f32 %v4755_v32, %v1860_v25  ;;  %vm1867_vm6 = vweird.f32 %v4755_v32 }
 0x5d4   :  { %v1880_v20 = vadd.f32 1.0, %v4757_v22  ;;  %vm1868_vm8 = vmor %vm1866_vm7, %vm1867_vm6 }
 0x5d5   :  { %2004 = vmatpush.bf16.msra.mxu2 %v5961_v49  ;;  %2096 = vmatpush.bf16.msra.mxu1 %v5961_v49  ;;  %v1863_v63 = vsub.f32 1.0, %v1862_v47 }
 0x5d6   :  { %4758 = vrcp.f32 %v1880_v20  ;;  %v1892_v0 = vand.u32 2147483648, %v1880_v20  ;;  %vm1886_vm11 = vweird.f32 %v1880_v20  ;;  %v1890_v8 = vand.u32 2147483647, %v1880_v20 }
 0x5d7   :  { %v1864_v11 = vmul.f32 %v4755_v32, %v1863_v63 }
 0x5d8   :  { %v4559_v24 = vld [vmem:[#allocation3 + $0x18] sm:$0xff]  ;;  %v6292_v46 = vpop.f32.mrf.mxu2  ;;  %vm1891_vm13 = vcmp.eq.f32.partialorder %v1890_v8, 8.507059e+37  ;;  %v1551_v8 = vadd.f32 %v6276_v31, %v6281_v62 }
 0x5d9   :  { %1562 = vmatmul.bf16.gmra.mxu2 %v4559_v24  ;;  %1591 = vmatmul.bf16.gmra.mxu3 %v4559_v24  ;;  %v1865_v45 = vadd.f32 %v4755_v32, %v1864_v11 }
 0x5da   :  { %1620 = vmatmul.bf16.gmra.mxu0 %v4559_v24 }
 0x5db   :  { %v1869_v30 = vsel %vm1868_vm8, %v4755_v32, %v1865_v45  ;;  %v1893_v32 = vor.u32 1.1754944e-38, %v1892_v0 }
 0x5dc   :  { %v4759_v56 = vpop.eup %4758  ;;  %v1874_v54 = vsel %vm1871_vm9, %v1873_v27, %v1869_v30 }
 0x5dd   :  { %v1882_v52 = vmul.f32 %v4759_v56, %v1880_v20  ;;  %vm1887_vm10 = vweird.f32 %v4759_v56  ;;  %v1608_v20 = vpop.f32.mrf.mxu0 }
 0x5de   :  { %vm1888_vm12 = vmor %vm1886_vm11, %vm1887_vm10 }
 0x5df   :  { %v1883_v51 = vsub.f32 1.0, %v1882_v52 }
 0x5e0   :  { %v6295_v3 = vpop.f32.mrf.mxu2 }
 0x5e1   :  { %v1884_v14 = vmul.f32 %v4759_v56, %v1883_v51 }
 0x5e3   :  { %v1885_v48 = vadd.f32 %v4759_v56, %v1884_v14 }
 0x5e5   :  { %v1889_v25 = vsel %vm1888_vm12, %v4759_v56, %v1885_v48  ;;  %v1579_v56 = vpop.f32.mrf.mxu3  ;;  %v6338_v52 = vpop.f32.mrf.mxu0 }
 0x5e6   :  { %v1894_v47 = vsel %vm1891_vm13, %v1893_v32, %v1889_v25  ;;  %v1580_v14 = vadd.f32 %v1579_v56, %v6289_v60 }
 0x5e9   :  { %1848 = vmatmul.bf16.vlgmr.msrb.gmra.mxu2 %v7314_v35 }
 0x5ea   :  { %2102 = vmatpush.bf16.msrb.mxu2 %v6035_v57 }
 0x5ed   :  { %v6340_v10 = vpop.f32.mrf.mxu3  ;;  %v6342_v5 = vpop.f32.mrf.mxu0 }
 0x5ee   :  { %2103 = vmatpush.bf16.msrb.mxu2 %v6045_v55 }
 0x5f2   :  { %2104 = vmatpush.bf16.msrb.mxu2 %v6056_v6 }
 0x5f5   :  { %v6344_v30 = vpop.f32.mrf.mxu3  ;;  %v6346_v34 = vpop.f32.mrf.mxu0 }
 0x5f6   :  { %2105 = vmatpush.bf16.msrb.mxu2 %v6067_v23 }
 0x5fa   :  { %2106 = vmatpush.bf16.msrb.mxu2 %v6078_v18 }
 0x5fd   :  { %v6348_v51 = vpop.f32.mrf.mxu3 }
 0x5fe   :  { %2107 = vmatpush.bf16.msrb.mxu2 %v6092_v1 }
 0x602   :  { %2108 = vmatpush.bf16.msrb.mxu2 %v6103_v50 }
 0x605   :  { %v6352_v27 = vpop.f32.mrf.mxu3 }
 0x606   :  { %2109 = vmatpush.bf16.msrb.mxu2 %v6114_v36 }
 0x65c   :  { %v6297_v37 = vpop.f32.mrf.mxu2 }
 0x664   :  { %v6299_v19 = vpop.f32.mrf.mxu2 }
 0x665   :  { %7318 = vst [vmem:[#allocation14_spill] sm:$0xff] %v6299_v19 }
 0x66c   :  { %v1849_v59 = vpop.f32.mrf.mxu2 }
 0x66d   :  { %v1896_v24 = vadd.f32 %v6304_v44, %v1849_v59  ;;  %v6350_v59 = vpop.f32.mrf.mxu0 }
 0x66f   :  { %v1897_v21 = vmul.f32 %v1896_v24, %v1874_v54  ;;  %v6356_v54 = vpop.f32.mrf.mxu3 }
 0x670   :  { %7320 = vst [vmem:[#allocation17_spill] sm:$0xff] %v6356_v54 }
 0x671   :  { %v1898_v9 = vadd.f32 %v1897_v21, %v1607_v15 }
 0x673   :  { %4760 = vtanh.f32 %v1898_v9 }
 0x674   :  { %v1851_v53 = vpop.f32.mrf.mxu2 }
 0x675   :  { %v6354_v24 = vpop.f32.mrf.mxu0 }
 0x676   :  { %7319 = vst [vmem:[#allocation16_spill] sm:$0xff] %v6354_v24 }
 0x677   :  { %v6360_v21 = vpop.f32.mrf.mxu3 }
 0x678   :  { %7322 = vst [vmem:[#allocation18_spill] sm:$0xff] %v6360_v21 }
 0x679   :  { %v4761_v4 = vpop.eup %4760 }
 0x67a   :  { %v1900_v22 = vsub.f32 0.0, %v4761_v4 }
 0x67c   :  { %v1901_v63 = vmul.f32 %v1900_v22, %v1894_v47 }
 0x67d   :  { %v6358_v15 = vpop.f32.mrf.mxu0 }
 0x67e   :  { %v6310_v11 = vadd.f32 %v4761_v4, %v1901_v63  ;;  %7321 = vst [vmem:[#allocation15_spill] sm:$0xff] %v6358_v15 }
 0x680   :  { %v1903_v45 = vpack.c.bf16 %v6310_v11, %v6310_v11 }
 0x682   :  { %1904 = vst [vmem:[#allocation4] sm:$0xf] %v1903_v45  ;;  %1913 = vmatmul.bf16.vlgmr.msra.gmra.mxu3 %v1903_v45  ;;  %1926 = vmatmul.bf16.vlgmr.msra.gmra.mxu0 %v1903_v45 }
 0x683   :  { %1939 = vmatmul.bf16.vlgmr.msrb.gmra.mxu1 %v1903_v45  ;;  %2115 = vmatpush.bf16.msra.mxu3 %v6149_v28 }
 0x684   :  { %2181 = vmatpush.bf16.msra.mxu0 %v5842_v7  ;;  %2194 = vmatpush.bf16.msrb.mxu1 %v6035_v57 }
 0x687   :  { %2116 = vmatpush.bf16.msra.mxu3 %v6161_v16 }
 0x688   :  { %2182 = vmatpush.bf16.msra.mxu0 %v5851_v17  ;;  %2195 = vmatpush.bf16.msrb.mxu1 %v6045_v55 }
 0x68b   :  { %2117 = vmatpush.bf16.msra.mxu3 %v6172_v43 }
 0x68c   :  { %2183 = vmatpush.bf16.msra.mxu0 %v5860_v2  ;;  %2196 = vmatpush.bf16.msrb.mxu1 %v6056_v6 }
 0x68f   :  { %2118 = vmatpush.bf16.msra.mxu3 %v6183_v39 }
 0x690   :  { %2184 = vmatpush.bf16.msra.mxu0 %v5872_v38  ;;  %2197 = vmatpush.bf16.msrb.mxu1 %v6067_v23 }
 0x693   :  { %2119 = vmatpush.bf16.msra.mxu3 %v6196_v58 }
 0x694   :  { %2185 = vmatpush.bf16.msra.mxu0 %v5893_v41  ;;  %2198 = vmatpush.bf16.msrb.mxu1 %v6078_v18 }
 0x697   :  { %2120 = vmatpush.bf16.msra.mxu3 %v6211_v29 }
 0x698   :  { %2186 = vmatpush.bf16.msra.mxu0 %v5916_v13  ;;  %2199 = vmatpush.bf16.msrb.mxu1 %v6092_v1 }
 0x69b   :  { %2121 = vmatpush.bf16.msra.mxu3 %v6225_v40 }
 0x69c   :  { %2187 = vmatpush.bf16.msra.mxu0 %v5939_v26  ;;  %2200 = vmatpush.bf16.msrb.mxu1 %v6103_v50 }
 0x69f   :  { %2122 = vmatpush.bf16.msra.mxu3 %v6241_v33 }
 0x6a0   :  { %2188 = vmatpush.bf16.msra.mxu0 %v5961_v49  ;;  %2201 = vmatpush.bf16.msrb.mxu1 %v6114_v36 }
 0x6ff   :  { %v1927_v9 = vpop.f32.mrf.mxu0 }
 0x700   :  { %v1967_v53 = vadd.f32 %v1927_v9, %v1580_v14  ;;  %v1940_v48 = vpop.f32.mrf.mxu1 }
 0x702   :  { %v4271_v0 = vmul.f32 -1.442695, %v1967_v53 }
 0x704   :  { %4762 = vpow2.f32 %v4271_v0 }
 0x705   :  { %v1914_v25 = vpop.f32.mrf.mxu3 }
 0x706   :  { %v1947_v4 = vadd.f32 %v1914_v25, %v1551_v8 }
 0x707   :  { %v1929_v32 = vpop.f32.mrf.mxu0 }
 0x708   :  { %v4270_v22 = vmul.f32 -1.442695, %v1947_v4  ;;  %v1942_v47 = vpop.f32.mrf.mxu1  ;;  %v1987_v32 = vadd.f32 %v6304_v44, %v1940_v48 }
 0x709   :  { %v1609_v47 = vadd.f32 %v1608_v20, %v6306_v42 }
 0x70a   :  { %4764 = vpow2.f32 %v4270_v22  ;;  %v4763_v63 = vpop.eup %4762 }
 0x70b   :  { %v1971_v21 = vadd.f32 1.0, %v4763_v63 }
 0x70d   :  { %v1916_v45 = vpop.f32.mrf.mxu3  ;;  %vm1977_vm4 = vweird.f32 %v1971_v21 }
 0x710   :  { %v4765_v15 = vpop.eup %4764 }
 0x711   :  { %v1951_v19 = vadd.f32 1.0, %v4765_v15 }
 0x713   :  { %4766 = vrcp.f32 %v1951_v19  ;;  %v1963_v31 = vand.u32 2147483648, %v1951_v19  ;;  %v1961_v0 = vand.u32 2147483647, %v1951_v19  ;;  %vm1957_vm15 = vweird.f32 %v1951_v19 }
 0x714   :  { %4768 = vrcp.f32 %v1971_v21 }
 0x715   :  { %v1964_v4 = vor.u32 1.1754944e-38, %v1963_v31  ;;  %vm1962_vm2 = vcmp.eq.f32.partialorder %v1961_v0, 8.507059e+37 }
 0x719   :  { %v4767_v56 = vpop.eup %4766 }
 0x71a   :  { %v4769_v14 = vpop.eup %4768  ;;  %v1953_v9 = vmul.f32 %v4767_v56, %v1951_v19  ;;  %vm1958_vm14 = vweird.f32 %v4767_v56 }
 0x71b   :  { %v1973_v35 = vmul.f32 %v4769_v14, %v1971_v21  ;;  %vm1959_vm1 = vmor %vm1957_vm15, %vm1958_vm14  ;;  %vm1978_vm3 = vweird.f32 %v4769_v14 }
 0x71c   :  { %v1954_v53 = vsub.f32 1.0, %v1953_v9  ;;  %vm1979_vm6 = vmor %vm1977_vm4, %vm1978_vm3 }
 0x71d   :  { %v1974_v25 = vsub.f32 1.0, %v1973_v35 }
 0x71e   :  { %v1955_v24 = vmul.f32 %v4767_v56, %v1954_v53  ;;  %v1983_v53 = vand.u32 2147483648, %v1971_v21 }
 0x71f   :  { %v1975_v45 = vmul.f32 %v4769_v14, %v1974_v25 }
 0x720   :  { %v1956_v8 = vadd.f32 %v4767_v56, %v1955_v24  ;;  %v1981_v24 = vand.u32 2147483647, %v1971_v21  ;;  %v1984_v31 = vor.u32 1.1754944e-38, %v1983_v53  ;;  %v1583_v21 = vadd.f32 %v6340_v10, %v6289_v60 }
 0x721   :  { %v1976_v54 = vadd.f32 %v4769_v14, %v1975_v45 }
 0x722   :  { %v1960_v22 = vsel %vm1959_vm1, %v4767_v56, %v1956_v8  ;;  %vm1982_vm7 = vcmp.eq.f32.partialorder %v1981_v24, 8.507059e+37 }
 0x723   :  { %v1965_v15 = vsel %vm1962_vm2, %v1964_v4, %v1960_v22  ;;  %v1980_v35 = vsel %vm1979_vm6, %v4769_v14, %v1976_v54  ;;  %v1554_v54 = vadd.f32 %v6283_v12, %v6281_v62 }
 0x724   :  { %v1988_v63 = vmul.f32 %v1987_v32, %v1965_v15  ;;  %v1985_v56 = vsel %vm1982_vm7, %v1984_v31, %v1980_v35 }
 0x726   :  { %v1989_v9 = vadd.f32 %v1988_v63, %v1609_v47 }
 0x728   :  { %4770 = vtanh.f32 %v1989_v9 }
 0x72e   :  { %v4771_v19 = vpop.eup %4770 }
 0x72f   :  { %v1991_v48 = vsub.f32 %v6310_v11, %v4771_v19 }
 0x731   :  { %v1992_v0 = vmul.f32 %v1991_v48, %v1985_v56 }
 0x733   :  { %v6368_v8 = vadd.f32 %v4771_v19, %v1992_v0 }
 0x735   :  { %v1994_v20 = vpack.c.bf16 %v6368_v8, %v6368_v8 }
 0x737   :  { %1996 = vst [vmem:[#allocation4 + $0x4] sm:$0xf] %v1994_v20  ;;  %2005 = vmatmul.bf16.vlgmr.msra.gmra.mxu2 %v1994_v20  ;;  %2018 = vmatmul.bf16.vlgmr.msrb.gmra.mxu3 %v1994_v20 }
 0x738   :  { %2031 = vmatmul.bf16.vlgmr.msrb.gmra.mxu0 %v1994_v20  ;;  %2207 = vmatpush.bf16.msra.mxu2 %v6149_v28 }
 0x739   :  { %2273 = vmatpush.bf16.msrb.mxu3 %v5842_v7  ;;  %2286 = vmatpush.bf16.msrb.mxu0 %v6035_v57 }
 0x73c   :  { %2208 = vmatpush.bf16.msra.mxu2 %v6161_v16 }
 0x73d   :  { %2274 = vmatpush.bf16.msrb.mxu3 %v5851_v17  ;;  %2287 = vmatpush.bf16.msrb.mxu0 %v6045_v55 }
 0x740   :  { %2209 = vmatpush.bf16.msra.mxu2 %v6172_v43 }
 0x741   :  { %2275 = vmatpush.bf16.msrb.mxu3 %v5860_v2  ;;  %2288 = vmatpush.bf16.msrb.mxu0 %v6056_v6 }
 0x744   :  { %2210 = vmatpush.bf16.msra.mxu2 %v6183_v39 }
 0x745   :  { %2276 = vmatpush.bf16.msrb.mxu3 %v5872_v38  ;;  %2289 = vmatpush.bf16.msrb.mxu0 %v6067_v23 }
 0x748   :  { %2211 = vmatpush.bf16.msra.mxu2 %v6196_v58 }
 0x749   :  { %2277 = vmatpush.bf16.msrb.mxu3 %v5893_v41  ;;  %2290 = vmatpush.bf16.msrb.mxu0 %v6078_v18 }
 0x74c   :  { %2212 = vmatpush.bf16.msra.mxu2 %v6211_v29 }
 0x74d   :  { %2278 = vmatpush.bf16.msrb.mxu3 %v5916_v13  ;;  %2291 = vmatpush.bf16.msrb.mxu0 %v6092_v1 }
 0x750   :  { %2213 = vmatpush.bf16.msra.mxu2 %v6225_v40 }
 0x751   :  { %2279 = vmatpush.bf16.msrb.mxu3 %v5939_v26  ;;  %2292 = vmatpush.bf16.msrb.mxu0 %v6103_v50 }
 0x754   :  { %2214 = vmatpush.bf16.msra.mxu2 %v6241_v33 }
 0x755   :  { %2280 = vmatpush.bf16.msrb.mxu3 %v5961_v49  ;;  %2293 = vmatpush.bf16.msrb.mxu0 %v6114_v36 }
 0x7b5   :  { %v2032_v11 = vpop.f32.mrf.mxu0 }
 0x7ba   :  { %v2006_v14 = vpop.f32.mrf.mxu2  ;;  %v2019_v25 = vpop.f32.mrf.mxu3 }
 0x7bb   :  { %v2039_v4 = vadd.f32 %v2006_v14, %v1554_v54  ;;  %v2059_v32 = vadd.f32 %v2019_v25, %v1583_v21  ;;  %v2079_v25 = vadd.f32 %v6304_v44, %v2032_v11 }
 0x7bd   :  { %v4272_v22 = vmul.f32 -1.442695, %v2039_v4  ;;  %v4273_v15 = vmul.f32 -1.442695, %v2059_v32  ;;  %v2034_v47 = vpop.f32.mrf.mxu0 }
 0x7bf   :  { %4772 = vpow2.f32 %v4272_v22  ;;  %v1612_v22 = vadd.f32 %v6338_v52, %v6306_v42 }
 0x7c0   :  { %4774 = vpow2.f32 %v4273_v15 }
 0x7c2   :  { %v2008_v63 = vpop.f32.mrf.mxu2  ;;  %v2021_v45 = vpop.f32.mrf.mxu3 }
 0x7c5   :  { %v4773_v9 = vpop.eup %4772 }
 0x7c6   :  { %v4775_v53 = vpop.eup %4774  ;;  %v2043_v24 = vadd.f32 1.0, %v4773_v9 }
 0x7c7   :  { %v2063_v35 = vadd.f32 1.0, %v4775_v53 }
 0x7c8   :  { %4776 = vrcp.f32 %v2043_v24  ;;  %v2055_v48 = vand.u32 2147483648, %v2043_v24  ;;  %v2053_v20 = vand.u32 2147483647, %v2043_v24  ;;  %vm2049_vm9 = vweird.f32 %v2043_v24 }
 0x7c9   :  { %4778 = vrcp.f32 %v2063_v35  ;;  %v2075_v9 = vand.u32 2147483648, %v2063_v35  ;;  %vm2069_vm13 = vweird.f32 %v2063_v35  ;;  %v2073_v53 = vand.u32 2147483647, %v2063_v35 }
 0x7ca   :  { %v2056_v21 = vor.u32 1.1754944e-38, %v2055_v48  ;;  %vm2054_vm11 = vcmp.eq.f32.partialorder %v2053_v20, 8.507059e+37  ;;  %v1585_v20 = vadd.f32 %v6344_v30, %v6289_v60 }
 0x7cb   :  { %vm2074_vm15 = vcmp.eq.f32.partialorder %v2073_v53, 8.507059e+37 }
 0x7ce   :  { %v4777_v12 = vpop.eup %4776 }
 0x7cf   :  { %v4779_v19 = vpop.eup %4778  ;;  %v2045_v10 = vmul.f32 %v4777_v12, %v2043_v24  ;;  %vm2050_vm8 = vweird.f32 %v4777_v12 }
 0x7d0   :  { %v2065_v56 = vmul.f32 %v4779_v19, %v2063_v35  ;;  %vm2051_vm10 = vmor %vm2049_vm9, %vm2050_vm8  ;;  %vm2070_vm12 = vweird.f32 %v4779_v19 }
 0x7d1   :  { %v2046_v31 = vsub.f32 1.0, %v2045_v10  ;;  %vm2071_vm14 = vmor %vm2069_vm13, %vm2070_vm12 }
 0x7d2   :  { %v2066_v14 = vsub.f32 1.0, %v2065_v56 }
 0x7d3   :  { %v2047_v0 = vmul.f32 %v4777_v12, %v2046_v31  ;;  %v2076_v31 = vor.u32 1.1754944e-38, %v2075_v9 }
 0x7d4   :  { %v2067_v47 = vmul.f32 %v4779_v19, %v2066_v14 }
 0x7d5   :  { %v2048_v54 = vadd.f32 %v4777_v12, %v2047_v0 }
 0x7d6   :  { %v2068_v45 = vadd.f32 %v4779_v19, %v2067_v47 }
 0x7d7   :  { %v2052_v4 = vsel %vm2051_vm10, %v4777_v12, %v2048_v54 }
 0x7d8   :  { %v2057_v32 = vsel %vm2054_vm11, %v2056_v21, %v2052_v4  ;;  %v2072_v24 = vsel %vm2071_vm14, %v4779_v19, %v2068_v45 }
 0x7d9   :  { %v2080_v15 = vmul.f32 %v2079_v25, %v2057_v32  ;;  %v2077_v12 = vsel %vm2074_vm15, %v2076_v31, %v2072_v24 }
 0x7db   :  { %v2081_v63 = vadd.f32 %v2080_v15, %v1612_v22 }
 0x7dd   :  { %4780 = vtanh.f32 %v2081_v63 }
 0x7e3   :  { %v4781_v10 = vpop.eup %4780 }
 0x7e4   :  { %v2083_v11 = vsub.f32 %v6368_v8, %v4781_v10  ;;  %v1556_v8 = vadd.f32 %v6287_v61, %v6281_v62 }
 0x7e6   :  { %v2084_v48 = vmul.f32 %v2083_v11, %v2077_v12 }
 0x7e8   :  { %v6404_v56 = vadd.f32 %v4781_v10, %v2084_v48 }
 0x7ea   :  { %v2086_v52 = vpack.c.bf16 %v6404_v56, %v6404_v56 }
 0x7ec   :  { %2088 = vst [vmem:[#allocation4 + $0x8] sm:$0xf] %v2086_v52  ;;  %2097 = vmatmul.bf16.vlgmr.msra.gmra.mxu1 %v2086_v52  ;;  %2110 = vmatmul.bf16.vlgmr.msrb.gmra.mxu2 %v2086_v52 }
 0x7ed   :  { %2123 = vmatmul.bf16.vlgmr.msra.gmra.mxu3 %v2086_v52  ;;  %2299 = vmatpush.bf16.msra.mxu1 %v6149_v28 }
 0x7ee   :  { %2365 = vmatpush.bf16.msrb.mxu2 %v5842_v7  ;;  %2378 = vmatpush.bf16.msra.mxu3 %v6035_v57 }
 0x7f1   :  { %2300 = vmatpush.bf16.msra.mxu1 %v6161_v16 }
 0x7f2   :  { %2366 = vmatpush.bf16.msrb.mxu2 %v5851_v17  ;;  %2379 = vmatpush.bf16.msra.mxu3 %v6045_v55 }
 0x7f5   :  { %2301 = vmatpush.bf16.msra.mxu1 %v6172_v43 }
 0x7f6   :  { %2367 = vmatpush.bf16.msrb.mxu2 %v5860_v2  ;;  %2380 = vmatpush.bf16.msra.mxu3 %v6056_v6 }
 0x7f9   :  { %2302 = vmatpush.bf16.msra.mxu1 %v6183_v39 }
 0x7fa   :  { %2368 = vmatpush.bf16.msrb.mxu2 %v5872_v38  ;;  %2381 = vmatpush.bf16.msra.mxu3 %v6067_v23 }
 0x7fd   :  { %2303 = vmatpush.bf16.msra.mxu1 %v6196_v58 }
 0x7fe   :  { %2369 = vmatpush.bf16.msrb.mxu2 %v5893_v41  ;;  %2382 = vmatpush.bf16.msra.mxu3 %v6078_v18 }
 0x801   :  { %2304 = vmatpush.bf16.msra.mxu1 %v6211_v29 }
 0x802   :  { %2370 = vmatpush.bf16.msrb.mxu2 %v5916_v13  ;;  %2383 = vmatpush.bf16.msra.mxu3 %v6092_v1 }
 0x805   :  { %2305 = vmatpush.bf16.msra.mxu1 %v6225_v40 }
 0x806   :  { %2371 = vmatpush.bf16.msrb.mxu2 %v5939_v26  ;;  %2384 = vmatpush.bf16.msra.mxu3 %v6103_v50 }
 0x809   :  { %2306 = vmatpush.bf16.msra.mxu1 %v6241_v33 }
 0x80a   :  { %2372 = vmatpush.bf16.msrb.mxu2 %v5961_v49  ;;  %2385 = vmatpush.bf16.msra.mxu3 %v6114_v36 }
 0x869   :  { %v2098_v35 = vpop.f32.mrf.mxu1 }
 0x86a   :  { %v2131_v19 = vadd.f32 %v2098_v35, %v1556_v8 }
 0x86c   :  { %v4274_v0 = vmul.f32 -1.442695, %v2131_v19 }
 0x86e   :  { %4782 = vpow2.f32 %v4274_v0  ;;  %v1614_v0 = vadd.f32 %v6342_v5, %v6306_v42 }
 0x86f   :  { %v2111_v54 = vpop.f32.mrf.mxu2 }
 0x870   :  { %v2151_v21 = vadd.f32 %v2111_v54, %v1585_v20  ;;  %v2124_v14 = vpop.f32.mrf.mxu3 }
 0x871   :  { %v2100_v25 = vpop.f32.mrf.mxu1  ;;  %v2171_v35 = vadd.f32 %v6304_v44, %v2124_v14 }
 0x872   :  { %v4275_v4 = vmul.f32 -1.442695, %v2151_v21 }
 0x874   :  { %v4783_v32 = vpop.eup %4782  ;;  %4784 = vpow2.f32 %v4275_v4 }
 0x875   :  { %v2135_v22 = vadd.f32 1.0, %v4783_v32 }
 0x877   :  { %4786 = vrcp.f32 %v2135_v22  ;;  %v2113_v15 = vpop.f32.mrf.mxu2  ;;  %v2147_v24 = vand.u32 2147483648, %v2135_v22  ;;  %v2145_v10 = vand.u32 2147483647, %v2135_v22  ;;  %vm2141_vm2 = vweird.f32 %v2135_v22 }
 0x878   :  { %v2126_v47 = vpop.f32.mrf.mxu3 }
 0x879   :  { %v2148_v48 = vor.u32 1.1754944e-38, %v2147_v24  ;;  %vm2146_vm4 = vcmp.eq.f32.partialorder %v2145_v10, 8.507059e+37 }
 0x87a   :  { %v4785_v63 = vpop.eup %4784 }
 0x87b   :  { %v2155_v61 = vadd.f32 1.0, %v4785_v63 }
 0x87d   :  { %v4787_v45 = vpop.eup %4786  ;;  %4788 = vrcp.f32 %v2155_v61  ;;  %v2167_v4 = vand.u32 2147483648, %v2155_v61  ;;  %vm2161_vm7 = vweird.f32 %v2155_v61  ;;  %v2165_v32 = vand.u32 2147483647, %v2155_v61 }
 0x87e   :  { %v2137_v9 = vmul.f32 %v4787_v45, %v2135_v22  ;;  %vm2142_vm1 = vweird.f32 %v4787_v45 }
 0x87f   :  { %vm2143_vm3 = vmor %vm2141_vm2, %vm2142_vm1  ;;  %v2168_v47 = vor.u32 1.1754944e-38, %v2167_v4  ;;  %vm2166_vm9 = vcmp.eq.f32.partialorder %v2165_v32, 8.507059e+37 }
 0x880   :  { %v2138_v53 = vsub.f32 1.0, %v2137_v9 }
 0x882   :  { %v2139_v30 = vmul.f32 %v4787_v45, %v2138_v53 }
 0x883   :  { %v4789_v31 = vpop.eup %4788 }
 0x884   :  { %v2157_v11 = vmul.f32 %v4789_v31, %v2155_v61  ;;  %v2140_v12 = vadd.f32 %v4787_v45, %v2139_v30  ;;  %vm2162_vm6 = vweird.f32 %v4789_v31 }
 0x885   :  { %vm2163_vm8 = vmor %vm2161_vm7, %vm2162_vm6 }
 0x886   :  { %v2158_v52 = vsub.f32 1.0, %v2157_v11  ;;  %v2144_v8 = vsel %vm2143_vm3, %v4787_v45, %v2140_v12 }
 0x887   :  { %v2149_v19 = vsel %vm2146_vm4, %v2148_v48, %v2144_v8 }
 0x888   :  { %v2172_v20 = vmul.f32 %v2171_v35, %v2149_v19  ;;  %v2159_v54 = vmul.f32 %v4789_v31, %v2158_v52  ;;  %v1617_v35 = vadd.f32 %v6346_v34, %v6306_v42 }
 0x88a   :  { %v2173_v21 = vadd.f32 %v2172_v20, %v1614_v0  ;;  %v2160_v25 = vadd.f32 %v4789_v31, %v2159_v54 }
 0x88c   :  { %4790 = vtanh.f32 %v2173_v21  ;;  %v2164_v22 = vsel %vm2163_vm8, %v4789_v31, %v2160_v25 }
 0x88d   :  { %v2169_v63 = vsel %vm2166_vm9, %v2168_v47, %v2164_v22 }
 0x892   :  { %v4791_v15 = vpop.eup %4790 }
 0x893   :  { %v2175_v14 = vsub.f32 %v6404_v56, %v4791_v15 }
 0x895   :  { %v2176_v45 = vmul.f32 %v2175_v14, %v2169_v63 }
 0x897   :  { %v6440_v9 = vadd.f32 %v4791_v15, %v2176_v45  ;;  %v1590_v45 = vadd.f32 %v6352_v27, %v6289_v60 }
 0x899   :  { %v2178_v5 = vpack.c.bf16 %v6440_v9, %v6440_v9 }
 0x89b   :  { %2180 = vst [vmem:[#allocation4 + $0xc] sm:$0xf] %v2178_v5  ;;  %2189 = vmatmul.bf16.vlgmr.msra.gmra.mxu0 %v2178_v5  ;;  %2202 = vmatmul.bf16.vlgmr.msrb.gmra.mxu1 %v2178_v5 }
 0x89c   :  { %2215 = vmatmul.bf16.vlgmr.msra.gmra.mxu2 %v2178_v5  ;;  %2391 = vmatpush.bf16.msra.mxu0 %v6149_v28 }
 0x89d   :  { %2457 = vmatpush.bf16.msrb.mxu1 %v5842_v7  ;;  %2470 = vmatpush.bf16.msra.mxu2 %v6035_v57  ;;  %v1559_v7 = vadd.f32 %v6292_v46, %v6281_v62 }
 0x8a0   :  { %2392 = vmatpush.bf16.msra.mxu0 %v6161_v16 }
 0x8a1   :  { %2458 = vmatpush.bf16.msrb.mxu1 %v5851_v17  ;;  %2471 = vmatpush.bf16.msra.mxu2 %v6045_v55  ;;  %v1588_v17 = vadd.f32 %v6348_v51, %v6289_v60 }
 0x8a4   :  { %2393 = vmatpush.bf16.msra.mxu0 %v6172_v43 }
 0x8a5   :  { %2459 = vmatpush.bf16.msrb.mxu1 %v5860_v2  ;;  %2472 = vmatpush.bf16.msra.mxu2 %v6056_v6 }
 0x8a8   :  { %2394 = vmatpush.bf16.msra.mxu0 %v6183_v39 }
 0x8a9   :  { %2460 = vmatpush.bf16.msrb.mxu1 %v5872_v38  ;;  %2473 = vmatpush.bf16.msra.mxu2 %v6067_v23 }
 0x8ac   :  { %2395 = vmatpush.bf16.msra.mxu0 %v6196_v58 }
 0x8ad   :  { %2461 = vmatpush.bf16.msrb.mxu1 %v5893_v41  ;;  %2474 = vmatpush.bf16.msra.mxu2 %v6078_v18 }
 0x8b0   :  { %2396 = vmatpush.bf16.msra.mxu0 %v6211_v29 }
 0x8b1   :  { %2462 = vmatpush.bf16.msrb.mxu1 %v5916_v13  ;;  %2475 = vmatpush.bf16.msra.mxu2 %v6092_v1 }
 0x8b4   :  { %2397 = vmatpush.bf16.msra.mxu0 %v6225_v40 }
 0x8b5   :  { %2463 = vmatpush.bf16.msrb.mxu1 %v5939_v26  ;;  %2476 = vmatpush.bf16.msra.mxu2 %v6103_v50 }
 0x8b8   :  { %2398 = vmatpush.bf16.msra.mxu0 %v6241_v33 }
 0x8b9   :  { %2464 = vmatpush.bf16.msrb.mxu1 %v5961_v49  ;;  %2477 = vmatpush.bf16.msra.mxu2 %v6114_v36 }
 0x918   :  { %v2190_v2 = vpop.f32.mrf.mxu0  ;;  %v2203_v38 = vpop.f32.mrf.mxu1 }
 0x919   :  { %v2223_v41 = vadd.f32 %v2190_v2, %v1559_v7  ;;  %v2243_v13 = vadd.f32 %v2203_v38, %v1588_v17 }
 0x91b   :  { %v4276_v57 = vmul.f32 -1.442695, %v2223_v41  ;;  %v4277_v26 = vmul.f32 -1.442695, %v2243_v13  ;;  %v4362_v41 = vld [vmem:[%s7292_s9 + $0x78] sm:$0xf] }
 0x91c   :  { %v4628_v13 = vld [vmem:[%s7292_s9 + $0x80] sm:$0xf0] }
 0x91d   :  { %4792 = vpow2.f32 %v4276_v57  ;;  %v4363_v57 = vor.u32 %v4628_v13, %v4362_v41 }
 0x91e   :  { %4794 = vpow2.f32 %v4277_v26  ;;  %v4350_v26 = vld [vmem:[%s7292_s9 + $0x60] sm:$0xf] }
 0x91f   :  { %v2216_v55 = vpop.f32.mrf.mxu2 }
 0x920   :  { %v2192_v6 = vpop.f32.mrf.mxu0  ;;  %v2205_v23 = vpop.f32.mrf.mxu1  ;;  %v2263_v52 = vadd.f32 %v6304_v44, %v2216_v55  ;;  %v4625_v55 = vld [vmem:[%s7292_s9 + $0x68] sm:$0xf0] }
 0x923   :  { %v4793_v49 = vpop.eup %4792 }
 0x924   :  { %v4795_v18 = vpop.eup %4794  ;;  %v2227_v1 = vadd.f32 1.0, %v4793_v49  ;;  %v4351_v49 = vor.u32 %v4625_v55, %v4350_v26  ;;  %v4652_v26 = vld [vmem:[%s7293_s10 + $0x80] sm:$0xf0]  ;;  %v1564_v55 = vadd.f32 %v6297_v37, %v6281_v62 }
 0x925   :  { %v2247_v50 = vadd.f32 1.0, %v4795_v18 }
 0x926   :  { %4796 = vrcp.f32 %v2227_v1  ;;  %v2239_v24 = vand.u32 2147483648, %v2227_v1  ;;  %v2237_v10 = vand.u32 2147483647, %v2227_v1  ;;  %vm2233_vm11 = vweird.f32 %v2227_v1 }
 0x927   :  { %4798 = vrcp.f32 %v2247_v50  ;;  %v2218_v36 = vpop.f32.mrf.mxu2  ;;  %v2259_v21 = vand.u32 2147483648, %v2247_v50  ;;  %vm2253_vm15 = vweird.f32 %v2247_v50  ;;  %v2257_v25 = vand.u32 2147483647, %v2247_v50 }
 0x928   :  { %v2240_v12 = vor.u32 1.1754944e-38, %v2239_v24  ;;  %vm2238_vm13 = vcmp.eq.f32.partialorder %v2237_v10, 8.507059e+37  ;;  %v4338_v36 = vld [vmem:[%s7292_s9 + $0x48] sm:$0xf] }
 0x929   :  { %v2260_v22 = vor.u32 1.1754944e-38, %v2259_v21  ;;  %vm2258_vm2 = vcmp.eq.f32.partialorder %v2257_v25, 8.507059e+37 }
 0x92c   :  { %v4797_v46 = vpop.eup %4796 }
 0x92d   :  { %v4799_v51 = vpop.eup %4798  ;;  %v2229_v56 = vmul.f32 %v4797_v46, %v2227_v1  ;;  %vm2234_vm10 = vweird.f32 %v4797_v46 }
 0x92e   :  { %v2249_v53 = vmul.f32 %v4799_v51, %v2247_v50  ;;  %vm2235_vm12 = vmor %vm2233_vm11, %vm2234_vm10  ;;  %vm2254_vm14 = vweird.f32 %v4799_v51 }
 0x92f   :  { %v2230_v61 = vsub.f32 1.0, %v2229_v56  ;;  %vm2255_vm1 = vmor %vm2253_vm15, %vm2254_vm14 }
 0x930   :  { %v2250_v11 = vsub.f32 1.0, %v2249_v53  ;;  %v4619_v53 = vld [vmem:[%s7292_s9 + $0x38] sm:$0xf0] }
 0x931   :  { %v2231_v30 = vmul.f32 %v4797_v46, %v2230_v61 }
 0x932   :  { %v2251_v0 = vmul.f32 %v4799_v51, %v2250_v11  ;;  %v4314_v11 = vld [vmem:[%s7292_s9 + $0x18] sm:$0xf] }
 0x933   :  { %v2232_v31 = vadd.f32 %v4797_v46, %v2231_v30 }
 0x934   :  { %v2252_v54 = vadd.f32 %v4799_v51, %v2251_v0 }
 0x935   :  { %v2236_v48 = vsel %vm2235_vm12, %v4797_v46, %v2232_v31  ;;  %v4622_v46 = vld [vmem:[%s7292_s9 + $0x50] sm:$0xf0] }
 0x936   :  { %v2241_v8 = vsel %vm2238_vm13, %v2240_v12, %v2236_v48  ;;  %v2256_v4 = vsel %vm2255_vm1, %v4799_v51, %v2252_v54  ;;  %v4326_v51 = vld [vmem:[%s7292_s9 + $0x30] sm:$0xf]  ;;  %v4339_v61 = vor.u32 %v4622_v46, %v4338_v36  ;;  %v4616_v12 = vld [vmem:[%s7292_s9 + $0x20] sm:$0xf0]  ;;  %v4613_v54 = vld [vmem:[%s7292_s9 + $0x8] sm:$0xf0] }
 0x937   :  { %v2264_v19 = vmul.f32 %v2263_v52, %v2241_v8  ;;  %v2261_v47 = vsel %vm2258_vm2, %v2260_v22, %v2256_v4  ;;  %v4327_v10 = vor.u32 %v4619_v53, %v4326_v51  ;;  %v4446_v46 = vld [vmem:[%s7293_s10 + $0x60] sm:$0xf]  ;;  %v4649_v51 = vld [vmem:[%s7293_s10 + $0x68] sm:$0xf0] }
 0x938   :  { %v6596_v53 = vor.u32 %v4649_v51, %v4446_v46  ;;  %v4623_v46 = vld [vmem:[%s7292_s9 + $0x58] sm:$0xf0] }
 0x939   :  { %v2265_v20 = vadd.f32 %v2264_v19, %v1617_v35  ;;  %v4315_v19 = vor.u32 %v4616_v12, %v4314_v11 }
 0x93b   :  { %4800 = vtanh.f32 %v2265_v20  ;;  %v4302_v20 = vld [vmem:[%s7292_s9] sm:$0xf] }
 0x941   :  { %v4801_v32 = vpop.eup %4800 }
 0x942   :  { %v2267_v15 = vsub.f32 %v6440_v9, %v4801_v32 }
 0x944   :  { %v2268_v14 = vmul.f32 %v2267_v15, %v2261_v47  ;;  %v4303_v15 = vor.u32 %v4613_v54, %v4302_v20  ;;  %v1619_v47 = vadd.f32 %v6350_v59, %v6306_v42  ;;  %v4632_v20 = vld [vmem:[%s7292_s9 + $0xa0] sm:$0xf0] }
 0x946   :  { %v6476_v63 = vadd.f32 %v4801_v32, %v2268_v14 }
 0x948   :  { %v2270_v34 = vpack.c.bf16 %v6476_v63, %v6476_v63 }
 0x94a   :  { %2272 = vst [vmem:[#allocation4 + $0x10] sm:$0xf] %v2270_v34  ;;  %2281 = vmatmul.bf16.vlgmr.msrb.gmra.mxu3 %v2270_v34  ;;  %2294 = vmatmul.bf16.vlgmr.msrb.gmra.mxu0 %v2270_v34 }
 0x94b   :  { %2307 = vmatmul.bf16.vlgmr.msra.gmra.mxu1 %v2270_v34  ;;  %2483 = vmatpush.bf16.msrb.mxu3 %v6149_v28 }
 0x94f   :  { %2484 = vmatpush.bf16.msrb.mxu3 %v6161_v16  ;;  %v1561_v16 = vadd.f32 %v6295_v3, %v6281_v62 }
 0x953   :  { %2485 = vmatpush.bf16.msrb.mxu3 %v6172_v43  ;;  %v4386_v43 = vld [vmem:[%s7292_s9 + $0xa8] sm:$0xf] }
 0x957   :  { %2486 = vmatpush.bf16.msrb.mxu3 %v6183_v39  ;;  %v4634_v39 = vld [vmem:[%s7292_s9 + $0xb0] sm:$0xf0] }
 0x95b   :  { %2487 = vmatpush.bf16.msrb.mxu3 %v6196_v58  ;;  %v4374_v58 = vld [vmem:[%s7292_s9 + $0x90] sm:$0xf] }
 0x95f   :  { %2488 = vmatpush.bf16.msrb.mxu3 %v6211_v29 }
 0x963   :  { %2489 = vmatpush.bf16.msrb.mxu3 %v6225_v40  ;;  %v4387_v40 = vor.u32 %v4634_v39, %v4386_v43 }
 0x965   :  { %2749 = vmatpush.bf16.msrb.mxu0 %v4387_v40  ;;  %v6548_v40 = vld [vmem:[#allocation4] sm:$0xff] }
 0x967   :  { %2490 = vmatpush.bf16.msrb.mxu3 %v6241_v33  ;;  %v4631_v33 = vld [vmem:[%s7292_s9 + $0x98] sm:$0xf0] }
 0x968   :  { %v4375_v17 = vor.u32 %v4631_v33, %v4374_v58  ;;  %v6551_v33 = vld [vmem:[#allocation4 + $0x8] sm:$0xff] }
 0x96a   :  { %2750 = vmatpush.bf16.msrb.mxu0 %v4375_v17 }
 0x96e   :  { %2751 = vmatpush.bf16.msrb.mxu0 %v4363_v57  ;;  %v4458_v57 = vld [vmem:[%s7293_s10 + $0x78] sm:$0xf] }
 0x972   :  { %2752 = vmatpush.bf16.msrb.mxu0 %v4351_v49  ;;  %v6587_v49 = vor.u32 %v4652_v26, %v4458_v57  ;;  %v4398_v26 = vld [vmem:[%s7293_s10] sm:$0xf] }
 0x976   :  { %2753 = vmatpush.bf16.msrb.mxu0 %v4339_v61 }
 0x97a   :  { %2754 = vmatpush.bf16.msrb.mxu0 %v4327_v10  ;;  %v4394_v10 = vld [vmem:[%s7292_s9 + $0xb0] sm:$0xf] }
 0x97e   :  { %2755 = vmatpush.bf16.msrb.mxu0 %v4315_v19  ;;  %v4376_v19 = vld [vmem:[%s7292_s9 + $0x9c] sm:$0xf0] }
 0x982   :  { %2756 = vmatpush.bf16.msrb.mxu0 %v4303_v15 }
 0x9c7   :  { %v2295_v9 = vpop.f32.mrf.mxu0 }
 0x9c8   :  { %v2335_v5 = vadd.f32 %v2295_v9, %v1590_v45  ;;  %v2308_v28 = vpop.f32.mrf.mxu1 }
 0x9c9   :  { %v2355_v4 = vadd.f32 %v6304_v44, %v2308_v28 }
 0x9ca   :  { %v4279_v7 = vmul.f32 -1.442695, %v2335_v5 }
 0x9cc   :  { %4802 = vpow2.f32 %v4279_v7 }
 0x9cd   :  { %v2282_v29 = vpop.f32.mrf.mxu3 }
 0x9ce   :  { %v2315_v27 = vadd.f32 %v2282_v29, %v1561_v16 }
 0x9cf   :  { %v2297_v3 = vpop.f32.mrf.mxu0 }
 0x9d0   :  { %v4278_v2 = vmul.f32 -1.442695, %v2315_v27  ;;  %v2310_v38 = vpop.f32.mrf.mxu1  ;;  %v4482_v27 = vld [vmem:[%s7293_s10 + $0xa8] sm:$0xf]  ;;  %v4658_v3 = vld [vmem:[%s7293_s10 + $0xb0] sm:$0xf0] }
 0x9d1   :  { %v6563_v17 = vor.u32 %v4658_v3, %v4482_v27  ;;  %v4655_v38 = vld [vmem:[%s7293_s10 + $0x98] sm:$0xf0]  ;;  %v4358_v27 = vld [vmem:[%s7292_s9 + $0x68] sm:$0xf] }
 0x9d2   :  { %4804 = vpow2.f32 %v4278_v2  ;;  %v4803_v6 = vpop.eup %4802  ;;  %v4470_v2 = vld [vmem:[%s7293_s10 + $0x90] sm:$0xf] }
 0x9d3   :  { %v2339_v1 = vadd.f32 1.0, %v4803_v6  ;;  %v6574_v13 = vor.u32 %v4655_v38, %v4470_v2  ;;  %v7323_v6 = vld [vmem:[#allocation17_spill] sm:$0xff]  ;;  %v4626_v38 = vld [vmem:[%s7292_s9 + $0x70] sm:$0xf0] }
 0x9d4   :  { %v4359_v57 = vor.u32 %v4626_v38, %v4358_v27 }
 0x9d5   :  { %v2284_v23 = vpop.f32.mrf.mxu3  ;;  %v2351_v5 = vand.u32 2147483648, %v2339_v1  ;;  %vm2345_vm9 = vweird.f32 %v2339_v1  ;;  %v2349_v7 = vand.u32 2147483647, %v2339_v1 }
 0x9d6   :  { %v1593_v23 = vadd.f32 %v7323_v6, %v6289_v60 }
 0x9d7   :  { %v2352_v16 = vor.u32 1.1754944e-38, %v2351_v5  ;;  %vm2350_vm11 = vcmp.eq.f32.partialorder %v2349_v7, 8.507059e+37 }
 0x9d8   :  { %v4805_v18 = vpop.eup %4804 }
 0x9d9   :  { %v2319_v50 = vadd.f32 1.0, %v4805_v18 }
 0x9db   :  { %4806 = vrcp.f32 %v2319_v50  ;;  %v2331_v52 = vand.u32 2147483648, %v2319_v50  ;;  %v2329_v35 = vand.u32 2147483647, %v2319_v50  ;;  %vm2325_vm4 = vweird.f32 %v2319_v50 }
 0x9dc   :  { %4808 = vrcp.f32 %v2339_v1 }
 0x9dd   :  { %v2332_v25 = vor.u32 1.1754944e-38, %v2331_v52  ;;  %vm2330_vm7 = vcmp.eq.f32.partialorder %v2329_v35, 8.507059e+37  ;;  %v4646_v52 = vld [vmem:[%s7293_s10 + $0x50] sm:$0xf0] }
 0x9e1   :  { %v4807_v56 = vpop.eup %4806 }
 0x9e2   :  { %v4809_v24 = vpop.eup %4808  ;;  %v2321_v30 = vmul.f32 %v4807_v56, %v2319_v50  ;;  %vm2326_vm3 = vweird.f32 %v4807_v56 }
 0x9e3   :  { %v2341_v48 = vmul.f32 %v4809_v24, %v2339_v1  ;;  %vm2327_vm6 = vmor %vm2325_vm4, %vm2326_vm3  ;;  %vm2346_vm8 = vweird.f32 %v4809_v24 }
 0x9e4   :  { %v2322_v31 = vsub.f32 1.0, %v2321_v30  ;;  %vm2347_vm10 = vmor %vm2345_vm9, %vm2346_vm8  ;;  %v4388_v30 = vld [vmem:[%s7292_s9 + $0xb4] sm:$0xf0] }
 0x9e5   :  { %v2342_v21 = vsub.f32 1.0, %v2341_v48  ;;  %v4434_v48 = vld [vmem:[%s7293_s10 + $0x48] sm:$0xf] }
 0x9e6   :  { %v2323_v8 = vmul.f32 %v4807_v56, %v2322_v31  ;;  %v4635_v31 = vld [vmem:[%s7292_s9 + $0xb8] sm:$0xf0]  ;;  %v6620_v35 = vor.u32 %v4646_v52, %v4434_v48 }
 0x9e7   :  { %v2343_v34 = vmul.f32 %v4809_v24, %v2342_v21  ;;  %v4395_v12 = vor.u32 %v4635_v31, %v4394_v10  ;;  %v4620_v31 = vld [vmem:[%s7292_s9 + $0x40] sm:$0xf0] }
 0x9e8   :  { %v2324_v0 = vadd.f32 %v4807_v56, %v2323_v8  ;;  %v4630_v8 = vld [vmem:[%s7292_s9 + $0x94] sm:$0xf] }
 0x9e9   :  { %v2344_v9 = vadd.f32 %v4809_v24, %v2343_v34  ;;  %v4379_v54 = vor.u32 %v4630_v8, %v4376_v19  ;;  %v4364_v34 = vld [vmem:[%s7292_s9 + $0x84] sm:$0xf0]  ;;  %v4615_v8 = vld [vmem:[%s7292_s9 + $0x1c] sm:$0xf] }
 0x9ea   :  { %v2328_v32 = vsel %vm2327_vm6, %v4807_v56, %v2324_v0  ;;  %v4382_v0 = vld [vmem:[%s7292_s9 + $0x98] sm:$0xf]  ;;  %v4316_v19 = vld [vmem:[%s7292_s9 + $0x24] sm:$0xf0] }
 0x9eb   :  { %v2333_v22 = vsel %vm2330_vm7, %v2332_v25, %v2328_v32  ;;  %v2348_v44 = vsel %vm2347_vm10, %v4809_v24, %v2344_v9  ;;  %v4633_v24 = vld [vmem:[%s7292_s9 + $0xac] sm:$0xf]  ;;  %v4383_v21 = vor.u32 %v4632_v20, %v4382_v0  ;;  %v4422_v32 = vld [vmem:[%s7293_s10 + $0x30] sm:$0xf] }
 0x9ec   :  { %v2356_v14 = vmul.f32 %v2355_v4, %v2333_v22  ;;  %v2353_v39 = vsel %vm2350_vm11, %v2352_v16, %v2348_v44  ;;  %v4391_v11 = vor.u32 %v4633_v24, %v4388_v30  ;;  %v4643_v22 = vld [vmem:[%s7293_s10 + $0x38] sm:$0xf0]  ;;  %v4629_v44 = vld [vmem:[%s7292_s9 + $0x88] sm:$0xf0]  ;;  %v4328_v24 = vld [vmem:[%s7292_s9 + $0x3c] sm:$0xf0] }
 0x9ed   :  { %v4334_v30 = vld [vmem:[%s7292_s9 + $0x38] sm:$0xf] }
 0x9ee   :  { %v2357_v45 = vadd.f32 %v2356_v14, %v1619_v47  ;;  %2778 = vmatpush.bf16.msra.mxu1 %v4391_v11  ;;  %v6638_v47 = vor.u32 %v4643_v22, %v4422_v32  ;;  %v4627_v14 = vld [vmem:[%s7292_s9 + $0x7c] sm:$0xf]  ;;  %v4335_v52 = vor.u32 %v4620_v31, %v4334_v30  ;;  %v4460_v31 = vld [vmem:[%s7293_s10 + $0x84] sm:$0xf0] }
 0x9ef   :  { %v4367_v7 = vor.u32 %v4627_v14, %v4364_v34  ;;  %v4612_v34 = vld [vmem:[%s7292_s9 + $0x4] sm:$0xf]  ;;  %v4412_v32 = vld [vmem:[%s7293_s10 + $0x24] sm:$0xf0] }
 0x9f0   :  { %4810 = vtanh.f32 %v2357_v45  ;;  %v4370_v45 = vld [vmem:[%s7292_s9 + $0x80] sm:$0xf] }
 0x9f2   :  { %2779 = vmatpush.bf16.msra.mxu1 %v4379_v54  ;;  %v4322_v54 = vld [vmem:[%s7292_s9 + $0x20] sm:$0xf] }
 0x9f6   :  { %v4811_v28 = vpop.eup %4810  ;;  %2780 = vmatpush.bf16.msra.mxu1 %v4367_v7 }
 0x9f7   :  { %v2359_v43 = vsub.f32 %v6476_v63, %v4811_v28 }
 0x9f9   :  { %v2360_v58 = vmul.f32 %v2359_v43, %v2353_v39  ;;  %v4371_v43 = vor.u32 %v4629_v44, %v4370_v45  ;;  %v4640_v39 = vld [vmem:[%s7293_s10 + $0x20] sm:$0xf0]  ;;  %v4304_v45 = vld [vmem:[%s7292_s9 + $0xc] sm:$0xf0] }
 0x9fa   :  { %v4307_v27 = vor.u32 %v4612_v34, %v4304_v45 }
 0x9fb   :  { %v6544_v59 = vadd.f32 %v4811_v28, %v2360_v58  ;;  %v4410_v28 = vld [vmem:[%s7293_s10 + $0x18] sm:$0xf]  ;;  %v4624_v58 = vld [vmem:[%s7292_s9 + $0x64] sm:$0xf] }
 0x9fc   :  { %v6674_v3 = vor.u32 %v4640_v39, %v4410_v28  ;;  %v4614_v28 = vld [vmem:[%s7292_s9 + $0x10] sm:$0xf0] }
 0x9fd   :  { %v2362_v29 = vpack.c.bf16 %v6544_v59, %v6544_v59 }
 0x9ff   :  { %2364 = vst [vmem:[#allocation4 + $0x14] sm:$0xf] %v2362_v29  ;;  %2373 = vmatmul.bf16.vlgmr.msrb.gmra.mxu2 %v2362_v29  ;;  %2386 = vmatmul.bf16.vlgmr.msra.gmra.mxu3 %v2362_v29 }
 0xa00   :  { %2399 = vmatmul.bf16.vlgmr.msra.gmra.mxu0 %v2362_v29  ;;  %3024 = vmatpush.bf16.msra.mxu3 %v6563_v17  ;;  %v4352_v29 = vld [vmem:[%s7292_s9 + $0x6c] sm:$0xf0] }
 0xa01   :  { %2807 = vmatpush.bf16.msrb.mxu2 %v4395_v12  ;;  %v4355_v2 = vor.u32 %v4624_v58, %v4352_v29 }
 0xa03   :  { %2781 = vmatpush.bf16.msra.mxu1 %v4355_v2 }
 0xa04   :  { %3025 = vmatpush.bf16.msra.mxu3 %v6574_v13 }
 0xa05   :  { %2808 = vmatpush.bf16.msrb.mxu2 %v4383_v21  ;;  %v4617_v21 = vld [vmem:[%s7292_s9 + $0x28] sm:$0xf0] }
 0xa06   :  { %v6554_v63 = vld [vmem:[#allocation4 + $0x10] sm:$0xff]  ;;  %v4323_v14 = vor.u32 %v4617_v21, %v4322_v54  ;;  %v4424_v54 = vld [vmem:[%s7293_s10 + $0x3c] sm:$0xf0]  ;;  %v7327_v21 = vmov 0  }
 0xa08   :  { %3026 = vmatpush.bf16.msra.mxu3 %v6587_v49 }
 0xa09   :  { %2809 = vmatpush.bf16.msrb.mxu2 %v4371_v43  ;;  %v7326_v43 = vld [vmem:[#allocation16_spill] sm:$0xff] }
 0xa0a   :  { %v1622_v39 = vadd.f32 %v7326_v43, %v6306_v42 }
 0xa0c   :  { %3027 = vmatpush.bf16.msra.mxu3 %v6596_v53 }
 0xa0d   :  { %2810 = vmatpush.bf16.msrb.mxu2 %v4359_v57 }
 0xa10   :  { %2757 = vmatmul.bf16.vlgmr.msrb.gmra.mxu0 %v6548_v40  ;;  %3028 = vmatpush.bf16.msra.mxu3 %v6620_v35 }
 0xa14   :  { %3029 = vmatpush.bf16.msra.mxu3 %v6638_v47 }
 0xa18   :  { %3030 = vmatpush.bf16.msra.mxu3 %v6674_v3 }
 0xa20   :  { %2762 = vmatmul.bf16.gmra.mxu0 %v6551_v33 }
 0xa30   :  { %2767 = vmatmul.bf16.gmra.mxu0 %v6554_v63 }
 0xa7d   :  { %v6572_v41 = vpop.f32.mrf.mxu0 }
 0xa82   :  { %v2374_v18 = vpop.f32.mrf.mxu2  ;;  %v2387_v1 = vpop.f32.mrf.mxu3 }
 0xa83   :  { %v2407_v50 = vadd.f32 %v2374_v18, %v1564_v55  ;;  %v2427_v36 = vadd.f32 %v2387_v1, %v1593_v23  ;;  %v4637_v55 = vld [vmem:[%s7293_s10 + $0x8] sm:$0xf0]  ;;  %v4340_v18 = vld [vmem:[%s7292_s9 + $0x54] sm:$0xf0]  ;;  %v4346_v1 = vld [vmem:[%s7292_s9 + $0x50] sm:$0xf] }
 0xa84   :  { %v6686_v6 = vor.u32 %v4637_v55, %v4398_v26  ;;  %v4621_v23 = vld [vmem:[%s7292_s9 + $0x4c] sm:$0xf] }
 0xa85   :  { %v4280_v37 = vmul.f32 -1.442695, %v2407_v50  ;;  %v4281_v56 = vmul.f32 -1.442695, %v2427_v36  ;;  %v2402_v61 = vpop.f32.mrf.mxu0  ;;  %v4343_v36 = vor.u32 %v4621_v23, %v4340_v18 }
 0xa86   :  { %v4618_v61 = vld [vmem:[%s7292_s9 + $0x34] sm:$0xf]  ;;  %3031 = vmatpush.bf16.msra.mxu3 %v6686_v6 }
 0xa87   :  { %4812 = vpow2.f32 %v4280_v37  ;;  %2782 = vmatpush.bf16.msra.mxu1 %v4343_v36  ;;  %v4331_v48 = vor.u32 %v4618_v61, %v4328_v24  ;;  %v4472_v24 = vld [vmem:[%s7293_s10 + $0x9c] sm:$0xf0] }
 0xa88   :  { %4814 = vpow2.f32 %v4281_v56  ;;  %v4347_v56 = vor.u32 %v4623_v46, %v4346_v1 }
 0xa8a   :  { %v2376_v25 = vpop.f32.mrf.mxu2  ;;  %v2389_v4 = vpop.f32.mrf.mxu3  ;;  %2811 = vmatpush.bf16.msrb.mxu2 %v4347_v56  ;;  %v4484_v56 = vld [vmem:[%s7293_s10 + $0xb4] sm:$0xf0] }
 0xa8b   :  { %2783 = vmatpush.bf16.msra.mxu1 %v4331_v48  ;;  %v4448_v48 = vld [vmem:[%s7293_s10 + $0x6c] sm:$0xf0] }
 0xa8d   :  { %v4813_v15 = vpop.eup %4812 }
 0xa8e   :  { %v4815_v9 = vpop.eup %4814  ;;  %v6649_v5 = vadd.f32 1.0, %v4813_v15  ;;  %2812 = vmatpush.bf16.msrb.mxu2 %v4335_v52  ;;  %v4319_v15 = vor.u32 %v4615_v8, %v4316_v19  ;;  %v4645_v8 = vld [vmem:[%s7293_s10 + $0x4c] sm:$0xf]  ;;  %v4436_v19 = vld [vmem:[%s7293_s10 + $0x54] sm:$0xf0] }
 0xa8f   :  { %v6657_v16 = vadd.f32 1.0, %v4815_v9  ;;  %v4310_v9 = vld [vmem:[%s7292_s9 + $0x8] sm:$0xf]  ;;  %s4975_s9 = smov 8  }
 0xa90   :  { %4816 = vrcp.f32 %v6649_v5  ;;  %v2423_v10 = vand.u32 2147483648, %v6649_v5  ;;  %v2421_v20 = vand.u32 2147483647, %v6649_v5  ;;  %vm2417_vm13 = vweird.f32 %v6649_v5  ;;  %2784 = vmatpush.bf16.msra.mxu1 %v4319_v15  ;;  %v4400_v15 = vld [vmem:[%s7293_s10 + $0xc] sm:$0xf0] }
 0xa91   :  { %4818 = vrcp.f32 %v6657_v16  ;;  %v4311_v2 = vor.u32 %v4614_v28, %v4310_v9  ;;  %v2443_v26 = vand.u32 2147483648, %v6657_v16  ;;  %vm2437_vm2 = vweird.f32 %v6657_v16 }
 0xa92   :  { %v2424_v25 = vor.u32 1.1754944e-38, %v2423_v10  ;;  %vm2422_vm15 = vcmp.eq.f32.partialorder %v2421_v20, 8.507059e+37  ;;  %2813 = vmatpush.bf16.msrb.mxu2 %v4323_v14  ;;  %v2441_v55 = vand.u32 2147483647, %v6657_v16  ;;  %v4651_v10 = vld [vmem:[%s7293_s10 + $0x7c] sm:$0xf] }
 0xa93   :  { %v2444_v1 = vor.u32 1.1754944e-38, %v2443_v26  ;;  %v4642_v20 = vld [vmem:[%s7293_s10 + $0x34] sm:$0xf]  ;;  %v4478_v26 = vld [vmem:[%s7293_s10 + $0x98] sm:$0xf] }
 0xa94   :  { %2785 = vmatpush.bf16.msra.mxu1 %v4307_v27  ;;  %vm2442_vm4 = vcmp.eq.f32.partialorder %v2441_v55, 8.507059e+37  ;;  %v4656_v55 = vld [vmem:[%s7293_s10 + $0xa0] sm:$0xf0] }
 0xa96   :  { %v4817_v50 = vpop.eup %4816  ;;  %2814 = vmatpush.bf16.msrb.mxu2 %v4311_v2 }
 0xa97   :  { %v6700_v51 = vpop.eup %4818  ;;  %v2413_v37 = vmul.f32 %v4817_v50, %v6649_v5  ;;  %vm2418_vm12 = vweird.f32 %v4817_v50  ;;  %v6749_v5 = vld [vmem:[%s7291_s8] ss:$0 sm:$0xff]  ;;  %s4974_s8 = smov 128  }
 0xa98   :  { %v2433_v12 = vmul.f32 %v6700_v51, %v6657_v16  ;;  %vm6733_vm14 = vmor %vm2417_vm13, %vm2418_vm12  ;;  %v2447_v7 = vadd.f32 %v6749_v5, %v6572_v41  ;;  %vm2438_vm1 = vweird.f32 %v6700_v51 }
 0xa99   :  { %v2414_v11 = vsub.f32 1.0, %v2413_v37  ;;  %vm2439_vm3 = vmor %vm2437_vm2, %vm2438_vm1  ;;  %v4657_v37 = vld [vmem:[%s7293_s10 + $0xac] sm:$0xf] }
 0xa9a   :  { %v2434_v22 = vsub.f32 1.0, %v2433_v12  ;;  %v4648_v12 = vld [vmem:[%s7293_s10 + $0x64] sm:$0xf] }
 0xa9b   :  { %v2415_v0 = vmul.f32 %v4817_v50, %v2414_v11  ;;  %v6799_v11 = vor.u32 %v4651_v10, %v4460_v31  ;;  %v6810_v52 = vor.u32 %v4648_v12, %v4448_v48 }
 0xa9c   :  { %v2435_v38 = vmul.f32 %v6700_v51, %v2434_v22  ;;  %v4636_v22 = vld [vmem:[%s7293_s10 + $0x4] sm:$0xf] }
 0xa9d   :  { %v2416_v4 = vadd.f32 %v4817_v50, %v2415_v0  ;;  %v6821_v0 = vor.u32 %v4645_v8, %v4436_v19  ;;  %v6857_v14 = vor.u32 %v4636_v22, %v4400_v15  ;;  %v4442_v22 = vld [vmem:[%s7293_s10 + $0x50] sm:$0xf]  ;;  %v4647_v15 = vld [vmem:[%s7293_s10 + $0x58] sm:$0xf0] }
 0xa9e   :  { %v2436_v57 = vadd.f32 %v6700_v51, %v2435_v38  ;;  %v4490_v38 = vld [vmem:[%s7293_s10 + $0xb0] sm:$0xf] }
 0xa9f   :  { %v2420_v44 = vsel %vm6733_vm14, %v4817_v50, %v2416_v4  ;;  %v4639_v4 = vld [vmem:[%s7293_s10 + $0x1c] sm:$0xf] }
 0xaa0   :  { %v2425_v58 = vsel %vm2422_vm15, %v2424_v25, %v2420_v44  ;;  %v2440_v23 = vsel %vm2439_vm3, %v6700_v51, %v2436_v57  ;;  %v6778_v51 = vor.u32 %v4657_v37, %v4484_v56  ;;  %v6835_v25 = vor.u32 %v4642_v20, %v4424_v54  ;;  %v7329_v44 = vld [vmem:[#allocation18_spill] sm:$0xff] }
 0xaa1   :  { %v2448_v29 = vmul.f32 %v2447_v7, %v2425_v58  ;;  %v2445_v36 = vsel %vm2442_vm4, %v2444_v1, %v2440_v23  ;;  %v1595_v28 = vadd.f32 %v7329_v44, %v6289_v60  ;;  %v4454_v56 = vld [vmem:[%s7293_s10 + $0x68] sm:$0xf] }
 0xaa3   :  { %v2449_v41 = vadd.f32 %v2448_v29, %v1622_v39 }
 0xaa5   :  { %4820 = vtanh.f32 %v2449_v41 }
 0xaab   :  { %v4821_v18 = vpop.eup %4820 }
 0xaac   :  { %v2451_v50 = vsub.f32 %v6544_v59, %v4821_v18  ;;  %v4654_v59 = vld [vmem:[%s7293_s10 + $0x94] sm:$0xf] }
 0xaad   :  { %v6788_v30 = vor.u32 %v4654_v59, %v4472_v24 }
 0xaae   :  { %v2452_v46 = vmul.f32 %v2451_v50, %v2445_v36  ;;  %v4466_v50 = vld [vmem:[%s7293_s10 + $0x80] sm:$0xf]  ;;  %v4653_v36 = vld [vmem:[%s7293_s10 + $0x88] sm:$0xf0] }
 0xab0   :  { %v6774_v61 = vadd.f32 %v4821_v18, %v2452_v46  ;;  %v6897_v18 = vor.u32 %v4656_v55, %v4478_v26  ;;  %v6908_v46 = vor.u32 %v4653_v36, %v4466_v50 }
 0xab2   :  { %v2454_v16 = vpack.c.bf16 %v6774_v61, %v6774_v61 }
 0xab4   :  { %2456 = vst [vmem:[#allocation4 + $0x18] sm:$0xf] %v2454_v16  ;;  %2465 = vmatmul.bf16.vlgmr.msrb.gmra.mxu1 %v2454_v16  ;;  %2478 = vmatmul.bf16.vlgmr.msra.gmra.mxu2 %v2454_v16 }
 0xab5   :  { %2491 = vmatmul.bf16.vlgmr.msrb.gmra.mxu3 %v2454_v16  ;;  %3115 = vmatpush.bf16.msrb.mxu1 %v6563_v17  ;;  %v4650_v16 = vld [vmem:[%s7293_s10 + $0x70] sm:$0xf0] }
 0xab6   :  { %3037 = vmatpush.bf16.msrb.mxu3 %v6778_v51  ;;  %3128 = vmatpush.bf16.msra.mxu2 %v6778_v51  ;;  %v6922_v31 = vor.u32 %v4650_v16, %v4454_v56 }
 0xab9   :  { %3116 = vmatpush.bf16.msrb.mxu1 %v6574_v13 }
 0xaba   :  { %3038 = vmatpush.bf16.msrb.mxu3 %v6788_v30  ;;  %3129 = vmatpush.bf16.msra.mxu2 %v6788_v30 }
 0xabd   :  { %3117 = vmatpush.bf16.msrb.mxu1 %v6587_v49 }
 0xabe   :  { %3039 = vmatpush.bf16.msrb.mxu3 %v6799_v11  ;;  %3130 = vmatpush.bf16.msra.mxu2 %v6799_v11 }
 0xac1   :  { %3118 = vmatpush.bf16.msrb.mxu1 %v6596_v53 }
 0xac2   :  { %3040 = vmatpush.bf16.msrb.mxu3 %v6810_v52  ;;  %3131 = vmatpush.bf16.msra.mxu2 %v6810_v52 }
 0xac4   :  { %2786 = vmatmul.bf16.vlgmr.msra.gmra.mxu1 %v6548_v40  ;;  %2815 = vmatmul.bf16.vlgmr.msrb.gmra.mxu2 %v6548_v40  ;;  %v6846_v40 = vor.u32 %v4639_v4, %v4412_v32 }
 0xac5   :  { %3032 = vmatmul.bf16.vlgmr.msra.gmra.mxu3 %v7327_v21  ;;  %3119 = vmatpush.bf16.msrb.mxu1 %v6620_v35 }
 0xac6   :  { %3041 = vmatpush.bf16.msrb.mxu3 %v6821_v0  ;;  %3132 = vmatpush.bf16.msra.mxu2 %v6821_v0 }
 0xac9   :  { %3120 = vmatpush.bf16.msrb.mxu1 %v6638_v47 }
 0xaca   :  { %3042 = vmatpush.bf16.msrb.mxu3 %v6835_v25  ;;  %3133 = vmatpush.bf16.msra.mxu2 %v6835_v25 }
 0xacd   :  { %3121 = vmatpush.bf16.msrb.mxu1 %v6674_v3 }
 0xace   :  { %3043 = vmatpush.bf16.msrb.mxu3 %v6846_v40  ;;  %3134 = vmatpush.bf16.msra.mxu2 %v6846_v40 }
 0xad1   :  { %3122 = vmatpush.bf16.msrb.mxu1 %v6686_v6 }
 0xad2   :  { %3044 = vmatpush.bf16.msrb.mxu3 %v6857_v14  ;;  %3135 = vmatpush.bf16.msra.mxu2 %v6857_v14 }
 0xad4   :  { %2791 = vmatmul.bf16.gmra.mxu1 %v6551_v33  ;;  %2820 = vmatmul.bf16.gmra.mxu2 %v6551_v33  ;;  %v7328_v33 = vld [vmem:[#allocation14_spill] sm:$0xff] }
 0xad5   :  { %3220 = vmatpush.bf16.msra.mxu1 %v6778_v51  ;;  %3045 = vmatmul.bf16.vlgmr.msrb.gmra.mxu3 %v7327_v21  ;;  %v1566_v34 = vadd.f32 %v7328_v33, %v6281_v62  ;;  %v4659_v62 = vld [vmem:[%s7293_s10 + $0xb8] sm:$0xf0] }
 0xad6   :  { %v6886_v41 = vor.u32 %v4659_v62, %v4490_v38  ;;  %v4406_v62 = vld [vmem:[%s7293_s10 + $0x8] sm:$0xf] }
 0xad8   :  { %3050 = vmatpush.bf16.msra.mxu0 %v6886_v41  ;;  %3141 = vmatpush.bf16.msra.mxu3 %v6886_v41 }
 0xad9   :  { %3221 = vmatpush.bf16.msra.mxu1 %v6788_v30  ;;  %3233 = vmatpush.bf16.msrb.mxu2 %v6886_v41 }
 0xadc   :  { %3051 = vmatpush.bf16.msra.mxu0 %v6897_v18  ;;  %3142 = vmatpush.bf16.msra.mxu3 %v6897_v18 }
 0xadd   :  { %3222 = vmatpush.bf16.msra.mxu1 %v6799_v11  ;;  %3234 = vmatpush.bf16.msrb.mxu2 %v6897_v18 }
 0xae0   :  { %3052 = vmatpush.bf16.msra.mxu0 %v6908_v46  ;;  %3143 = vmatpush.bf16.msra.mxu3 %v6908_v46 }
 0xae1   :  { %3223 = vmatpush.bf16.msra.mxu1 %v6810_v52  ;;  %3235 = vmatpush.bf16.msrb.mxu2 %v6908_v46 }
 0xae4   :  { %2796 = vmatmul.bf16.gmra.mxu1 %v6554_v63  ;;  %2825 = vmatmul.bf16.gmra.mxu2 %v6554_v63 }
 0xae5   :  { %3224 = vmatpush.bf16.msra.mxu1 %v6821_v0  ;;  %3053 = vmatpush.bf16.msra.mxu0 %v6922_v31 }
 0xae6   :  { %3144 = vmatpush.bf16.msra.mxu3 %v6922_v31  ;;  %3236 = vmatpush.bf16.msrb.mxu2 %v6922_v31 }
 0xae9   :  { %3225 = vmatpush.bf16.msra.mxu1 %v6835_v25 }
 0xaed   :  { %3226 = vmatpush.bf16.msra.mxu1 %v6846_v40 }
 0xaf1   :  { %3227 = vmatpush.bf16.msra.mxu1 %v6857_v14 }
 0xb31   :  { %v2466_v45 = vpop.f32.mrf.mxu1 }
 0xb32   :  { %v2499_v9 = vadd.f32 %v2466_v45, %v1566_v34  ;;  %v6937_v45 = vor.u32 %v4647_v15, %v4442_v22 }
 0xb34   :  { %v4282_v7 = vmul.f32 -1.442695, %v2499_v9  ;;  %3054 = vmatpush.bf16.msra.mxu0 %v6937_v45  ;;  %3145 = vmatpush.bf16.msra.mxu3 %v6937_v45 }
 0xb35   :  { %3237 = vmatpush.bf16.msrb.mxu2 %v6937_v45 }
 0xb36   :  { %4822 = vpow2.f32 %v4282_v7  ;;  %v7330_v7 = vld [vmem:[#allocation15_spill] sm:$0xff] }
 0xb37   :  { %v2479_v43 = vpop.f32.mrf.mxu2  ;;  %v1624_v44 = vadd.f32 %v7330_v7, %v6306_v42  ;;  %v4418_v42 = vld [vmem:[%s7293_s10 + $0x20] sm:$0xf] }
 0xb38   :  { %v2519_v39 = vadd.f32 %v2479_v43, %v1595_v28  ;;  %v2492_v58 = vpop.f32.mrf.mxu3 }
 0xb39   :  { %v2468_v63 = vpop.f32.mrf.mxu1  ;;  %v2539_v32 = vadd.f32 %v6749_v5, %v2492_v58  ;;  %v4644_v58 = vld [vmem:[%s7293_s10 + $0x40] sm:$0xf0] }
 0xb3a   :  { %v4283_v29 = vmul.f32 -1.442695, %v2519_v39  ;;  %v4430_v39 = vld [vmem:[%s7293_s10 + $0x38] sm:$0xf] }
 0xb3c   :  { %v4823_v27 = vpop.eup %4822  ;;  %4824 = vpow2.f32 %v4283_v29  ;;  %v6950_v29 = vor.u32 %v4644_v58, %v4430_v39 }
 0xb3d   :  { %v2503_v2 = vadd.f32 1.0, %v4823_v27  ;;  %v4641_v27 = vld [vmem:[%s7293_s10 + $0x28] sm:$0xf0] }
 0xb3e   :  { %3055 = vmatpush.bf16.msra.mxu0 %v6950_v29  ;;  %3146 = vmatpush.bf16.msra.mxu3 %v6950_v29 }
 0xb3f   :  { %4826 = vrcp.f32 %v2503_v2  ;;  %v2481_v60 = vpop.f32.mrf.mxu2  ;;  %v2515_v12 = vand.u32 2147483648, %v2503_v2  ;;  %v2513_v8 = vand.u32 2147483647, %v2503_v2  ;;  %vm2509_vm7 = vweird.f32 %v2503_v2  ;;  %3238 = vmatpush.bf16.msrb.mxu2 %v6950_v29 }
 0xb40   :  { %v2494_v57 = vpop.f32.mrf.mxu3  ;;  %v4638_v60 = vld [vmem:[%s7293_s10 + $0x10] sm:$0xf0] }
 0xb41   :  { %v2516_v4 = vor.u32 1.1754944e-38, %v2515_v12  ;;  %vm2514_vm9 = vcmp.eq.f32.partialorder %v2513_v8, 8.507059e+37 }
 0xb42   :  { %v4825_v23 = vpop.eup %4824 }
 0xb43   :  { %v6899_v1 = vadd.f32 1.0, %v4825_v23  ;;  %v6975_v23 = vor.u32 %v4638_v60, %v4406_v62 }
 0xb45   :  { %v4827_v37 = vpop.eup %4826  ;;  %4828 = vrcp.f32 %v6899_v1  ;;  %v2535_v57 = vand.u32 2147483648, %v6899_v1  ;;  %vm2529_vm11 = vweird.f32 %v6899_v1  ;;  %v2533_v26 = vand.u32 2147483647, %v6899_v1 }
 0xb46   :  { %v2505_v59 = vmul.f32 %v4827_v37, %v2503_v2  ;;  %vm2510_vm6 = vweird.f32 %v4827_v37  ;;  %v6959_v2 = vor.u32 %v4641_v27, %v4418_v42 }
 0xb47   :  { %vm2511_vm8 = vmor %vm2509_vm7, %vm2510_vm6  ;;  %vm2534_vm13 = vcmp.eq.f32.partialorder %v2533_v26, 8.507059e+37 }
 0xb48   :  { %v2506_v24 = vsub.f32 1.0, %v2505_v59  ;;  %v6919_v10 = vpop.f32.mrf.mxu3  ;;  %3056 = vmatpush.bf16.msra.mxu0 %v6959_v2  ;;  %3147 = vmatpush.bf16.msra.mxu3 %v6959_v2 }
 0xb49   :  { %3239 = vmatpush.bf16.msrb.mxu2 %v6959_v2 }
 0xb4a   :  { %v2507_v48 = vmul.f32 %v4827_v37, %v2506_v24 }
 0xb4b   :  { %v4829_v19 = vpop.eup %4828 }
 0xb4c   :  { %v2525_v20 = vmul.f32 %v4829_v19, %v6899_v1  ;;  %v2508_v54 = vadd.f32 %v4827_v37, %v2507_v48  ;;  %vm2530_vm10 = vweird.f32 %v4829_v19  ;;  %3057 = vmatpush.bf16.msra.mxu0 %v6975_v23  ;;  %3148 = vmatpush.bf16.msra.mxu3 %v6975_v23  ;;  %v2758_v48 = vpop.f32.mrf.mxu0 }
 0xb4d   :  { %vm2531_vm12 = vmor %vm2529_vm11, %vm2530_vm10  ;;  %3240 = vmatpush.bf16.msrb.mxu2 %v6975_v23 }
 0xb4e   :  { %v2526_v33 = vsub.f32 1.0, %v2525_v20  ;;  %v2512_v34 = vsel %vm2511_vm8, %v4827_v37, %v2508_v54  ;;  %v2536_v37 = vor.u32 1.1754944e-38, %v2535_v57 }
 0xb4f   :  { %v2517_v9 = vsel %vm2514_vm9, %v2516_v4, %v2512_v34 }
 0xb50   :  { %v2540_v5 = vmul.f32 %v2539_v32, %v2517_v9  ;;  %v3035_v28 = vpop.f32.mrf.mxu3  ;;  %v2527_v43 = vmul.f32 %v4829_v19, %v2526_v33  ;;  %3207 = vmatpush.bf16.msrb.mxu0 %v6563_v17  ;;  %3299 = vmatpush.bf16.msrb.mxu3 %v6563_v17  ;;  %v2787_v33 = vpop.f32.mrf.mxu1 }
 0xb52   :  { %v2541_v63 = vadd.f32 %v2540_v5, %v1624_v44  ;;  %v2528_v38 = vadd.f32 %v4829_v19, %v2527_v43 }
 0xb54   :  { %4830 = vtanh.f32 %v2541_v63  ;;  %v2532_v50 = vsel %vm2531_vm12, %v4829_v19, %v2528_v38  ;;  %3208 = vmatpush.bf16.msrb.mxu0 %v6574_v13  ;;  %3300 = vmatpush.bf16.msrb.mxu3 %v6574_v13  ;;  %v7009_v8 = vpop.f32.mrf.mxu0 }
 0xb55   :  { %v2537_v16 = vsel %vm2534_vm13, %v2536_v37, %v2532_v50  ;;  %v7037_v50 = vld [vmem:[%s7295_s12] ss:$0 sm:$0xff] }
 0xb58   :  { %v6972_v55 = vpop.f32.mrf.mxu3  ;;  %3209 = vmatpush.bf16.msrb.mxu0 %v6587_v49  ;;  %3301 = vmatpush.bf16.msrb.mxu3 %v6587_v49 }
 0xb5a   :  { %v4831_v36 = vpop.eup %4830 }
 0xb5b   :  { %v2543_v56 = vsub.f32 %v6774_v61, %v4831_v36 }
 0xb5c   :  { %3210 = vmatpush.bf16.msrb.mxu0 %v6596_v53  ;;  %3302 = vmatpush.bf16.msrb.mxu3 %v6596_v53  ;;  %v7016_v20 = vpop.f32.mrf.mxu0 }
 0xb5d   :  { %v2544_v1 = vmul.f32 %v2543_v56, %v2537_v16  ;;  %v2816_v16 = vpop.f32.mrf.mxu2 }
 0xb5f   :  { %v2545_v59 = vadd.f32 %v4831_v36, %v2544_v1 }
 0xb60   :  { %v3048_v24 = vpop.f32.mrf.mxu3  ;;  %3211 = vmatpush.bf16.msrb.mxu0 %v6620_v35  ;;  %3303 = vmatpush.bf16.msrb.mxu3 %v6620_v35 }
 0xb61   :  { %v2546_v12 = vpack.c.bf16 %v2545_v59, %v2545_v59  ;;  %3813 = vst.msk [vmem:[#allocation8 + $0x2] sm:$0x3] %vm3810_vm5, %v2545_v59 }
 0xb63   :  { %2548 = vst [vmem:[#allocation4 + $0x1c] sm:$0xf] %v2546_v12 }
 0xb64   :  { %3212 = vmatpush.bf16.msrb.mxu0 %v6638_v47  ;;  %3304 = vmatpush.bf16.msrb.mxu3 %v6638_v47  ;;  %v7020_v32 = vpop.f32.mrf.mxu0 }
 0xb68   :  { %3213 = vmatpush.bf16.msrb.mxu0 %v6674_v3  ;;  %3305 = vmatpush.bf16.msrb.mxu3 %v6674_v3 }
 0xb6a   :  { %v4611_v61 = vld [vmem:[#allocation4 + $0x18] sm:$0xff] }
 0xb6b   :  { %2772 = vmatmul.bf16.gmra.mxu0 %v4611_v61  ;;  %2801 = vmatmul.bf16.gmra.mxu1 %v4611_v61 }
 0xb6c   :  { %2830 = vmatmul.bf16.gmra.mxu2 %v4611_v61  ;;  %3214 = vmatpush.bf16.msrb.mxu0 %v6686_v6  ;;  %v7025_v7 = vpop.f32.mrf.mxu0 }
 0xb6d   :  { %3306 = vmatpush.bf16.msrb.mxu3 %v6686_v6 }
 0xb74   :  { %v7028_v43 = vpop.f32.mrf.mxu0 }
 0xb7b   :  { %3058 = vmatmul.bf16.vlgmr.msra.gmra.mxu0 %v7327_v21  ;;  %v2589_v21 = vld [vmem:[%s7294_s11] sm:$0x7] }
 0xb7c   :  { %3312 = vmatpush.bf16.msra.mxu0 %v6778_v51  ;;  %v7014_v19 = vperm.slane %v2589_v21, 0  ;;  %v7022_v15 = vperm.slane %v2589_v21, 1  ;;  %v7039_v37 = vperm.slane %v2589_v21, 2 }
 0xb7e   :  { %v2759_v54 = vadd.f32 %v2758_v48, %v7014_v19  ;;  %v2788_v34 = vadd.f32 %v2787_v33, %v7022_v15  ;;  %v2817_v48 = vadd.f32 %v2816_v16, %v7039_v37 }
 0xb80   :  { %3313 = vmatpush.bf16.msra.mxu0 %v6788_v30  ;;  %v3066_v4 = vadd.f32 %v6919_v10, %v2759_v54  ;;  %v3086_v44 = vadd.f32 %v6972_v55, %v2788_v34 }
 0xb82   :  { %v4492_v22 = vmul.f32 -1.442695, %v3066_v4  ;;  %v4493_v28 = vmul.f32 -1.442695, %v3086_v44 }
 0xb84   :  { %3314 = vmatpush.bf16.msra.mxu0 %v6799_v11  ;;  %4832 = vpow2.f32 %v4492_v22 }
 0xb88   :  { %3315 = vmatpush.bf16.msra.mxu0 %v6810_v52 }
 0xb8a   :  { %v4833_v9 = vpop.eup %4832 }
 0xb8b   :  { %v3070_v5 = vadd.f32 1.0, %v4833_v9 }
 0xb8c   :  { %3316 = vmatpush.bf16.msra.mxu0 %v6821_v0 }
 0xb8d   :  { %4834 = vrcp.f32 %v3070_v5  ;;  %v3082_v55 = vand.u32 2147483648, %v3070_v5  ;;  %vm3076_vm15 = vweird.f32 %v3070_v5  ;;  %v3080_v36 = vand.u32 2147483647, %v3070_v5 }
 0xb8e   :  { %4836 = vpow2.f32 %v4493_v28 }
 0xb8f   :  { %v3083_v24 = vor.u32 1.1754944e-38, %v3082_v55  ;;  %vm3081_vm2 = vcmp.eq.f32.partialorder %v3080_v36, 8.507059e+37 }
 0xb90   :  { %3317 = vmatpush.bf16.msra.mxu0 %v6835_v25 }
 0xb93   :  { %v4835_v10 = vpop.eup %4834 }
 0xb94   :  { %3318 = vmatpush.bf16.msra.mxu0 %v6846_v40  ;;  %v4837_v39 = vpop.eup %4836  ;;  %v3072_v63 = vmul.f32 %v4835_v10, %v3070_v5  ;;  %vm3077_vm14 = vweird.f32 %v4835_v10 }
 0xb95   :  { %v3090_v58 = vadd.f32 1.0, %v4837_v39  ;;  %vm3078_vm1 = vmor %vm3076_vm15, %vm3077_vm14 }
 0xb96   :  { %v3073_v27 = vsub.f32 1.0, %v3072_v63 }
 0xb97   :  { %4838 = vrcp.f32 %v3090_v58  ;;  %v3102_v21 = vand.u32 2147483648, %v3090_v58  ;;  %vm3096_vm4 = vweird.f32 %v3090_v58  ;;  %v3100_v9 = vand.u32 2147483647, %v3090_v58 }
 0xb98   :  { %3319 = vmatpush.bf16.msra.mxu0 %v6857_v14  ;;  %v3074_v38 = vmul.f32 %v4835_v10, %v3073_v27 }
 0xb99   :  { %v3103_v28 = vor.u32 1.1754944e-38, %v3102_v21  ;;  %vm3101_vm7 = vcmp.eq.f32.partialorder %v3100_v9, 8.507059e+37 }
 0xb9a   :  { %v3075_v57 = vadd.f32 %v4835_v10, %v3074_v38 }
 0xb9c   :  { %v3079_v56 = vsel %vm3078_vm1, %v4835_v10, %v3075_v57 }
 0xb9d   :  { %v4839_v60 = vpop.eup %4838  ;;  %v3084_v61 = vsel %vm3081_vm2, %v3083_v24, %v3079_v56 }
 0xb9e   :  { %v3092_v26 = vmul.f32 %v4839_v60, %v3090_v58  ;;  %vm3097_vm3 = vweird.f32 %v4839_v60  ;;  %v2789_v58 = vpop.f32.mrf.mxu1 }
 0xb9f   :  { %vm3098_vm6 = vmor %vm3096_vm4, %vm3097_vm3 }
 0xba0   :  { %v3093_v1 = vsub.f32 1.0, %v3092_v26 }
 0xba2   :  { %v3094_v4 = vmul.f32 %v4839_v60, %v3093_v1 }
 0xba4   :  { %v3095_v33 = vadd.f32 %v4839_v60, %v3094_v4 }
 0xba6   :  { %v3099_v44 = vsel %vm3098_vm6, %v4839_v60, %v3095_v33  ;;  %v2818_v60 = vpop.f32.mrf.mxu2  ;;  %v7071_v57 = vpop.f32.mrf.mxu1 }
 0xba7   :  { %v3104_v39 = vsel %vm3101_vm7, %v3103_v28, %v3099_v44 }
 0xbae   :  { %v7073_v26 = vpop.f32.mrf.mxu2  ;;  %v7075_v55 = vpop.f32.mrf.mxu1 }
 0xbb6   :  { %v7077_v36 = vpop.f32.mrf.mxu2  ;;  %v7079_v56 = vpop.f32.mrf.mxu1 }
 0xbbe   :  { %v7081_v16 = vpop.f32.mrf.mxu2  ;;  %v7083_v1 = vpop.f32.mrf.mxu1 }
 0xbe8   :  { %v7030_v42 = vpop.f32.mrf.mxu0  ;;  %v7087_v24 = vpop.f32.mrf.mxu1 }
 0xbe9   :  { %7332 = vst [vmem:[#allocation16_spill] sm:$0xff] %v7087_v24 }
 0xbf0   :  { %v7032_v62 = vpop.f32.mrf.mxu0 }
 0xbf1   :  { %7331 = vst [vmem:[#allocation17_spill] sm:$0xff] %v7032_v62 }
 0xbf8   :  { %v3059_v59 = vpop.f32.mrf.mxu0 }
 0xbf9   :  { %v3106_v12 = vadd.f32 %v7037_v50, %v3059_v59  ;;  %v7085_v59 = vpop.f32.mrf.mxu2 }
 0xbfb   :  { %v3107_v54 = vmul.f32 %v3106_v12, %v3084_v61  ;;  %v7091_v61 = vpop.f32.mrf.mxu1 }
 0xbfc   :  { %7334 = vst [vmem:[#allocation18_spill] sm:$0xff] %v7091_v61 }
 0xbfd   :  { %v3108_v22 = vadd.f32 %v3107_v54, %v2817_v48  ;;  %v2761_v54 = vadd.f32 %v7009_v8, %v7014_v19 }
 0xbff   :  { %4840 = vtanh.f32 %v3108_v22 }
 0xc00   :  { %v3061_v34 = vpop.f32.mrf.mxu0 }
 0xc01   :  { %v7089_v12 = vpop.f32.mrf.mxu2  ;;  %v2790_v34 = vadd.f32 %v2789_v58, %v7022_v15 }
 0xc02   :  { %7333 = vst [vmem:[#allocation14_spill] sm:$0xff] %v7089_v12 }
 0xc05   :  { %v4841_v5 = vpop.eup %4840 }
 0xc06   :  { %v3110_v10 = vsub.f32 0.0, %v4841_v5 }
 0xc08   :  { %v3111_v63 = vmul.f32 %v3110_v10, %v3104_v39 }
 0xc09   :  { %v7093_v48 = vpop.f32.mrf.mxu2 }
 0xc0a   :  { %v7043_v27 = vadd.f32 %v4841_v5, %v3111_v63  ;;  %7335 = vst [vmem:[#allocation15_spill] sm:$0xff] %v7093_v48 }
 0xc0c   :  { %v3114_v38 = vpack.c.bf16 %v7043_v27, %v7043_v27 }
 0xc0e   :  { %3123 = vmatmul.bf16.vlgmr.msrb.gmra.mxu1 %v3114_v38  ;;  %3136 = vmatmul.bf16.vlgmr.msra.gmra.mxu2 %v3114_v38 }
 0xc0f   :  { %3149 = vmatmul.bf16.vlgmr.msra.gmra.mxu3 %v3114_v38  ;;  %3325 = vmatpush.bf16.msrb.mxu1 %v6886_v41 }
 0xc10   :  { %3391 = vmatpush.bf16.msra.mxu2 %v6563_v17  ;;  %3404 = vmatpush.bf16.msra.mxu3 %v6778_v51 }
 0xc13   :  { %3326 = vmatpush.bf16.msrb.mxu1 %v6897_v18 }
 0xc14   :  { %3392 = vmatpush.bf16.msra.mxu2 %v6574_v13  ;;  %3405 = vmatpush.bf16.msra.mxu3 %v6788_v30 }
 0xc17   :  { %3327 = vmatpush.bf16.msrb.mxu1 %v6908_v46 }
 0xc18   :  { %3393 = vmatpush.bf16.msra.mxu2 %v6587_v49  ;;  %3406 = vmatpush.bf16.msra.mxu3 %v6799_v11 }
 0xc1b   :  { %3328 = vmatpush.bf16.msrb.mxu1 %v6922_v31 }
 0xc1c   :  { %3394 = vmatpush.bf16.msra.mxu2 %v6596_v53  ;;  %3407 = vmatpush.bf16.msra.mxu3 %v6810_v52 }
 0xc1f   :  { %3329 = vmatpush.bf16.msrb.mxu1 %v6937_v45 }
 0xc20   :  { %3395 = vmatpush.bf16.msra.mxu2 %v6620_v35  ;;  %3408 = vmatpush.bf16.msra.mxu3 %v6821_v0 }
 0xc23   :  { %3330 = vmatpush.bf16.msrb.mxu1 %v6950_v29 }
 0xc24   :  { %3396 = vmatpush.bf16.msra.mxu2 %v6638_v47  ;;  %3409 = vmatpush.bf16.msra.mxu3 %v6835_v25 }
 0xc27   :  { %3331 = vmatpush.bf16.msrb.mxu1 %v6959_v2 }
 0xc28   :  { %3397 = vmatpush.bf16.msra.mxu2 %v6674_v3  ;;  %3410 = vmatpush.bf16.msra.mxu3 %v6846_v40 }
 0xc2b   :  { %3332 = vmatpush.bf16.msrb.mxu1 %v6975_v23 }
 0xc2c   :  { %3398 = vmatpush.bf16.msra.mxu2 %v6686_v6  ;;  %3411 = vmatpush.bf16.msra.mxu3 %v6857_v14 }
 0xc8b   :  { %v3124_v4 = vpop.f32.mrf.mxu1 }
 0xc8c   :  { %v3157_v22 = vadd.f32 %v3124_v4, %v2761_v54 }
 0xc8e   :  { %v4494_v33 = vmul.f32 -1.442695, %v3157_v22 }
 0xc90   :  { %4842 = vpow2.f32 %v4494_v33 }
 0xc91   :  { %v3137_v21 = vpop.f32.mrf.mxu2 }
 0xc92   :  { %v3177_v9 = vadd.f32 %v3137_v21, %v2790_v34  ;;  %v3150_v44 = vpop.f32.mrf.mxu3 }
 0xc93   :  { %v3126_v5 = vpop.f32.mrf.mxu1 }
 0xc94   :  { %v4495_v28 = vmul.f32 -1.442695, %v3177_v9 }
 0xc96   :  { %v4843_v10 = vpop.eup %4842  ;;  %4844 = vpow2.f32 %v4495_v28 }
 0xc97   :  { %v3161_v39 = vadd.f32 1.0, %v4843_v10 }
 0xc99   :  { %4846 = vrcp.f32 %v3161_v39  ;;  %v3139_v63 = vpop.f32.mrf.mxu2  ;;  %v3173_v22 = vand.u32 2147483648, %v3161_v39  ;;  %v3171_v33 = vand.u32 2147483647, %v3161_v39  ;;  %vm3167_vm9 = vweird.f32 %v3161_v39 }
 0xc9a   :  { %v3152_v38 = vpop.f32.mrf.mxu3  ;;  %v3197_v63 = vadd.f32 %v7037_v50, %v3150_v44 }
 0xc9b   :  { %v3174_v9 = vor.u32 1.1754944e-38, %v3173_v22  ;;  %vm3172_vm11 = vcmp.eq.f32.partialorder %v3171_v33, 8.507059e+37  ;;  %v2819_v38 = vadd.f32 %v2818_v60, %v7039_v37 }
 0xc9c   :  { %v4845_v48 = vpop.eup %4844 }
 0xc9d   :  { %v3181_v62 = vadd.f32 1.0, %v4845_v48 }
 0xc9f   :  { %v4847_v8 = vpop.eup %4846  ;;  %4848 = vrcp.f32 %v3181_v62  ;;  %v3193_v24 = vand.u32 2147483648, %v3181_v62  ;;  %vm3187_vm13 = vweird.f32 %v3181_v62 }
 0xca0   :  { %v3163_v54 = vmul.f32 %v4847_v8, %v3161_v39  ;;  %vm3168_vm8 = vweird.f32 %v4847_v8 }
 0xca1   :  { %vm3169_vm10 = vmor %vm3167_vm9, %vm3168_vm8 }
 0xca2   :  { %v3164_v4 = vsub.f32 1.0, %v3163_v54 }
 0xca4   :  { %v3165_v58 = vmul.f32 %v4847_v8, %v3164_v4 }
 0xca5   :  { %v4849_v34 = vpop.eup %4848 }
 0xca6   :  { %v3183_v21 = vmul.f32 %v4849_v34, %v3181_v62  ;;  %v3166_v5 = vadd.f32 %v4847_v8, %v3165_v58  ;;  %vm3188_vm12 = vweird.f32 %v4849_v34  ;;  %v3191_v58 = vand.u32 2147483647, %v3181_v62 }
 0xca7   :  { %vm3189_vm14 = vmor %vm3187_vm13, %vm3188_vm12  ;;  %v2764_v62 = vadd.f32 %v7016_v20, %v7014_v19 }
 0xca8   :  { %v3184_v28 = vsub.f32 1.0, %v3183_v21  ;;  %v3170_v10 = vsel %vm3169_vm10, %v4847_v8, %v3166_v5  ;;  %v3194_v21 = vor.u32 1.1754944e-38, %v3193_v24  ;;  %vm3192_vm15 = vcmp.eq.f32.partialorder %v3191_v58, 8.507059e+37 }
 0xca9   :  { %v3175_v48 = vsel %vm3172_vm11, %v3174_v9, %v3170_v10  ;;  %v2793_v24 = vadd.f32 %v7071_v57, %v7022_v15 }
 0xcaa   :  { %v3198_v61 = vmul.f32 %v3197_v63, %v3175_v48  ;;  %v3185_v54 = vmul.f32 %v4849_v34, %v3184_v28 }
 0xcac   :  { %v3199_v12 = vadd.f32 %v3198_v61, %v2819_v38  ;;  %v3186_v4 = vadd.f32 %v4849_v34, %v3185_v54 }
 0xcae   :  { %4850 = vtanh.f32 %v3199_v12  ;;  %v3190_v39 = vsel %vm3189_vm14, %v4849_v34, %v3186_v4 }
 0xcaf   :  { %v3195_v44 = vsel %vm3192_vm15, %v3194_v21, %v3190_v39 }
 0xcb4   :  { %v4851_v22 = vpop.eup %4850 }
 0xcb5   :  { %v3201_v8 = vsub.f32 %v7043_v27, %v4851_v22 }
 0xcb7   :  { %v3202_v33 = vmul.f32 %v3201_v8, %v3195_v44 }
 0xcb9   :  { %v7101_v5 = vadd.f32 %v4851_v22, %v3202_v33 }
 0xcbb   :  { %v3206_v60 = vpack.c.bf16 %v7101_v5, %v7101_v5 }
 0xcbd   :  { %3215 = vmatmul.bf16.vlgmr.msrb.gmra.mxu0 %v3206_v60  ;;  %3228 = vmatmul.bf16.vlgmr.msra.gmra.mxu1 %v3206_v60 }
 0xcbe   :  { %3241 = vmatmul.bf16.vlgmr.msrb.gmra.mxu2 %v3206_v60  ;;  %3417 = vmatpush.bf16.msrb.mxu0 %v6886_v41 }
 0xcbf   :  { %3483 = vmatpush.bf16.msra.mxu1 %v6563_v17  ;;  %3496 = vmatpush.bf16.msrb.mxu2 %v6778_v51 }
 0xcc2   :  { %3418 = vmatpush.bf16.msrb.mxu0 %v6897_v18 }
 0xcc3   :  { %3484 = vmatpush.bf16.msra.mxu1 %v6574_v13  ;;  %3497 = vmatpush.bf16.msrb.mxu2 %v6788_v30 }
 0xcc6   :  { %3419 = vmatpush.bf16.msrb.mxu0 %v6908_v46 }
 0xcc7   :  { %3485 = vmatpush.bf16.msra.mxu1 %v6587_v49  ;;  %3498 = vmatpush.bf16.msrb.mxu2 %v6799_v11 }
 0xcca   :  { %3420 = vmatpush.bf16.msrb.mxu0 %v6922_v31 }
 0xccb   :  { %3486 = vmatpush.bf16.msra.mxu1 %v6596_v53  ;;  %3499 = vmatpush.bf16.msrb.mxu2 %v6810_v52 }
 0xcce   :  { %3421 = vmatpush.bf16.msrb.mxu0 %v6937_v45 }
 0xccf   :  { %3487 = vmatpush.bf16.msra.mxu1 %v6620_v35  ;;  %3500 = vmatpush.bf16.msrb.mxu2 %v6821_v0 }
 0xcd2   :  { %3422 = vmatpush.bf16.msrb.mxu0 %v6950_v29 }
 0xcd3   :  { %3488 = vmatpush.bf16.msra.mxu1 %v6638_v47  ;;  %3501 = vmatpush.bf16.msrb.mxu2 %v6835_v25 }
 0xcd6   :  { %3423 = vmatpush.bf16.msrb.mxu0 %v6959_v2 }
 0xcd7   :  { %3489 = vmatpush.bf16.msra.mxu1 %v6674_v3  ;;  %3502 = vmatpush.bf16.msrb.mxu2 %v6846_v40 }
 0xcda   :  { %3424 = vmatpush.bf16.msrb.mxu0 %v6975_v23 }
 0xcdb   :  { %3490 = vmatpush.bf16.msra.mxu1 %v6686_v6  ;;  %3503 = vmatpush.bf16.msrb.mxu2 %v6857_v14 }
 0xd3a   :  { %v3216_v12 = vpop.f32.mrf.mxu0  ;;  %v3229_v61 = vpop.f32.mrf.mxu1 }
 0xd3b   :  { %v3249_v34 = vadd.f32 %v3216_v12, %v2764_v62  ;;  %v3269_v9 = vadd.f32 %v3229_v61, %v2793_v24 }
 0xd3d   :  { %v4496_v28 = vmul.f32 -1.442695, %v3249_v34  ;;  %v4497_v10 = vmul.f32 -1.442695, %v3269_v9 }
 0xd3f   :  { %4852 = vpow2.f32 %v4496_v28 }
 0xd40   :  { %4854 = vpow2.f32 %v4497_v10  ;;  %v2822_v10 = vadd.f32 %v7073_v26, %v7039_v37 }
 0xd41   :  { %v3242_v63 = vpop.f32.mrf.mxu2 }
 0xd42   :  { %v3218_v48 = vpop.f32.mrf.mxu0  ;;  %v3231_v38 = vpop.f32.mrf.mxu1  ;;  %v3289_v9 = vadd.f32 %v7037_v50, %v3242_v63 }
 0xd45   :  { %v4853_v54 = vpop.eup %4852 }
 0xd46   :  { %v4855_v4 = vpop.eup %4854  ;;  %v3253_v58 = vadd.f32 1.0, %v4853_v54 }
 0xd47   :  { %v3273_v39 = vadd.f32 1.0, %v4855_v4 }
 0xd48   :  { %4856 = vrcp.f32 %v3253_v58  ;;  %v3265_v33 = vand.u32 2147483648, %v3253_v58  ;;  %v3263_v62 = vand.u32 2147483647, %v3253_v58  ;;  %vm3259_vm2 = vweird.f32 %v3253_v58 }
 0xd49   :  { %4858 = vrcp.f32 %v3273_v39  ;;  %v3244_v20 = vpop.f32.mrf.mxu2  ;;  %vm3279_vm7 = vweird.f32 %v3273_v39 }
 0xd4a   :  { %v3266_v61 = vor.u32 1.1754944e-38, %v3265_v33  ;;  %vm3264_vm4 = vcmp.eq.f32.partialorder %v3263_v62, 8.507059e+37  ;;  %v3285_v20 = vand.u32 2147483648, %v3273_v39 }
 0xd4e   :  { %v4857_v22 = vpop.eup %4856 }
 0xd4f   :  { %v4859_v57 = vpop.eup %4858  ;;  %v3255_v21 = vmul.f32 %v4857_v22, %v3253_v58  ;;  %vm3260_vm1 = vweird.f32 %v4857_v22  ;;  %v3283_v58 = vand.u32 2147483647, %v3273_v39 }
 0xd50   :  { %v3275_v44 = vmul.f32 %v4859_v57, %v3273_v39  ;;  %vm3261_vm3 = vmor %vm3259_vm2, %vm3260_vm1  ;;  %vm3280_vm6 = vweird.f32 %v4859_v57  ;;  %v2795_v39 = vadd.f32 %v7075_v55, %v7022_v15 }
 0xd51   :  { %v3256_v8 = vsub.f32 1.0, %v3255_v21  ;;  %vm3281_vm8 = vmor %vm3279_vm7, %vm3280_vm6  ;;  %vm3284_vm9 = vcmp.eq.f32.partialorder %v3283_v58, 8.507059e+37 }
 0xd52   :  { %v3276_v12 = vsub.f32 1.0, %v3275_v44 }
 0xd53   :  { %v3257_v60 = vmul.f32 %v4857_v22, %v3256_v8 }
 0xd54   :  { %v3277_v38 = vmul.f32 %v4859_v57, %v3276_v12 }
 0xd55   :  { %v3258_v24 = vadd.f32 %v4857_v22, %v3257_v60 }
 0xd56   :  { %v3278_v4 = vadd.f32 %v4859_v57, %v3277_v38 }
 0xd57   :  { %v3262_v34 = vsel %vm3261_vm3, %v4857_v22, %v3258_v24  ;;  %v3286_v22 = vor.u32 1.1754944e-38, %v3285_v20 }
 0xd58   :  { %v3267_v28 = vsel %vm3264_vm4, %v3266_v61, %v3262_v34  ;;  %v3282_v21 = vsel %vm3281_vm8, %v4859_v57, %v3278_v4  ;;  %v2766_v61 = vadd.f32 %v7020_v32, %v7014_v19 }
 0xd59   :  { %v3290_v48 = vmul.f32 %v3289_v9, %v3267_v28  ;;  %v3287_v44 = vsel %vm3284_vm9, %v3286_v22, %v3282_v21 }
 0xd5b   :  { %v3291_v54 = vadd.f32 %v3290_v48, %v2822_v10 }
 0xd5d   :  { %4860 = vtanh.f32 %v3291_v54 }
 0xd63   :  { %v4861_v8 = vpop.eup %4860 }
 0xd64   :  { %v3293_v63 = vsub.f32 %v7101_v5, %v4861_v8 }
 0xd66   :  { %v3294_v33 = vmul.f32 %v3293_v63, %v3287_v44 }
 0xd68   :  { %v7137_v60 = vadd.f32 %v4861_v8, %v3294_v33 }
 0xd6a   :  { %v3298_v26 = vpack.c.bf16 %v7137_v60, %v7137_v60 }
 0xd6c   :  { %3307 = vmatmul.bf16.vlgmr.msrb.gmra.mxu3 %v3298_v26  ;;  %3320 = vmatmul.bf16.vlgmr.msra.gmra.mxu0 %v3298_v26 }
 0xd6d   :  { %3333 = vmatmul.bf16.vlgmr.msrb.gmra.mxu1 %v3298_v26  ;;  %3509 = vmatpush.bf16.msrb.mxu3 %v6886_v41 }
 0xd6e   :  { %3575 = vmatpush.bf16.msra.mxu0 %v6563_v17  ;;  %3588 = vmatpush.bf16.msrb.mxu1 %v6778_v51 }
 0xd71   :  { %3510 = vmatpush.bf16.msrb.mxu3 %v6897_v18 }
 0xd72   :  { %3576 = vmatpush.bf16.msra.mxu0 %v6574_v13  ;;  %3589 = vmatpush.bf16.msrb.mxu1 %v6788_v30 }
 0xd75   :  { %3511 = vmatpush.bf16.msrb.mxu3 %v6908_v46 }
 0xd76   :  { %3577 = vmatpush.bf16.msra.mxu0 %v6587_v49  ;;  %3590 = vmatpush.bf16.msrb.mxu1 %v6799_v11 }
 0xd79   :  { %3512 = vmatpush.bf16.msrb.mxu3 %v6922_v31 }
 0xd7a   :  { %3578 = vmatpush.bf16.msra.mxu0 %v6596_v53  ;;  %3591 = vmatpush.bf16.msrb.mxu1 %v6810_v52 }
 0xd7d   :  { %3513 = vmatpush.bf16.msrb.mxu3 %v6937_v45 }
 0xd7e   :  { %3579 = vmatpush.bf16.msra.mxu0 %v6620_v35  ;;  %3592 = vmatpush.bf16.msrb.mxu1 %v6821_v0 }
 0xd81   :  { %3514 = vmatpush.bf16.msrb.mxu3 %v6950_v29 }
 0xd82   :  { %3580 = vmatpush.bf16.msra.mxu0 %v6638_v47  ;;  %3593 = vmatpush.bf16.msrb.mxu1 %v6835_v25 }
 0xd85   :  { %3515 = vmatpush.bf16.msrb.mxu3 %v6959_v2 }
 0xd86   :  { %3581 = vmatpush.bf16.msra.mxu0 %v6674_v3  ;;  %3594 = vmatpush.bf16.msrb.mxu1 %v6846_v40 }
 0xd89   :  { %3516 = vmatpush.bf16.msrb.mxu3 %v6975_v23 }
 0xd8a   :  { %3582 = vmatpush.bf16.msra.mxu0 %v6686_v6  ;;  %3595 = vmatpush.bf16.msrb.mxu1 %v6857_v14 }
 0xde9   :  { %v3321_v57 = vpop.f32.mrf.mxu0 }
 0xdea   :  { %v3361_v62 = vadd.f32 %v3321_v57, %v2795_v39  ;;  %v3334_v24 = vpop.f32.mrf.mxu1 }
 0xdec   :  { %v4499_v12 = vmul.f32 -1.442695, %v3361_v62  ;;  %v3381_v62 = vadd.f32 %v7037_v50, %v3334_v24 }
 0xdee   :  { %4862 = vpow2.f32 %v4499_v12 }
 0xdef   :  { %v3308_v34 = vpop.f32.mrf.mxu3 }
 0xdf0   :  { %v3341_v9 = vadd.f32 %v3308_v34, %v2766_v61  ;;  %v2824_v34 = vadd.f32 %v7077_v36, %v7039_v37 }
 0xdf1   :  { %v3323_v28 = vpop.f32.mrf.mxu0 }
 0xdf2   :  { %v4498_v10 = vmul.f32 -1.442695, %v3341_v9  ;;  %v3336_v48 = vpop.f32.mrf.mxu1 }
 0xdf4   :  { %4864 = vpow2.f32 %v4498_v10  ;;  %v4863_v38 = vpop.eup %4862 }
 0xdf5   :  { %v3365_v20 = vadd.f32 1.0, %v4863_v38 }
 0xdf7   :  { %v3310_v54 = vpop.f32.mrf.mxu3  ;;  %v3377_v38 = vand.u32 2147483648, %v3365_v20  ;;  %vm3371_vm15 = vweird.f32 %v3365_v20 }
 0xdf8   :  { %v3375_v54 = vand.u32 2147483647, %v3365_v20 }
 0xdfa   :  { %v4865_v4 = vpop.eup %4864  ;;  %vm3376_vm2 = vcmp.eq.f32.partialorder %v3375_v54, 8.507059e+37 }
 0xdfb   :  { %v3345_v58 = vadd.f32 1.0, %v4865_v4 }
 0xdfd   :  { %4866 = vrcp.f32 %v3345_v58  ;;  %v3357_v32 = vand.u32 2147483648, %v3345_v58  ;;  %v3355_v33 = vand.u32 2147483647, %v3345_v58  ;;  %vm3351_vm11 = vweird.f32 %v3345_v58 }
 0xdfe   :  { %4868 = vrcp.f32 %v3365_v20 }
 0xdff   :  { %v3358_v57 = vor.u32 1.1754944e-38, %v3357_v32  ;;  %vm3356_vm13 = vcmp.eq.f32.partialorder %v3355_v33, 8.507059e+37 }
 0xe03   :  { %v4867_v55 = vpop.eup %4866 }
 0xe04   :  { %v4869_v21 = vpop.eup %4868  ;;  %v3347_v8 = vmul.f32 %v4867_v55, %v3345_v58  ;;  %vm3352_vm10 = vweird.f32 %v4867_v55 }
 0xe05   :  { %v3367_v63 = vmul.f32 %v4869_v21, %v3365_v20  ;;  %vm3353_vm12 = vmor %vm3351_vm11, %vm3352_vm10  ;;  %vm3372_vm14 = vweird.f32 %v4869_v21 }
 0xe06   :  { %v3348_v22 = vsub.f32 1.0, %v3347_v8  ;;  %vm3373_vm1 = vmor %vm3371_vm15, %vm3372_vm14  ;;  %v3378_v8 = vor.u32 1.1754944e-38, %v3377_v38 }
 0xe07   :  { %v3368_v39 = vsub.f32 1.0, %v3367_v63 }
 0xe08   :  { %v3349_v44 = vmul.f32 %v4867_v55, %v3348_v22 }
 0xe09   :  { %v3369_v28 = vmul.f32 %v4869_v21, %v3368_v39 }
 0xe0a   :  { %v3350_v26 = vadd.f32 %v4867_v55, %v3349_v44 }
 0xe0b   :  { %v3370_v48 = vadd.f32 %v4869_v21, %v3369_v28 }
 0xe0c   :  { %v3354_v12 = vsel %vm3353_vm12, %v4867_v55, %v3350_v26 }
 0xe0d   :  { %v3359_v61 = vsel %vm3356_vm13, %v3358_v57, %v3354_v12  ;;  %v3374_v4 = vsel %vm3373_vm1, %v4869_v21, %v3370_v48 }
 0xe0e   :  { %v3382_v9 = vmul.f32 %v3381_v62, %v3359_v61  ;;  %v3379_v55 = vsel %vm3376_vm2, %v3378_v8, %v3374_v4 }
 0xe10   :  { %v3383_v10 = vadd.f32 %v3382_v9, %v2824_v34  ;;  %v2827_v9 = vadd.f32 %v7081_v16, %v7039_v37 }
 0xe12   :  { %4870 = vtanh.f32 %v3383_v10 }
 0xe18   :  { %v4871_v58 = vpop.eup %4870 }
 0xe19   :  { %v3385_v24 = vsub.f32 %v7137_v60, %v4871_v58 }
 0xe1b   :  { %v3386_v22 = vmul.f32 %v3385_v24, %v3379_v55 }
 0xe1d   :  { %v7173_v63 = vadd.f32 %v4871_v58, %v3386_v22 }
 0xe1f   :  { %v3390_v36 = vpack.c.bf16 %v7173_v63, %v7173_v63 }
 0xe21   :  { %3399 = vmatmul.bf16.vlgmr.msra.gmra.mxu2 %v3390_v36  ;;  %3412 = vmatmul.bf16.vlgmr.msra.gmra.mxu3 %v3390_v36 }
 0xe22   :  { %3425 = vmatmul.bf16.vlgmr.msrb.gmra.mxu0 %v3390_v36  ;;  %3601 = vmatpush.bf16.msra.mxu2 %v6886_v41 }
 0xe23   :  { %3667 = vmatpush.bf16.msra.mxu3 %v6563_v17  ;;  %3680 = vmatpush.bf16.msrb.mxu0 %v6778_v51 }
 0xe26   :  { %3602 = vmatpush.bf16.msra.mxu2 %v6897_v18 }
 0xe27   :  { %3668 = vmatpush.bf16.msra.mxu3 %v6574_v13  ;;  %3681 = vmatpush.bf16.msrb.mxu0 %v6788_v30  ;;  %v2769_v13 = vadd.f32 %v7025_v7, %v7014_v19 }
 0xe2a   :  { %3603 = vmatpush.bf16.msra.mxu2 %v6908_v46 }
 0xe2b   :  { %3669 = vmatpush.bf16.msra.mxu3 %v6587_v49  ;;  %3682 = vmatpush.bf16.msrb.mxu0 %v6799_v11  ;;  %v2798_v49 = vadd.f32 %v7079_v56, %v7022_v15 }
 0xe2e   :  { %3604 = vmatpush.bf16.msra.mxu2 %v6922_v31 }
 0xe2f   :  { %3670 = vmatpush.bf16.msra.mxu3 %v6596_v53  ;;  %3683 = vmatpush.bf16.msrb.mxu0 %v6810_v52 }
 0xe32   :  { %3605 = vmatpush.bf16.msra.mxu2 %v6937_v45 }
 0xe33   :  { %3671 = vmatpush.bf16.msra.mxu3 %v6620_v35  ;;  %3684 = vmatpush.bf16.msrb.mxu0 %v6821_v0 }
 0xe36   :  { %3606 = vmatpush.bf16.msra.mxu2 %v6950_v29 }
 0xe37   :  { %3672 = vmatpush.bf16.msra.mxu3 %v6638_v47  ;;  %3685 = vmatpush.bf16.msrb.mxu0 %v6835_v25 }
 0xe3a   :  { %3607 = vmatpush.bf16.msra.mxu2 %v6959_v2 }
 0xe3b   :  { %3673 = vmatpush.bf16.msra.mxu3 %v6674_v3  ;;  %3686 = vmatpush.bf16.msrb.mxu0 %v6846_v40 }
 0xe3e   :  { %3608 = vmatpush.bf16.msra.mxu2 %v6975_v23 }
 0xe3f   :  { %3674 = vmatpush.bf16.msra.mxu3 %v6686_v6  ;;  %3687 = vmatpush.bf16.msrb.mxu0 %v6857_v14 }
 0xe9f   :  { %v3426_v17 = vpop.f32.mrf.mxu0 }
 0xea0   :  { %v3473_v12 = vadd.f32 %v7037_v50, %v3426_v17 }
 0xea4   :  { %v3400_v53 = vpop.f32.mrf.mxu2  ;;  %v3413_v35 = vpop.f32.mrf.mxu3 }
 0xea5   :  { %v3433_v47 = vadd.f32 %v3400_v53, %v2769_v13  ;;  %v3453_v51 = vadd.f32 %v3413_v35, %v2798_v49  ;;  %v2771_v13 = vadd.f32 %v7028_v43, %v7014_v19 }
 0xea7   :  { %v4500_v3 = vmul.f32 -1.442695, %v3433_v47  ;;  %v4501_v30 = vmul.f32 -1.442695, %v3453_v51  ;;  %v3428_v11 = vpop.f32.mrf.mxu0 }
 0xea9   :  { %4872 = vpow2.f32 %v4500_v3 }
 0xeaa   :  { %4874 = vpow2.f32 %v4501_v30 }
 0xeac   :  { %v3402_v52 = vpop.f32.mrf.mxu2  ;;  %v3415_v6 = vpop.f32.mrf.mxu3 }
 0xeaf   :  { %v4873_v0 = vpop.eup %4872 }
 0xeb0   :  { %v4875_v25 = vpop.eup %4874  ;;  %v3437_v40 = vadd.f32 1.0, %v4873_v0 }
 0xeb1   :  { %v3457_v14 = vadd.f32 1.0, %v4875_v25 }
 0xeb2   :  { %4876 = vrcp.f32 %v3437_v40  ;;  %v3449_v32 = vand.u32 2147483648, %v3437_v40  ;;  %v3447_v26 = vand.u32 2147483647, %v3437_v40  ;;  %vm3443_vm4 = vweird.f32 %v3437_v40 }
 0xeb3   :  { %4878 = vrcp.f32 %v3457_v14  ;;  %v3469_v54 = vand.u32 2147483648, %v3457_v14  ;;  %vm3463_vm9 = vweird.f32 %v3457_v14  ;;  %v3467_v4 = vand.u32 2147483647, %v3457_v14 }
 0xeb4   :  { %v3450_v57 = vor.u32 1.1754944e-38, %v3449_v32  ;;  %vm3448_vm7 = vcmp.eq.f32.partialorder %v3447_v26, 8.507059e+37 }
 0xeb5   :  { %v3470_v24 = vor.u32 1.1754944e-38, %v3469_v54  ;;  %vm3468_vm11 = vcmp.eq.f32.partialorder %v3467_v4, 8.507059e+37  ;;  %v2774_v54 = vadd.f32 %v7030_v42, %v7014_v19  ;;  %v7336_v4 = vld [vmem:[#allocation16_spill] sm:$0xff] }
 0xeb8   :  { %v4877_v7 = vpop.eup %4876 }
 0xeb9   :  { %v4879_v20 = vpop.eup %4878  ;;  %v3439_v56 = vmul.f32 %v4877_v7, %v3437_v40  ;;  %vm3444_vm3 = vweird.f32 %v4877_v7 }
 0xeba   :  { %v3459_v44 = vmul.f32 %v4879_v20, %v3457_v14  ;;  %vm3445_vm6 = vmor %vm3443_vm4, %vm3444_vm3  ;;  %vm3464_vm8 = vweird.f32 %v4879_v20 }
 0xebb   :  { %v3440_v21 = vsub.f32 1.0, %v3439_v56  ;;  %vm3465_vm10 = vmor %vm3463_vm9, %vm3464_vm8 }
 0xebc   :  { %v3460_v62 = vsub.f32 1.0, %v3459_v44  ;;  %v2829_v44 = vadd.f32 %v7085_v59, %v7039_v37 }
 0xebd   :  { %v3441_v33 = vmul.f32 %v4877_v7, %v3440_v21 }
 0xebe   :  { %v3461_v10 = vmul.f32 %v4879_v20, %v3460_v62 }
 0xebf   :  { %v3442_v39 = vadd.f32 %v4877_v7, %v3441_v33 }
 0xec0   :  { %v3462_v38 = vadd.f32 %v4879_v20, %v3461_v10 }
 0xec1   :  { %v3446_v61 = vsel %vm3445_vm6, %v4877_v7, %v3442_v39 }
 0xec2   :  { %v3451_v34 = vsel %vm3448_vm7, %v3450_v57, %v3446_v61  ;;  %v3466_v58 = vsel %vm3465_vm10, %v4879_v20, %v3462_v38 }
 0xec3   :  { %v3474_v28 = vmul.f32 %v3473_v12, %v3451_v34  ;;  %v3471_v22 = vsel %vm3468_vm11, %v3470_v24, %v3466_v58  ;;  %v2803_v58 = vadd.f32 %v7336_v4, %v7022_v15 }
 0xec5   :  { %v3475_v48 = vadd.f32 %v3474_v28, %v2827_v9 }
 0xec7   :  { %4880 = vtanh.f32 %v3475_v48 }
 0xecd   :  { %v4881_v8 = vpop.eup %4880 }
 0xece   :  { %v3477_v55 = vsub.f32 %v7173_v63, %v4881_v8 }
 0xed0   :  { %v3478_v36 = vmul.f32 %v3477_v55, %v3471_v22 }
 0xed2   :  { %v7209_v17 = vadd.f32 %v4881_v8, %v3478_v36 }
 0xed4   :  { %v3482_v16 = vpack.c.bf16 %v7209_v17, %v7209_v17 }
 0xed6   :  { %3491 = vmatmul.bf16.vlgmr.msra.gmra.mxu1 %v3482_v16  ;;  %3504 = vmatmul.bf16.vlgmr.msrb.gmra.mxu2 %v3482_v16 }
 0xed7   :  { %3517 = vmatmul.bf16.vlgmr.msrb.gmra.mxu3 %v3482_v16  ;;  %3693 = vmatpush.bf16.msra.mxu1 %v6886_v41 }
 0xedb   :  { %3694 = vmatpush.bf16.msra.mxu1 %v6897_v18  ;;  %v2800_v18 = vadd.f32 %v7083_v1, %v7022_v15 }
 0xedf   :  { %3695 = vmatpush.bf16.msra.mxu1 %v6908_v46 }
 0xee3   :  { %3696 = vmatpush.bf16.msra.mxu1 %v6922_v31 }
 0xee7   :  { %3697 = vmatpush.bf16.msra.mxu1 %v6937_v45 }
 0xeeb   :  { %3698 = vmatpush.bf16.msra.mxu1 %v6950_v29 }
 0xeef   :  { %3699 = vmatpush.bf16.msra.mxu1 %v6959_v2 }
 0xef3   :  { %3700 = vmatpush.bf16.msra.mxu1 %v6975_v23 }
 0xf53   :  { %v3492_v49 = vpop.f32.mrf.mxu1 }
 0xf54   :  { %v3525_v53 = vadd.f32 %v3492_v49, %v2771_v13 }
 0xf56   :  { %v4502_v41 = vmul.f32 -1.442695, %v3525_v53 }
 0xf58   :  { %4882 = vpow2.f32 %v4502_v41 }
 0xf59   :  { %v3505_v46 = vpop.f32.mrf.mxu2 }
 0xf5a   :  { %v3545_v31 = vadd.f32 %v3505_v46, %v2800_v18  ;;  %v3518_v35 = vpop.f32.mrf.mxu3 }
 0xf5b   :  { %v3494_v45 = vpop.f32.mrf.mxu1  ;;  %v3565_v21 = vadd.f32 %v7037_v50, %v3518_v35 }
 0xf5c   :  { %v4503_v47 = vmul.f32 -1.442695, %v3545_v31 }
 0xf5e   :  { %v4883_v29 = vpop.eup %4882  ;;  %4884 = vpow2.f32 %v4503_v47 }
 0xf5f   :  { %v3529_v2 = vadd.f32 1.0, %v4883_v29 }
 0xf61   :  { %4886 = vrcp.f32 %v3529_v2  ;;  %v3507_v23 = vpop.f32.mrf.mxu2  ;;  %v3541_v6 = vand.u32 2147483648, %v3529_v2  ;;  %v3539_v0 = vand.u32 2147483647, %v3529_v2  ;;  %vm3535_vm13 = vweird.f32 %v3529_v2 }
 0xf62   :  { %v3520_v51 = vpop.f32.mrf.mxu3 }
 0xf63   :  { %v3542_v7 = vor.u32 1.1754944e-38, %v3541_v6  ;;  %vm3540_vm15 = vcmp.eq.f32.partialorder %v3539_v0, 8.507059e+37  ;;  %v7337_v0 = vld [vmem:[#allocation14_spill] sm:$0xff] }
 0xf64   :  { %v4885_v3 = vpop.eup %4884 }
 0xf65   :  { %v3549_v43 = vadd.f32 1.0, %v4885_v3 }
 0xf67   :  { %v4887_v30 = vpop.eup %4886  ;;  %4888 = vrcp.f32 %v3549_v43  ;;  %v3561_v62 = vand.u32 2147483648, %v3549_v43  ;;  %vm3555_vm2 = vweird.f32 %v3549_v43  ;;  %v3559_v12 = vand.u32 2147483647, %v3549_v43 }
 0xf68   :  { %v3531_v11 = vmul.f32 %v4887_v30, %v3529_v2  ;;  %vm3536_vm12 = vweird.f32 %v4887_v30 }
 0xf69   :  { %vm3537_vm14 = vmor %vm3535_vm13, %vm3536_vm12  ;;  %v3562_v9 = vor.u32 1.1754944e-38, %v3561_v62  ;;  %vm3560_vm4 = vcmp.eq.f32.partialorder %v3559_v12, 8.507059e+37  ;;  %v7338_v12 = vld [vmem:[#allocation18_spill] sm:$0xff] }
 0xf6a   :  { %v3532_v52 = vsub.f32 1.0, %v3531_v11 }
 0xf6c   :  { %v3533_v1 = vmul.f32 %v4887_v30, %v3532_v52 }
 0xf6d   :  { %v4889_v25 = vpop.eup %4888 }
 0xf6e   :  { %v3551_v40 = vmul.f32 %v4889_v25, %v3549_v43  ;;  %v3534_v14 = vadd.f32 %v4887_v30, %v3533_v1  ;;  %vm3556_vm1 = vweird.f32 %v4889_v25 }
 0xf6f   :  { %vm3557_vm3 = vmor %vm3555_vm2, %vm3556_vm1 }
 0xf70   :  { %v3552_v20 = vsub.f32 1.0, %v3551_v40  ;;  %v3538_v56 = vsel %vm3537_vm14, %v4887_v30, %v3534_v14 }
 0xf71   :  { %v3543_v32 = vsel %vm3540_vm15, %v3542_v7, %v3538_v56 }
 0xf72   :  { %v3566_v33 = vmul.f32 %v3565_v21, %v3543_v32  ;;  %v3553_v26 = vmul.f32 %v4889_v25, %v3552_v20 }
 0xf74   :  { %v3567_v39 = vadd.f32 %v3566_v33, %v2829_v44  ;;  %v3554_v57 = vadd.f32 %v4889_v25, %v3553_v26 }
 0xf76   :  { %4890 = vtanh.f32 %v3567_v39  ;;  %v3558_v61 = vsel %vm3557_vm3, %v4889_v25, %v3554_v57  ;;  %v2832_v25 = vadd.f32 %v7337_v0, %v7039_v37 }
 0xf77   :  { %v3563_v10 = vsel %vm3560_vm4, %v3562_v9, %v3558_v61  ;;  %v2805_v61 = vadd.f32 %v7338_v12, %v7022_v15 }
 0xf7c   :  { %v4891_v34 = vpop.eup %4890 }
 0xf7d   :  { %v3569_v28 = vsub.f32 %v7209_v17, %v4891_v34 }
 0xf7f   :  { %v3570_v48 = vmul.f32 %v3569_v28, %v3563_v10 }
 0xf81   :  { %v7229_v38 = vadd.f32 %v4891_v34, %v3570_v48  ;;  %v7339_v48 = vld [vmem:[#allocation17_spill] sm:$0xff] }
 0xf83   :  { %v3574_v59 = vpack.c.bf16 %v7229_v38, %v7229_v38 }
 0xf85   :  { %3583 = vmatmul.bf16.vlgmr.msra.gmra.mxu0 %v3574_v59  ;;  %3596 = vmatmul.bf16.vlgmr.msrb.gmra.mxu1 %v3574_v59 }
 0xf86   :  { %3609 = vmatmul.bf16.vlgmr.msra.gmra.mxu2 %v3574_v59  ;;  %v2776_v59 = vadd.f32 %v7339_v48, %v7014_v19 }
0x1002   :  { %v3584_v8 = vpop.f32.mrf.mxu0  ;;  %v3597_v24 = vpop.f32.mrf.mxu1 }
0x1003   :  { %v3617_v55 = vadd.f32 %v3584_v8, %v2774_v54  ;;  %v3637_v22 = vadd.f32 %v3597_v24, %v2803_v58 }
0x1005   :  { %v4504_v36 = vmul.f32 -1.442695, %v3617_v55  ;;  %v4505_v16 = vmul.f32 -1.442695, %v3637_v22 }
0x1007   :  { %4892 = vpow2.f32 %v4504_v36 }
0x1008   :  { %4894 = vpow2.f32 %v4505_v16 }
0x1009   :  { %v3610_v13 = vpop.f32.mrf.mxu2 }
0x100a   :  { %v3586_v49 = vpop.f32.mrf.mxu0  ;;  %v3599_v53 = vpop.f32.mrf.mxu1  ;;  %v3657_v6 = vadd.f32 %v7037_v50, %v3610_v13 }
0x100d   :  { %v4893_v41 = vpop.eup %4892 }
0x100e   :  { %v4895_v18 = vpop.eup %4894  ;;  %v3621_v46 = vadd.f32 1.0, %v4893_v41 }
0x100f   :  { %v3641_v31 = vadd.f32 1.0, %v4895_v18 }
0x1010   :  { %4896 = vrcp.f32 %v3621_v46  ;;  %v3633_v23 = vand.u32 2147483648, %v3621_v46  ;;  %v3631_v3 = vand.u32 2147483647, %v3621_v46  ;;  %vm3627_vm7 = vweird.f32 %v3621_v46 }
0x1011   :  { %4898 = vrcp.f32 %v3641_v31  ;;  %v3612_v42 = vpop.f32.mrf.mxu2  ;;  %v3653_v56 = vand.u32 2147483648, %v3641_v31  ;;  %vm3647_vm11 = vweird.f32 %v3641_v31  ;;  %v3651_v21 = vand.u32 2147483647, %v3641_v31 }
0x1012   :  { %v3634_v11 = vor.u32 1.1754944e-38, %v3633_v23  ;;  %vm3632_vm9 = vcmp.eq.f32.partialorder %v3631_v3, 8.507059e+37 }
0x1013   :  { %v3654_v33 = vor.u32 1.1754944e-38, %v3653_v56  ;;  %vm3652_vm13 = vcmp.eq.f32.partialorder %v3651_v21, 8.507059e+37 }
0x1016   :  { %v4897_v35 = vpop.eup %4896 }
0x1017   :  { %v4899_v45 = vpop.eup %4898  ;;  %v3623_v47 = vmul.f32 %v4897_v35, %v3621_v46  ;;  %vm3628_vm6 = vweird.f32 %v4897_v35 }
0x1018   :  { %v3643_v2 = vmul.f32 %v4899_v45, %v3641_v31  ;;  %vm3629_vm8 = vmor %vm3627_vm7, %vm3628_vm6  ;;  %vm3648_vm10 = vweird.f32 %v4899_v45 }
0x1019   :  { %v3624_v29 = vsub.f32 1.0, %v3623_v47  ;;  %vm3649_vm12 = vmor %vm3647_vm11, %vm3648_vm10  ;;  %v4914_v47 = vld [vmem:[%s7295_s12] ss:$0 sm:$0xff]  ;;  %s4970_s12 = smov [#allocation8]  }
0x101a   :  { %v3644_v30 = vsub.f32 1.0, %v3643_v2  ;;  %s3833_s5 = sshll.u32 %s4970_s12, 4  ;;  %s3834_s5 = int_to_ptr.vmem [resolvable:$true] %s3833_s5 }
0x101b   :  { %v3625_v51 = vmul.f32 %v4897_v35, %v3624_v29 }
0x101c   :  { %v3645_v14 = vmul.f32 %v4899_v45, %v3644_v30 }
0x101d   :  { %v3626_v43 = vadd.f32 %v4897_v35, %v3625_v51  ;;  %v7340_v51 = vld [vmem:[#allocation15_spill] sm:$0xff] }
0x101e   :  { %v3646_v20 = vadd.f32 %v4899_v45, %v3645_v14  ;;  %v2834_v3 = vadd.f32 %v7340_v51, %v7039_v37 }
0x101f   :  { %v3630_v52 = vsel %vm3629_vm8, %v4897_v35, %v3626_v43 }
0x1020   :  { %v3635_v1 = vsel %vm3632_vm9, %v3634_v11, %v3630_v52  ;;  %v3650_v32 = vsel %vm3649_vm12, %v4899_v45, %v3646_v20  ;;  %v3773_v52 = vrot.slane %v7173_v63, 4  ;;  %v7341_v20 = vld [vmem:[#allocation12_spill] sm:$0xff] }
0x1021   :  { %v3658_v40 = vmul.f32 %v3657_v6, %v3635_v1  ;;  %v3655_v26 = vsel %vm3652_vm13, %v3654_v33, %v3650_v32 }
0x1023   :  { %v3659_v7 = vadd.f32 %v3658_v40, %v2832_v25  ;;  %v3774_v25 = vsel %vm58_vm0, %v3773_v52, %v7101_v5  ;;  %v3766_v40 = vrot.slane %v7137_v60, 4 }
0x1024   :  { %v3778_v56 = vperm.slane %v3774_v25, %v7341_v20 }
0x1025   :  { %4900 = vtanh.f32 %v3659_v7  ;;  %v3768_v5 = vsel %vm58_vm0, %v3766_v40, %v7043_v27 }
0x1026   :  { %v3791_v60 = vrot.slane %v3778_v56, 4 }
0x102b   :  { %v4901_v44 = vpop.eup %4900 }
0x102c   :  { %v3661_v50 = vsub.f32 %v7229_v38, %v4901_v44 }
0x102e   :  { %v3662_v39 = vmul.f32 %v3661_v50, %v3655_v26  ;;  %v3772_v50 = vperm.slane %v3768_v5, %v7341_v20 }
0x1030   :  { %v7241_v57 = vadd.f32 %v4901_v44, %v3662_v39  ;;  %v3792_v39 = vsel %vm58_vm0, %v3791_v60, %v3772_v50 }
0x1032   :  { %v3666_v62 = vpack.c.bf16 %v7241_v57, %v7241_v57  ;;  %v3779_v44 = vrot.slane %v7241_v57, 4 }
0x1034   :  { %3675 = vmatmul.bf16.vlgmr.msra.gmra.mxu3 %v3666_v62  ;;  %3688 = vmatmul.bf16.vlgmr.msrb.gmra.mxu0 %v3666_v62 }
0x1035   :  { %3701 = vmatmul.bf16.vlgmr.msra.gmra.mxu1 %v3666_v62  ;;  %v3780_v62 = vsel %vm58_vm0, %v3779_v44, %v7209_v17 }
0x10b1   :  { %v3689_v34 = vpop.f32.mrf.mxu0 }
0x10b2   :  { %v3729_v9 = vadd.f32 %v3689_v34, %v2805_v61  ;;  %v3702_v28 = vpop.f32.mrf.mxu1  ;;  %v3784_v34 = vperm.slane %v3780_v62, %v7341_v20 }
0x10b3   :  { %v3749_v29 = vadd.f32 %v4914_v47, %v3702_v28 }
0x10b4   :  { %v4507_v10 = vmul.f32 -1.442695, %v3729_v9 }
0x10b6   :  { %4902 = vpow2.f32 %v4507_v10 }
0x10b7   :  { %v3676_v54 = vpop.f32.mrf.mxu3 }
0x10b8   :  { %v3709_v4 = vadd.f32 %v3676_v54, %v2776_v59 }
0x10b9   :  { %v3691_v58 = vpop.f32.mrf.mxu0 }
0x10ba   :  { %v4506_v8 = vmul.f32 -1.442695, %v3709_v4  ;;  %v3704_v24 = vpop.f32.mrf.mxu1 }
0x10bc   :  { %4904 = vpow2.f32 %v4506_v8  ;;  %v4903_v55 = vpop.eup %4902 }
0x10bd   :  { %v3733_v16 = vadd.f32 1.0, %v4903_v55 }
0x10bf   :  { %v3678_v22 = vpop.f32.mrf.mxu3  ;;  %v3745_v1 = vand.u32 2147483648, %v3733_v16  ;;  %vm3739_vm4 = vweird.f32 %v3733_v16  ;;  %v3743_v0 = vand.u32 2147483647, %v3733_v16 }
0x10c1   :  { %v3746_v37 = vor.u32 1.1754944e-38, %v3745_v1  ;;  %vm3744_vm7 = vcmp.eq.f32.partialorder %v3743_v0, 8.507059e+37 }
0x10c2   :  { %v4905_v36 = vpop.eup %4904 }
0x10c3   :  { %v3713_v13 = vadd.f32 1.0, %v4905_v36 }
0x10c5   :  { %4906 = vrcp.f32 %v3713_v13  ;;  %v3725_v19 = vand.u32 2147483648, %v3713_v13  ;;  %v3723_v31 = vand.u32 2147483647, %v3713_v13  ;;  %vm3719_vm15 = vweird.f32 %v3713_v13 }
0x10c6   :  { %4908 = vrcp.f32 %v3733_v16 }
0x10c7   :  { %v3726_v45 = vor.u32 1.1754944e-38, %v3725_v19  ;;  %vm3724_vm2 = vcmp.eq.f32.partialorder %v3723_v31, 8.507059e+37 }
0x10cb   :  { %v4907_v15 = vpop.eup %4906 }
0x10cc   :  { %v4909_v49 = vpop.eup %4908  ;;  %v3715_v53 = vmul.f32 %v4907_v15, %v3713_v13  ;;  %vm3720_vm14 = vweird.f32 %v4907_v15 }
0x10cd   :  { %v3735_v18 = vmul.f32 %v4909_v49, %v3733_v16  ;;  %vm3721_vm1 = vmor %vm3719_vm15, %vm3720_vm14  ;;  %vm3740_vm3 = vweird.f32 %v4909_v49 }
0x10ce   :  { %v3716_v41 = vsub.f32 1.0, %v3715_v53  ;;  %vm3741_vm6 = vmor %vm3739_vm4, %vm3740_vm3 }
0x10cf   :  { %v3736_v35 = vsub.f32 1.0, %v3735_v18 }
0x10d0   :  { %v3717_v46 = vmul.f32 %v4907_v15, %v3716_v41 }
0x10d1   :  { %v3737_v30 = vmul.f32 %v4909_v49, %v3736_v35 }
0x10d2   :  { %v3718_v42 = vadd.f32 %v4907_v15, %v3717_v46 }
0x10d3   :  { %v3738_v6 = vadd.f32 %v4909_v49, %v3737_v30 }
0x10d4   :  { %v3722_v2 = vsel %vm3721_vm1, %v4907_v15, %v3718_v42 }
0x10d5   :  { %v3727_v23 = vsel %vm3724_vm2, %v3726_v45, %v3722_v2  ;;  %v3742_v14 = vsel %vm3741_vm6, %v4909_v49, %v3738_v6 }
0x10d6   :  { %v3750_v43 = vmul.f32 %v3749_v29, %v3727_v23  ;;  %v3747_v21 = vsel %vm3744_vm7, %v3746_v37, %v3742_v14 }
0x10d8   :  { %v3751_v11 = vadd.f32 %v3750_v43, %v2834_v3 }
0x10da   :  { %4910 = vtanh.f32 %v3751_v11 }
0x10e0   :  { %v4911_v7 = vpop.eup %4910 }
0x10e1   :  { %v3753_v63 = vsub.f32 %v7241_v57, %v4911_v7  ;;  %v7342_v57 = vld [vmem:[#allocation13_spill] sm:$0xff] }
0x10e2   :  { %v3796_v61 = vperm.slane %v3792_v39, %v7342_v57 }
0x10e3   :  { %v3754_v32 = vmul.f32 %v3753_v63, %v3747_v21 }
0x10e4   :  { %v3805_v10 = vrot.slane %v3796_v61, 4 }
0x10e5   :  { %v3755_v33 = vadd.f32 %v4911_v7, %v3754_v32 }
0x10e7   :  { %v3785_v26 = vrot.slane %v3755_v33, 4  ;;  %3815 = vst.msk [vmem:[#allocation8 + $0x4] sm:$0x3] %vm3810_vm5, %v3755_v33  ;;  %vm3807_vm5 = vcmask 261120  }
0x10e8   :  { %3841 = dma.vmem_to_hbm [thread:$0]  %s3834_s5, 96, %s3836_s15, [#allocation9], %s4971_s1, %s4971_s1, %s4972_s14  }
0x10e9   :  { %v3786_v27 = vsel %vm58_vm0, %v3785_v26, %v7229_v38 }
0x10ea   :  { %v3790_v12 = vperm.slane %v3786_v27, %v7341_v20 }
0x10ec   :  { %v3797_v9 = vrot.slane %v3790_v12, 4 }
0x10ee   :  { %v3798_v28 = vsel %vm58_vm0, %v3797_v9, %v3784_v34 }
0x10ef   :  { %v3802_v17 = vperm.slane %v3798_v28, %v7342_v57 }
0x10f1   :  { %v3803_v38 = vrot.slane %v3802_v17, 4  ;;  %v3806_v48 = vsel %vm58_vm0, %v3802_v17, %v3805_v10 }
0x10f2   :  { %3809 = vst.msk [vmem:[#allocation6 + $0x8] sm:$0xff] %vm3807_vm5, %v3806_v48 }
0x10f3   :  { %v3804_v59 = vsel %vm58_vm0, %v3803_v38, %v3796_v61 }
0x10f4   :  { %3808 = vst.msk [vmem:[#allocation6] sm:$0xff] %vm3807_vm5, %v3804_v59 }
0x10f5   :  { %3828 = dma.vmem_to_hbm [thread:$0]  %s3821_s17, 256, %s3823_s19, [#allocation7], %s4974_s8, %s4974_s8, %s4975_s9  }
0x10f6   :  { %4963 = dma.done.wait [#allocation7], 256  }
0x10f7   :  { %4964 = vsyncadd [#allocation7], 4294967040 }
0x10f8   :  { %4965 = dma.done.wait [#allocation9], 96  }
0x10f9   :  { %4966 = vsyncadd [#allocation9], 4294967200 }
0x10fa   :  { %3850 = vsyncpa [#allocation7], 1 }
0x10fb   :  { %3851 = vsyncpa [#allocation9], 1 }

</bundles_post_ra>
